<compile_context>
chip_gen: v6e
topology: v6e:2x2x1
jax: 0.10.0
libtpu: 0.0.40
codegen_flags: <defaults>
</compile_context>

<pallas_src>
import jax
import jax.numpy as jnp
from jax.experimental import pallas as pl
from jax.experimental.pallas import tpu as pltpu


def _round_up(x, m):
    return (x + m - 1) // m * m


def _resident(a):
    """Whole-array block with a constant index map (grid-invariant resident input)."""
    zeros = (0,) * a.ndim
    return pl.BlockSpec(a.shape, lambda *_: zeros)


def _bytes(*arrays):
    return int(sum(a.size * a.dtype.itemsize for a in arrays))


def _vmem_capacity_bytes():
    """Per-core VMEM capacity (generation-aware tiling); conservative fallback."""
    try:
        info = pltpu.get_tpu_info()
        for name in ("vmem_capacity_bytes", "vmem_bytes", "vmem_size_bytes"):
            v = getattr(info, name, None)
            if v:
                return int(v)
    except Exception:
        pass
    return 64 << 20  # v7x-sized conservative default


# --------------------------------------------------------------------------- #
# Fused kernel: conv1/2/3 (+BN+ReLU) -> running max over point tiles -> fc1/2/3.
#   x block:   (Bt, Nt, 4)          grid = (Bpad/Bt, Npad/Nt)
#   out block: (1, Bt, 128)         written only at the last point tile
#   acc:       VMEM (Bt, 1024) f32  resident running max across the point axis
# --------------------------------------------------------------------------- #
def _stn3d_fused_kernel(x_ref, w1_ref, b1_ref, w2_ref, b2_ref, w3_ref, b3_ref,
                        w4_ref, b4_ref, w5_ref, b5_ref, w6_ref, b6_ref,
                        o_ref, acc_ref):
    j = pl.program_id(1)

    @pl.when(j == 0)
    def _init():
        acc_ref[...] = jnp.full(acc_ref.shape, -jnp.inf, dtype=acc_ref.dtype)

    bt, nt, cin = x_ref.shape
    x = x_ref[...].reshape(bt * nt, cin)                      # (rows, 4) f32

    # conv1 + bn1 + relu -> (rows, 64)   (f32 operands; K=4 is negligible FLOPs)
    h = jnp.dot(x, w1_ref[...], preferred_element_type=jnp.float32) + b1_ref[...]
    h = jnp.maximum(h, 0.0).astype(w2_ref.dtype)
    # conv2 + bn2 + relu -> (rows, 128)
    h = jnp.dot(h, w2_ref[...], preferred_element_type=jnp.float32) + b2_ref[...]
    h = jnp.maximum(h, 0.0).astype(w3_ref.dtype)
    # conv3 + bn3 + relu -> (rows, 1024)   (dominant matmul; f32 accumulation)
    h = jnp.dot(h, w3_ref[...], preferred_element_type=jnp.float32) + b3_ref[...]
    h = jnp.maximum(h, 0.0)                                   # f32

    # fold this point tile's per-batch max into the resident accumulator
    tile_max = jnp.max(h.reshape(bt, nt, h.shape[-1]), axis=1)   # (Bt, 1024)
    acc_ref[...] = jnp.maximum(acc_ref[...], tile_max)

    # FC tail fused on the last point tile: weights are already VMEM-resident and
    # their DMA was hidden under the conv compute of earlier tiles.
    @pl.when(j == pl.num_programs(1) - 1)
    def _finalize():
        g = acc_ref[...].astype(w4_ref.dtype)
        f = jnp.dot(g, w4_ref[...], preferred_element_type=jnp.float32) + b4_ref[...]
        f = jnp.maximum(f, 0.0).astype(w5_ref.dtype)
        f = jnp.dot(f, w5_ref[...], preferred_element_type=jnp.float32) + b5_ref[...]
        f = jnp.maximum(f, 0.0).astype(w6_ref.dtype)
        o_ref[0] = (jnp.dot(f, w6_ref[...], preferred_element_type=jnp.float32)
                    + b6_ref[...]).astype(o_ref.dtype)


def stn3d_forward(x_bcn, params, *, block_n=None, block_b=None, use_bf16=True,
                  target_rows=None):
    """STN3d forward. x_bcn: (B, 4, N) float32 in PyTorch Conv1d layout -> (B, 9)."""
    B, C, N = x_bcn.shape
    (w1, b1), (w2, b2), (w3, b3), (w4, b4), (w5, b5), (w6, b6) = params

    # Conv1d(kernel_size=1) is a per-point channel matmul; keep channels on the lane
    # axis so every conv is a lane-dense (rows, Cin) @ (Cin, Cout) MXU matmul.  The
    # wrapper transpose touches only the tiny 4-channel input once; the 4->128 lane
    # padding of the x tile is accepted and included in the VMEM budget below.
    x = jnp.transpose(x_bcn, (0, 2, 1))                       # (B, N, 4)

    vmem_cap = _vmem_capacity_bytes()
    if target_rows is None:
        # Rows per grid step large enough that MXU time dwarfs the ~0.35us/step
        # pipeline overhead, capped per generation: 2048 rows (~25 MB live) on 64 MiB
        # VMEM (v7x), 4096 rows (~45 MB live) on 128 MiB VMEM (v5e/v6e).
        target_rows = 4096 if vmem_cap >= (100 << 20) else 2048
    vmem_limit = max(32 << 20, min(int(vmem_cap * 3 // 4), 112 << 20))

    # --- batch blocking ------------------------------------------------------
    # Keep >=2 blocks on the "parallel" batch axis whenever B >= 2 so both v7x
    # TensorCores are fed; prefer block_b >= 8 (full-sublane accumulator writes)
    # once B >= 16.
    if block_b is None:
        if B >= 16:
            block_b = 8
        else:
            block_b = max(1, _round_up(B, 2) // 2)
    block_b = int(block_b)
    b_pad = _round_up(B, block_b)
    if b_pad != B:
        x = jnp.pad(x, ((0, b_pad - B), (0, 0), (0, 0)))      # zero rows, sliced off
    gb = b_pad // block_b

    # --- point tiling (reduction axis, last grid dim) -------------------------
    if block_n is None:
        block_n = max(128, target_rows // block_b)
    block_n = min(_round_up(int(block_n), 8), _round_up(N, 8))
    n_pad = _round_up(N, block_n)
    if n_pad != N:
        # replicate the last point: the global max-pool is invariant to duplication.
        x = jnp.pad(x, ((0, 0), (0, n_pad - N), (0, 0)), mode="edge")
    gn = n_pad // block_n

    # bf16 operands (default on v5e/v6e/v7x) for the FLOP-heavy matmuls; the MXU runs
    # f32 as multi-pass bf16 on all three generations, so this is ~2.5-3x on conv3.
    # Accumulation stays f32 (preferred_element_type).  conv1 / fc3 stay f32.
    cast_w = (lambda w: w.astype(jnp.bfloat16)) if use_bf16 else (lambda w: w)
    w6p = jnp.pad(w6, ((0, 0), (0, 128 - w6.shape[1])))       # lane-dense fc3 output
    b6p = jnp.pad(b6, ((0, 0), (0, 128 - b6.shape[1])))
    weights = (w1, b1, cast_w(w2), b2, cast_w(w3), b3,
               cast_w(w4), b4, cast_w(w5), b5, w6p, b6p)

    cost = pl.CostEstimate(
        flops=2 * b_pad * n_pad * (C * 64 + 64 * 128 + 128 * 1024)
              + 2 * b_pad * (1024 * 512 + 512 * 256 + 256 * 128),
        transcendentals=0,
        bytes_accessed=_bytes(x, *weights) + b_pad * 128 * 4)

    out = pl.pallas_call(
        _stn3d_fused_kernel,
        out_shape=jax.ShapeDtypeStruct((gb, block_b, 128), jnp.float32),
        grid_spec=pltpu.PrefetchScalarGridSpec(
            num_scalar_prefetch=0,
            grid=(gb, gn),
            in_specs=[pl.BlockSpec((block_b, block_n, C), lambda i, j: (i, j, 0))]
                     + [_resident(a) for a in weights],
            out_specs=pl.BlockSpec((1, block_b, 128), lambda i, j: (i, 0, 0)),
            scratch_shapes=[pltpu.VMEM((block_b, 1024), jnp.float32)],
        ),
        compiler_params=pltpu.CompilerParams(
            dimension_semantics=("parallel", "arbitrary"),
            vmem_limit_bytes=vmem_limit),
        cost_estimate=cost,
    )(x, *weights)

    return out.reshape(b_pad, 128)[:B, :9]


# --------------------------------------------------------------------------- #
# Parameters (BN folded, eval-mode) and pure-JAX reference.
# --------------------------------------------------------------------------- #
def _fold_bn(w, b, gamma, beta, mean, var, eps=1e-5):
    """Fold eval-mode BatchNorm1d into a channels-last weight (Cin, Cout) + bias."""
    scale = gamma / jnp.sqrt(var + eps)
    w_eff = w * scale[None, :]
    b_eff = (b - mean) * scale + beta
    return w_eff.astype(jnp.float32), b_eff.reshape(1, -1).astype(jnp.float32)


def make_params(key):
    """Deterministic synthetic parameters matching STN3d.__init__ shapes."""
    dims = [(4, 64), (64, 128), (128, 1024), (1024, 512), (512, 256), (256, 9)]
    keys = jax.random.split(key, len(dims) * 6)
    params = []
    ki = 0
    for i, (cin, cout) in enumerate(dims):
        w = jax.random.normal(keys[ki], (cin, cout), jnp.float32) * (1.0 / jnp.sqrt(cin)); ki += 1
        b = jax.random.normal(keys[ki], (cout,), jnp.float32) * 0.05; ki += 1
        if i < 5:  # layers followed by a BatchNorm1d
            gamma = 1.0 + 0.1 * jax.random.normal(keys[ki], (cout,), jnp.float32); ki += 1
            beta = 0.05 * jax.random.normal(keys[ki], (cout,), jnp.float32); ki += 1
            mean = 0.1 * jax.random.normal(keys[ki], (cout,), jnp.float32); ki += 1
            var = jnp.abs(1.0 + 0.1 * jax.random.normal(keys[ki], (cout,), jnp.float32)); ki += 1
            params.append(_fold_bn(w, b, gamma, beta, mean, var))
        else:      # fc3 has no BN
            ki += 4
            params.append((w.astype(jnp.float32), b.reshape(1, -1).astype(jnp.float32)))
    return tuple(params)


def stn3d_reference(x_bcn, params):
    """Pure-JAX (f32, highest precision) reference of the BN-folded forward pass."""
    mm = lambda a, b: jnp.dot(a, b, precision=jax.lax.Precision.HIGHEST)
    x = jnp.transpose(x_bcn, (0, 2, 1))  # (B, N, C)
    (w1, b1), (w2, b2), (w3, b3), (w4, b4), (w5, b5), (w6, b6) = params
    h = jnp.maximum(mm(x, w1) + b1, 0.0)
    h = jnp.maximum(mm(h, w2) + b2, 0.0)
    h = jnp.maximum(mm(h, w3) + b3, 0.0)
    g = jnp.max(h, axis=1)  # (B, 1024)
    h = jnp.maximum(mm(g, w4) + b4, 0.0)
    h = jnp.maximum(mm(h, w5) + b5, 0.0)
    return mm(h, w6) + b6


if __name__ == "__main__":
    key = jax.random.PRNGKey(0)
    k_x, k_p = jax.random.split(key)

    B, C_in, N = 4, 4, 200  # small; exercises batch blocking, point tiling, padding
    x = jax.random.normal(k_x, (B, C_in, N), jnp.float32)  # PyTorch (B, C, N) layout
    params = make_params(k_p)

    ref = stn3d_reference(x, params)

    # f32 path, explicit small tiles: 2 batch blocks x 4 point tiles + edge pad,
    # exercising the running-max accumulation and the fused FC finalize.
    out = jax.block_until_ready(
        stn3d_forward(x, params, block_n=64, block_b=2, use_bf16=False))
    assert out.shape == (B, 9), out.shape
    assert jnp.allclose(out, ref, atol=5e-3, rtol=5e-3), float(jnp.max(jnp.abs(out - ref)))

    # f32 path, auto tiling (single point tile, 2 parallel batch blocks).
    out2 = jax.block_until_ready(stn3d_forward(x, params, use_bf16=False))
    assert jnp.allclose(out2, ref, atol=5e-3, rtol=5e-3), float(jnp.max(jnp.abs(out2 - ref)))

    # Default path: bf16 matmul operands on all generations, f32 accumulation.
    out_bf = jax.block_until_ready(stn3d_forward(x, params))
    assert out_bf.shape == (B, 9), out_bf.shape
    assert jnp.allclose(out_bf, ref, atol=1e-1, rtol=1e-1), float(jnp.max(jnp.abs(out_bf - ref)))

    print("KERNEL_OK")
</pallas_src>

<mosaic_0001>
module attributes {stable_mosaic.version = 11 : i64} {
  func.func @_stn3d_fused_kernel(%arg0: i32, %arg1: i32, %arg2: memref<2x64x4xf32, #tpu.memory_space<vmem>>, %arg3: memref<4x64xf32, #tpu.memory_space<vmem>>, %arg4: memref<1x64xf32, #tpu.memory_space<vmem>>, %arg5: memref<64x128xf32, #tpu.memory_space<vmem>>, %arg6: memref<1x128xf32, #tpu.memory_space<vmem>>, %arg7: memref<128x1024xf32, #tpu.memory_space<vmem>>, %arg8: memref<1x1024xf32, #tpu.memory_space<vmem>>, %arg9: memref<1024x512xf32, #tpu.memory_space<vmem>>, %arg10: memref<1x512xf32, #tpu.memory_space<vmem>>, %arg11: memref<512x256xf32, #tpu.memory_space<vmem>>, %arg12: memref<1x256xf32, #tpu.memory_space<vmem>>, %arg13: memref<256x128xf32, #tpu.memory_space<vmem>>, %arg14: memref<1x128xf32, #tpu.memory_space<vmem>>, %arg15: memref<1x2x128xf32, #tpu.memory_space<vmem>>, %arg16: memref<2x1024xf32, #tpu.memory_space<vmem>>) attributes {dimension_semantics = [#tpu.dimension_semantics<parallel>, #tpu.dimension_semantics<arbitrary>], iteration_bounds = array<i64: 2, 4>, scalar_prefetch = 0 : i64, scratch_operands = 1 : i64, tpu.core_type = #tpu.core_type<tc>, window_params = [{transform_indices = @transform_0, window_bounds = array<i64: 2, 64, 4>}, {pipeline_mode = #tpu.pipeline_mode<synchronous>, transform_indices = @transform_1, window_bounds = array<i64: 4, 64>}, {pipeline_mode = #tpu.pipeline_mode<synchronous>, transform_indices = @transform_2, window_bounds = array<i64: 1, 64>}, {pipeline_mode = #tpu.pipeline_mode<synchronous>, transform_indices = @transform_3, window_bounds = array<i64: 64, 128>}, {pipeline_mode = #tpu.pipeline_mode<synchronous>, transform_indices = @transform_4, window_bounds = array<i64: 1, 128>}, {pipeline_mode = #tpu.pipeline_mode<synchronous>, transform_indices = @transform_5, window_bounds = array<i64: 128, 1024>}, {pipeline_mode = #tpu.pipeline_mode<synchronous>, transform_indices = @transform_6, window_bounds = array<i64: 1, 1024>}, {pipeline_mode = #tpu.pipeline_mode<synchronous>, transform_indices = @transform_7, window_bounds = array<i64: 1024, 512>}, {pipeline_mode = #tpu.pipeline_mode<synchronous>, transform_indices = @transform_8, window_bounds = array<i64: 1, 512>}, {pipeline_mode = #tpu.pipeline_mode<synchronous>, transform_indices = @transform_9, window_bounds = array<i64: 512, 256>}, {pipeline_mode = #tpu.pipeline_mode<synchronous>, transform_indices = @transform_10, window_bounds = array<i64: 1, 256>}, {pipeline_mode = #tpu.pipeline_mode<synchronous>, transform_indices = @transform_11, window_bounds = array<i64: 256, 128>}, {pipeline_mode = #tpu.pipeline_mode<synchronous>, transform_indices = @transform_12, window_bounds = array<i64: 1, 128>}, {transform_indices = @transform_13, window_bounds = array<i64: 1, 2, 128>}]} {
    %c0_i32 = arith.constant 0 : i32
    %0 = arith.cmpi eq, %arg1, %c0_i32 : i32
    %1 = arith.extui %0 : i1 to i32
    %c0_i32_0 = arith.constant 0 : i32
    %2 = arith.cmpi ne, %1, %c0_i32_0 : i32
    scf.if %2 {
      %cst_26 = arith.constant 0xFF800000 : f32
      %34 = vector.broadcast %cst_26 : f32 to vector<2x1024xf32>
      %c0_27 = arith.constant 0 : index
      %c0_28 = arith.constant 0 : index
      %35 = vector.load %arg16[%c0_27, %c0_28] : memref<2x1024xf32, #tpu.memory_space<vmem>>, vector<2x1024xf32>
      tpu.vector_store %arg16[%c0_27, %c0_28], %34 {strides = array<i32>} : memref<2x1024xf32, #tpu.memory_space<vmem>>, vector<2x1024xf32>,
    } else {
    }
    %c0 = arith.constant 0 : index
    %c0_1 = arith.constant 0 : index
    %c0_2 = arith.constant 0 : index
    %3 = vector.load %arg2[%c0, %c0_1, %c0_2] : memref<2x64x4xf32, #tpu.memory_space<vmem>>, vector<2x64x4xf32>
    %4 = vector.shape_cast %3 : vector<2x64x4xf32> to vector<128x4xf32>
    %c0_3 = arith.constant 0 : index
    %c0_4 = arith.constant 0 : index
    %5 = vector.load %arg3[%c0_3, %c0_4] : memref<4x64xf32, #tpu.memory_space<vmem>>, vector<4x64xf32>
    %cst = arith.constant dense<0.000000e+00> : vector<128x64xf32>
    %6 = tpu.matmul %4, %5, %cst {dimension_numbers = #tpu.dot_dimension_numbers<[1], [0], [0], [1], [0, 0, 1, 1], [], []>} : vector<128x4xf32>, vector<4x64xf32>, vector<128x64xf32> -> vector<128x64xf32>
    %c0_5 = arith.constant 0 : index
    %c0_6 = arith.constant 0 : index
    %7 = vector.load %arg4[%c0_5, %c0_6] : memref<1x64xf32, #tpu.memory_space<vmem>>, vector<1x64xf32>
    %8 = vector.broadcast %7 : vector<1x64xf32> to vector<128x64xf32>
    %9 = arith.addf %6, %8 : vector<128x64xf32>
    %cst_7 = arith.constant 0.000000e+00 : f32
    %10 = vector.broadcast %cst_7 : f32 to vector<128x64xf32>
    %11 = arith.maximumf %9, %10 : vector<128x64xf32>
    %c0_8 = arith.constant 0 : index
    %c0_9 = arith.constant 0 : index
    %12 = vector.load %arg5[%c0_8, %c0_9] : memref<64x128xf32, #tpu.memory_space<vmem>>, vector<64x128xf32>
    %cst_10 = arith.constant dense<0.000000e+00> : vector<128x128xf32>
    %13 = tpu.matmul %11, %12, %cst_10 {dimension_numbers = #tpu.dot_dimension_numbers<[1], [0], [0], [1], [0, 0, 1, 1], [], []>} : vector<128x64xf32>, vector<64x128xf32>, vector<128x128xf32> -> vector<128x128xf32>
    %c0_11 = arith.constant 0 : index
    %c0_12 = arith.constant 0 : index
    %14 = vector.load %arg6[%c0_11, %c0_12] : memref<1x128xf32, #tpu.memory_space<vmem>>, vector<1x128xf32>
    %15 = vector.broadcast %14 : vector<1x128xf32> to vector<128x128xf32>
    %16 = arith.addf %13, %15 : vector<128x128xf32>
    %cst_13 = arith.constant 0.000000e+00 : f32
    %17 = vector.broadcast %cst_13 : f32 to vector<128x128xf32>
    %18 = arith.maximumf %16, %17 : vector<128x128xf32>
    %c0_14 = arith.constant 0 : index
    %c0_15 = arith.constant 0 : index
    %19 = vector.load %arg7[%c0_14, %c0_15] : memref<128x1024xf32, #tpu.memory_space<vmem>>, vector<128x1024xf32>
    %cst_16 = arith.constant dense<0.000000e+00> : vector<128x1024xf32>
    %20 = tpu.matmul %18, %19, %cst_16 {dimension_numbers = #tpu.dot_dimension_numbers<[1], [0], [0], [1], [0, 0, 1, 1], [], []>} : vector<128x128xf32>, vector<128x1024xf32>, vector<128x1024xf32> -> vector<128x1024xf32>
    %c0_17 = arith.constant 0 : index
    %c0_18 = arith.constant 0 : index
    %21 = vector.load %arg8[%c0_17, %c0_18] : memref<1x1024xf32, #tpu.memory_space<vmem>>, vector<1x1024xf32>
    %22 = vector.broadcast %21 : vector<1x1024xf32> to vector<128x1024xf32>
    %23 = arith.addf %20, %22 : vector<128x1024xf32>
    %cst_19 = arith.constant 0.000000e+00 : f32
    %24 = vector.broadcast %cst_19 : f32 to vector<128x1024xf32>
    %25 = arith.maximumf %23, %24 : vector<128x1024xf32>
    %26 = vector.shape_cast %25 : vector<128x1024xf32> to vector<2x64x1024xf32>
    %cst_20 = arith.constant dense<0xFF800000> : vector<2x1024xf32>
    %27 = vector.multi_reduction <maximumf>, %26, %cst_20 [1] : vector<2x64x1024xf32> to vector<2x1024xf32>
    %c0_21 = arith.constant 0 : index
    %c0_22 = arith.constant 0 : index
    %28 = vector.load %arg16[%c0_21, %c0_22] : memref<2x1024xf32, #tpu.memory_space<vmem>>, vector<2x1024xf32>
    %29 = arith.maximumf %28, %27 : vector<2x1024xf32>
    %c0_23 = arith.constant 0 : index
    %c0_24 = arith.constant 0 : index
    %30 = vector.load %arg16[%c0_23, %c0_24] : memref<2x1024xf32, #tpu.memory_space<vmem>>, vector<2x1024xf32>
    tpu.vector_store %arg16[%c0_23, %c0_24], %29 {strides = array<i32>} : memref<2x1024xf32, #tpu.memory_space<vmem>>, vector<2x1024xf32>,
    %c3_i32 = arith.constant 3 : i32
    %31 = arith.cmpi eq, %arg1, %c3_i32 : i32
    %32 = arith.extui %31 : i1 to i32
    %c0_i32_25 = arith.constant 0 : i32
    %33 = arith.cmpi ne, %32, %c0_i32_25 : i32
    scf.if %33 {
      %c0_26 = arith.constant 0 : index
      %c0_27 = arith.constant 0 : index
      %34 = vector.load %arg16[%c0_26, %c0_27] : memref<2x1024xf32, #tpu.memory_space<vmem>>, vector<2x1024xf32>
      %c0_28 = arith.constant 0 : index
      %c0_29 = arith.constant 0 : index
      %35 = vector.load %arg9[%c0_28, %c0_29] : memref<1024x512xf32, #tpu.memory_space<vmem>>, vector<1024x512xf32>
      %cst_30 = arith.constant dense<0.000000e+00> : vector<2x512xf32>
      %36 = tpu.matmul %34, %35, %cst_30 {dimension_numbers = #tpu.dot_dimension_numbers<[1], [0], [0], [1], [0, 0, 1, 1], [], []>} : vector<2x1024xf32>, vector<1024x512xf32>, vector<2x512xf32> -> vector<2x512xf32>
      %c0_31 = arith.constant 0 : index
      %c0_32 = arith.constant 0 : index
      %37 = vector.load %arg10[%c0_31, %c0_32] : memref<1x512xf32, #tpu.memory_space<vmem>>, vector<1x512xf32>
      %38 = vector.broadcast %37 : vector<1x512xf32> to vector<2x512xf32>
      %39 = arith.addf %36, %38 : vector<2x512xf32>
      %cst_33 = arith.constant 0.000000e+00 : f32
      %40 = vector.broadcast %cst_33 : f32 to vector<2x512xf32>
      %41 = arith.maximumf %39, %40 : vector<2x512xf32>
      %c0_34 = arith.constant 0 : index
      %c0_35 = arith.constant 0 : index
      %42 = vector.load %arg11[%c0_34, %c0_35] : memref<512x256xf32, #tpu.memory_space<vmem>>, vector<512x256xf32>
      %cst_36 = arith.constant dense<0.000000e+00> : vector<2x256xf32>
      %43 = tpu.matmul %41, %42, %cst_36 {dimension_numbers = #tpu.dot_dimension_numbers<[1], [0], [0], [1], [0, 0, 1, 1], [], []>} : vector<2x512xf32>, vector<512x256xf32>, vector<2x256xf32> -> vector<2x256xf32>
      %c0_37 = arith.constant 0 : index
      %c0_38 = arith.constant 0 : index
      %44 = vector.load %arg12[%c0_37, %c0_38] : memref<1x256xf32, #tpu.memory_space<vmem>>, vector<1x256xf32>
      %45 = vector.broadcast %44 : vector<1x256xf32> to vector<2x256xf32>
      %46 = arith.addf %43, %45 : vector<2x256xf32>
      %cst_39 = arith.constant 0.000000e+00 : f32
      %47 = vector.broadcast %cst_39 : f32 to vector<2x256xf32>
      %48 = arith.maximumf %46, %47 : vector<2x256xf32>
      %c0_40 = arith.constant 0 : index
      %c0_41 = arith.constant 0 : index
      %49 = vector.load %arg13[%c0_40, %c0_41] : memref<256x128xf32, #tpu.memory_space<vmem>>, vector<256x128xf32>
      %cst_42 = arith.constant dense<0.000000e+00> : vector<2x128xf32>
      %50 = tpu.matmul %48, %49, %cst_42 {dimension_numbers = #tpu.dot_dimension_numbers<[1], [0], [0], [1], [0, 0, 1, 1], [], []>} : vector<2x256xf32>, vector<256x128xf32>, vector<2x128xf32> -> vector<2x128xf32>
      %c0_43 = arith.constant 0 : index
      %c0_44 = arith.constant 0 : index
      %51 = vector.load %arg14[%c0_43, %c0_44] : memref<1x128xf32, #tpu.memory_space<vmem>>, vector<1x128xf32>
      %52 = vector.broadcast %51 : vector<1x128xf32> to vector<2x128xf32>
      %53 = arith.addf %50, %52 : vector<2x128xf32>
      %c0_45 = arith.constant 0 : index
      %c0_46 = arith.constant 0 : index
      %c0_47 = arith.constant 0 : index
      %54 = vector.load %arg15[%c0_45, %c0_46, %c0_47] : memref<1x2x128xf32, #tpu.memory_space<vmem>>, vector<1x2x128xf32>
      %55 = vector.shape_cast %54 : vector<1x2x128xf32> to vector<2x128xf32>
      %56 = vector.shape_cast %53 : vector<2x128xf32> to vector<1x2x128xf32>
      tpu.vector_store %arg15[%c0_45, %c0_46, %c0_47], %56 {strides = array<i32>} : memref<1x2x128xf32, #tpu.memory_space<vmem>>, vector<1x2x128xf32>,
    } else {
    }
    return
  }
  func.func @transform_0(%arg0: i32, %arg1: i32) -> (i32, i32, i32) {
    %c0_i32 = arith.constant 0 : i32
    %c0_i32_0 = arith.constant 0 : i32
    return %arg0, %arg1, %c0_i32 : i32, i32, i32
  }
  func.func @transform_1(%arg0: i32, %arg1: i32) -> (i32, i32) {
    %c0_i32 = arith.constant 0 : i32
    %c0_i32_0 = arith.constant 0 : i32
    %c0_i32_1 = arith.constant 0 : i32
    return %c0_i32, %c0_i32_0 : i32, i32
  }
  func.func @transform_2(%arg0: i32, %arg1: i32) -> (i32, i32) {
    %c0_i32 = arith.constant 0 : i32
    %c0_i32_0 = arith.constant 0 : i32
    %c0_i32_1 = arith.constant 0 : i32
    return %c0_i32, %c0_i32_0 : i32, i32
  }
  func.func @transform_3(%arg0: i32, %arg1: i32) -> (i32, i32) {
    %c0_i32 = arith.constant 0 : i32
    %c0_i32_0 = arith.constant 0 : i32
    %c0_i32_1 = arith.constant 0 : i32
    return %c0_i32, %c0_i32_0 : i32, i32
  }
  func.func @transform_4(%arg0: i32, %arg1: i32) -> (i32, i32) {
    %c0_i32 = arith.constant 0 : i32
    %c0_i32_0 = arith.constant 0 : i32
    %c0_i32_1 = arith.constant 0 : i32
    return %c0_i32, %c0_i32_0 : i32, i32
  }
  func.func @transform_5(%arg0: i32, %arg1: i32) -> (i32, i32) {
    %c0_i32 = arith.constant 0 : i32
    %c0_i32_0 = arith.constant 0 : i32
    %c0_i32_1 = arith.constant 0 : i32
    return %c0_i32, %c0_i32_0 : i32, i32
  }
  func.func @transform_6(%arg0: i32, %arg1: i32) -> (i32, i32) {
    %c0_i32 = arith.constant 0 : i32
    %c0_i32_0 = arith.constant 0 : i32
    %c0_i32_1 = arith.constant 0 : i32
    return %c0_i32, %c0_i32_0 : i32, i32
  }
  func.func @transform_7(%arg0: i32, %arg1: i32) -> (i32, i32) {
    %c0_i32 = arith.constant 0 : i32
    %c0_i32_0 = arith.constant 0 : i32
    %c0_i32_1 = arith.constant 0 : i32
    return %c0_i32, %c0_i32_0 : i32, i32
  }
  func.func @transform_8(%arg0: i32, %arg1: i32) -> (i32, i32) {
    %c0_i32 = arith.constant 0 : i32
    %c0_i32_0 = arith.constant 0 : i32
    %c0_i32_1 = arith.constant 0 : i32
    return %c0_i32, %c0_i32_0 : i32, i32
  }
  func.func @transform_9(%arg0: i32, %arg1: i32) -> (i32, i32) {
    %c0_i32 = arith.constant 0 : i32
    %c0_i32_0 = arith.constant 0 : i32
    %c0_i32_1 = arith.constant 0 : i32
    return %c0_i32, %c0_i32_0 : i32, i32
  }
  func.func @transform_10(%arg0: i32, %arg1: i32) -> (i32, i32) {
    %c0_i32 = arith.constant 0 : i32
    %c0_i32_0 = arith.constant 0 : i32
    %c0_i32_1 = arith.constant 0 : i32
    return %c0_i32, %c0_i32_0 : i32, i32
  }
  func.func @transform_11(%arg0: i32, %arg1: i32) -> (i32, i32) {
    %c0_i32 = arith.constant 0 : i32
    %c0_i32_0 = arith.constant 0 : i32
    %c0_i32_1 = arith.constant 0 : i32
    return %c0_i32, %c0_i32_0 : i32, i32
  }
  func.func @transform_12(%arg0: i32, %arg1: i32) -> (i32, i32) {
    %c0_i32 = arith.constant 0 : i32
    %c0_i32_0 = arith.constant 0 : i32
    %c0_i32_1 = arith.constant 0 : i32
    return %c0_i32, %c0_i32_0 : i32, i32
  }
  func.func @transform_13(%arg0: i32, %arg1: i32) -> (i32, i32, i32) {
    %c0_i32 = arith.constant 0 : i32
    %c0_i32_0 = arith.constant 0 : i32
    %c0_i32_1 = arith.constant 0 : i32
    return %arg0, %c0_i32, %c0_i32_0 : i32, i32, i32
  }
}

</mosaic_0001>

<bundles_post_ra>
// kernel: tpu_custom_call.1
= control target key start
LH: loop header
LB: loop body
LE: loop exit
PB: predicated region body
PF: predicated region fallthrough
CT: control target
= control target key end

     0   :  { %s6264_s0 = inlined_call_operand.vmem [shape: f32[4,256,4], index: 0, kind: input, shape index: {}]   ;;  %s6265_s1 = inlined_call_operand.hbm [shape: f32[4,64], index: 1, kind: input, shape index: {}]   ;;  %s6266_s2 = inlined_call_operand.hbm [shape: f32[1,64], index: 2, kind: input, shape index: {}]   ;;  %s6267_s3 = inlined_call_operand.hbm [shape: f32[64,128], index: 3, kind: input, shape index: {}]   ;;  %s6268_s4 = inlined_call_operand.hbm [shape: f32[1,128], index: 4, kind: input, shape index: {}]   ;;  %s6269_s5 = inlined_call_operand.hbm [shape: f32[128,1024], index: 5, kind: input, shape index: {}]   ;;  %s6270_s6 = inlined_call_operand.hbm [shape: f32[1,1024], index: 6, kind: input, shape index: {}]   ;;  %s6271_s7 = inlined_call_operand.hbm [shape: f32[1024,512], index: 7, kind: input, shape index: {}]   ;;  %s6272_s8 = inlined_call_operand.hbm [shape: f32[1,512], index: 8, kind: input, shape index: {}]   ;;  %s6273_s9 = inlined_call_operand.hbm [shape: f32[512,256], index: 9, kind: input, shape index: {}]   ;;  %s6274_s10 = inlined_call_operand.hbm [shape: f32[1,256], index: 10, kind: input, shape index: {}]   ;;  %s6275_s11 = inlined_call_operand.hbm [shape: f32[256,128], index: 11, kind: input, shape index: {}]   ;;  %s6276_s12 = inlined_call_operand.hbm [shape: f32[1,128], index: 12, kind: input, shape index: {}]   ;;  %s6277_s13 = inlined_call_operand.hbm [shape: f32[2,2,128], index: 13, kind: output, shape index: {}]  }
   0x1   :  { %6292 = sst [smem:[#allocation44_spill]] %s6264_s0 }
   0x2   :  { %6293 = sst [smem:[#allocation45_spill]] %s6265_s1 }
   0x3   :  { %6294 = sst [smem:[#allocation46_spill]] %s6266_s2 }
   0x4   :  { %6295 = sst [smem:[#allocation47_spill]] %s6267_s3 }
   0x5   :  { %6296 = sst [smem:[#allocation48_spill]] %s6277_s13 }
   0x6   :  { %18 = vsyncpa [#allocation5], 0 }
   0x7   :  { %19 = vsyncpa [#allocation8], 0 }
   0x8   :  { %20 = vsyncpa [#allocation11], 0 }
   0x9   :  { %21 = vsyncpa [#allocation14], 0 }
   0xa   :  { %22 = vsyncpa [#allocation17], 0 }
   0xb   :  { %23 = vsyncpa [#allocation20], 0 }
   0xc   :  { %24 = vsyncpa [#allocation23], 0 }
   0xd   :  { %25 = vsyncpa [#allocation6], 0 }
   0xe   :  { %27 = vsyncpa [#allocation6 + $0x1], 0  ;;  %s5224_s25 = smov 0   ;;  %s5226_s26 = smov 0  }
   0xf   :  { %s5228_s27 = smov 0   ;;  %s5230_s28 = smov 0  }
  0x10   :  { %s5232_s29 = smov 0   ;;  %s5234_s30 = smov 0  }
  0x11   :  { %s5236_s14 = smov 0   ;;  %s5238_s15 = smov 0  }
  0x12   :  { %s5240_s16 = smov 0   ;;  %s5242_s17 = smov 0  }
  0x13 LB: > { %6297 = sst [smem:[#allocation33_spill]] %s5100_s27  ;;  %s4206_s18 = sadd.s32 4294967295, %s5128_s17   ;;  %s5128_s17 = sphi %s5242_s17, %s33_s17   ;;  %s5124_s16 = sphi %s5240_s16, %s6345_s16   ;;  %s5120_s15 = sphi %s5238_s15, %s6338_s15   ;;  %s5116_s14 = sphi %s5236_s14, %s6344_s14   ;;  %s5112_s30 = sphi %s5234_s30, %s6337_s30   ;;  %s5108_s29 = sphi %s5232_s29, %s6343_s29   ;;  %s5104_s28 = sphi %s5230_s28, %s6342_s28   ;;  %s5100_s27 = sphi %s5228_s27, %s6335_s27   ;;  %s5096_s26 = sphi %s5226_s26, %s6341_s26   ;;  %s5092_s25 = sphi %s5224_s25, %s6340_s25  }
  0x14   : > { %6298 = sst [smem:[#allocation34_spill]] %s5104_s28  ;;  %s4207_s19 = sadd.s32 4294967294, %s5128_s17  }
  0x15   : > { %6299 = sst [smem:[#allocation35_spill]] %s5112_s30  ;;  %s42_s20 = sadd.s32 1, %s5120_s15 }
  0x16   : > { %6300 = sst [smem:[#allocation36_spill]] %s5116_s14  ;;  %s45_s21 = sadd.s32 1, %s5124_s16 }
  0x17   : > { %6301 = sst [smem:[#allocation37_spill]] %s5120_s15  ;;  %p43_p0 = scmp.ge.s32.totalorder %s42_s20, 4 }
  0x18   : > { %s54_s22 = sadd.s32 1, %s5108_s29  ;;  %p61_p1 = scmp.ne.s32.totalorder %s5108_s29, %s5104_s28 }
  0x19   : > { %p62_p2 = scmp.eq.s32.totalorder %s5128_s17, 0  ;;  %s6347_s20 = smov (%p43_p0, %s42_s20), 0 }
  0x1a   : > { %6302 = sst [smem:[#allocation38_spill]] %s6347_s20  ;;  %s6349_s21 = smov (!%p43_p0, %s45_s21), %s5124_s16 }
  0x1b   : > { %s50_s23 = ssub.s32 %s5120_s15, %s6347_s20  ;;  %p5287_p3 = por %p62_p2, %p61_p1 }
  0x1c   : > { %p47_p4 = scmp.ge.s32.totalorder %s6349_s21, 2  ;;  %s332_s13 = sadd.s32 1, %s5100_s27 }
  0x1d   : > { %s6303_s24 = scalar_select %p5287_p3, 1, 0 }
  0x1e   : > { %p342_p5 = scmp.ne.s32.totalorder %s5100_s27, %s5096_s26  ;;  %p343_p6 = scmp.eq.s32.totalorder %s4206_s18, 7 }
  0x1f   : > { %6304 = sst [smem:[#allocation39_spill]] %s6303_s24  ;;  %s6351_s21 = smov (%p47_p4, %s6349_s21), 0 }
  0x20   : > { %6305 = sst [smem:[#allocation40_spill]] %s6351_s21  ;;  %p5296_p7 = por %p343_p6, %p342_p5 }
  0x21   : > { %p348_p8 = scmp.ne.s32.totalorder %s5096_s26, %s5092_s25  ;;  %s49_s20 = ssub.s32 %s5124_s16, %s6351_s21 }
  0x22   : > { %s6306_s14 = scalar_select %p5296_p7, 1, 0 }
  0x23   : > { %p349_p9 = scmp.eq.s32.totalorder %s4207_s19, 7  ;;  %s51_s30 = sor.u32 %s50_s23, %s49_s20 }
  0x24   : > { %p330_p10 = scmp.eq.s32.totalorder %s49_s20, 0  ;;  %p52_p11 = scmp.eq.s32.totalorder %s51_s30, 0 }
  0x25   : > { %p5304_p12 = por %p349_p9, %p348_p8  ;;  %p4208_p13 = scmp.ge.s32.totalorder %s5128_s17, 1 }
  0x26   : > { %s5309_s0 = scalar_select %p330_p10, %s5100_s27, %s332_s13  }
  0x27   : > { %s6307_s28 = scalar_select %p5304_p12, 1, 0 }
  0x28   : > { %6309 = sst [smem:[#allocation42_spill]] %s5309_s0  ;;  %p356_p0 = scmp.lt.s32.totalorder %s5128_s17, 9 }
  0x29   : > { %6308 = sst [smem:[#allocation41_spill]] %s6307_s28  ;;  %p5316_p1 = scmp.eq.s32.totalorder %s4206_s18, 0 }
  0x2a   : > { %s5312_s15 = scalar_select %p52_p11, %s5108_s29, %s54_s22  }
  0x2b   : > { %s6311_s24 = scalar_select %p5316_p1, 1, 0 }
  0x2c   : > { %6310 = sst [smem:[#allocation43_spill]] %s5312_s15  ;;  %p5320_p2 = pnand %p4208_p13, %p356_p0 }
  0x2d   : > { %s5130_s30 = smov [#allocation7]   ;;  %s5131_s13 = smov [#allocation10]  }
  0x2e   : > { %s6312_s19 = scalar_select %p5320_p2, 1, 0 }
  0x2f   : > { %s380_s20 = sshll.u32 %s5130_s30, 4  ;;  %p4509_p4 = pneg %p5320_p2  ;;  %s381_s20 = int_to_ptr.vmem [resolvable:$true] %s380_s20 }
  0x30   : > { %s404_s22 = sshll.u32 %s5131_s13, 4  ;;  %s5132_s18 = smov [#allocation13]   ;;  %s405_s22 = int_to_ptr.vmem [resolvable:$true] %s404_s22 }
  0x31   : > { %p5328_p5 = pnand %p5316_p1, %p4509_p4  ;;  %s428_s21 = sshll.u32 %s5132_s18, 4  ;;  %s5332_s21 = int_to_ptr.vmem [resolvable:$true] %s428_s21 }
  0x32   : > { %s4691_s30 = scalar_lea.vmem %s381_s20, 16  ;;  %s4698_s13 = scalar_lea.vmem %s381_s20, 32 }
  0x33   : > { %p5336_p6 = pneg %p5328_p5  ;;  %p4692_p8 = scmp.ne.s32.totalorder %s381_s20, %s4691_s30 }
  0x34   : > { %p4699_p11 = scmp.lt.s32.totalorder %s381_s20, %s381_s20  ;;  %p4700_p13 = scmp.lt.s32.totalorder %s4698_s13, %s4691_s30 }
  0x35   : > { %p4694_p9 = pnand %p4692_p8, %p5336_p6 }
  0x36   : > { %p4701_p0 = por %p4700_p13, %p4699_p11 }
  0x37   : > { %p4695_p10 = pneg %p4694_p9 }
  0x39   : > { %p4702_p4 = pnand %p4701_p0, %p4695_p10 }
  0x3b   : > { %4705 = shalt.err (!%p4702_p4)
}
  0x3c   : > { %s6315_s2 = sld [smem:[#allocation46_spill]]  ;;  %s4717_s27 = scalar_lea.vmem %s405_s22, 16 }
  0x3d   : > { %p4718_p12 = scmp.ne.s32.totalorder %s405_s22, %s4717_s27  ;;  %s4724_s28 = scalar_lea.vmem %s405_s22, 32 }
  0x3e   : > { %p4725_p8 = scmp.lt.s32.totalorder %s405_s22, %s405_s22  ;;  %p4726_p9 = scmp.lt.s32.totalorder %s4724_s28, %s4717_s27 }
  0x3f   : > { %p4720_p7 = pnand %p4718_p12, %p5336_p6 }
  0x40   : > { %p4727_p2 = por %p4726_p9, %p4725_p8 }
  0x41   : > { %p4721_p1 = pneg %p4720_p7 }
  0x42   : > { %4515 = dma.hbm_to_vmem [thread:$0]  (!%p5328_p5), %s6315_s2, 16, %s381_s20, [#allocation8]  }
  0x43   : > { %p4728_p3 = pnand %p4727_p2, %p4721_p1 }
  0x45   : > { %4731 = shalt.err (!%p4728_p3)
}
  0x46   : > { %4521 = dma.hbm_to_vmem [thread:$0]  (!%p5328_p5), %s6268_s4, 16, %s405_s22, [#allocation11]  }
  0x47   : > { %s4743_s0 = scalar_lea.vmem %s5332_s21, 128  ;;  %p4751_p11 = scmp.lt.s32.totalorder %s5332_s21, %s5332_s21 }
  0x48   : > { %p4744_p10 = scmp.ne.s32.totalorder %s5332_s21, %s4743_s0  ;;  %p4752_p13 = scmp.lt.s32.totalorder %s4743_s0, %s4743_s0 }
  0x4a   : > { %p4746_p7 = pnand %p4744_p10, %p5336_p6  ;;  %p4753_p1 = por %p4752_p13, %p4751_p11 }
  0x4c   : > { %p4747_p12 = pneg %p4746_p7 }
  0x4e   : > { %p4754_p3 = pnand %p4753_p1, %p4747_p12 }
  0x50   : > { %4757 = shalt.err (!%p4754_p3)
}
  0x51   : > { %4527 = dma.hbm_to_vmem [thread:$0]  (!%p5328_p5), %s6270_s6, 128, %s5332_s21, [#allocation14]  }
  0x52   : > { %s5133_s20 = smov [#allocation16]   ;;  %s5134_s18 = smov [#allocation19]  }
  0x53   : > { %s452_s22 = sshll.u32 %s5133_s20, 4  ;;  %s476_s30 = sshll.u32 %s5134_s18, 4  ;;  %s453_s22 = int_to_ptr.vmem [resolvable:$true] %s452_s22  ;;  %s477_s30 = int_to_ptr.vmem [resolvable:$true] %s476_s30 }
  0x54   : > { %s4769_s13 = scalar_lea.vmem %s453_s22, 64  ;;  %p4777_p8 = scmp.lt.s32.totalorder %s453_s22, %s453_s22 }
  0x55   : > { %p4770_p2 = scmp.ne.s32.totalorder %s453_s22, %s4769_s13  ;;  %p4778_p9 = scmp.lt.s32.totalorder %s4769_s13, %s4769_s13 }
  0x57   : > { %p4772_p0 = pnand %p4770_p2, %p5336_p6  ;;  %p4779_p10 = por %p4778_p9, %p4777_p8 }
  0x59   : > { %p4773_p4 = pneg %p4772_p0 }
  0x5b   : > { %p4780_p7 = pnand %p4779_p10, %p4773_p4 }
  0x5d   : > { %4783 = shalt.err (!%p4780_p7)
}
  0x5e   : > { %4533 = dma.hbm_to_vmem [thread:$0]  (!%p5328_p5), %s6272_s8, 64, %s453_s22, [#allocation17]  }
  0x5f   : > { %s4795_s21 = scalar_lea.vmem %s477_s30, 32  ;;  %p4803_p1 = scmp.lt.s32.totalorder %s477_s30, %s477_s30 }
  0x60   : > { %p4796_p12 = scmp.ne.s32.totalorder %s477_s30, %s4795_s21  ;;  %p4804_p3 = scmp.lt.s32.totalorder %s4795_s21, %s4795_s21 }
  0x62   : > { %p4798_p11 = pnand %p4796_p12, %p5336_p6  ;;  %p4805_p2 = por %p4804_p3, %p4803_p1 }
  0x64   : > { %p4799_p13 = pneg %p4798_p11 }
  0x66   : > { %p4806_p0 = pnand %p4805_p2, %p4799_p13 }
  0x68   : > { %4809 = shalt.err (!%p4806_p0)
}
  0x69   : > { %4539 = dma.hbm_to_vmem [thread:$0]  (!%p5328_p5), %s6274_s10, 32, %s477_s30, [#allocation20]  }
  0x6a   : > { %s5135_s18 = smov [#allocation4]   ;;  %s5136_s13 = smov [#allocation9]  }
  0x6b   : > { %s369_s22 = sshll.u32 %s5135_s18, 4  ;;  %s390_s0 = sshll.u32 %s5136_s13, 4  ;;  %s370_s22 = int_to_ptr.vmem [resolvable:$true] %s369_s22  ;;  %s391_s0 = int_to_ptr.vmem [resolvable:$true] %s390_s0 }
  0x6c   : > { %s4821_s27 = scalar_lea.vmem %s370_s22, 64  ;;  %p4829_p10 = scmp.lt.s32.totalorder %s370_s22, %s370_s22 }
  0x6d   : > { %p4822_p4 = scmp.ne.s32.totalorder %s370_s22, %s4821_s27  ;;  %p4830_p7 = scmp.lt.s32.totalorder %s4821_s27, %s4821_s27 }
  0x6f   : > { %p4824_p8 = pnand %p4822_p4, %p5336_p6  ;;  %p4831_p12 = por %p4830_p7, %p4829_p10 }
  0x71   : > { %p4825_p9 = pneg %p4824_p8 }
  0x73   : > { %p4832_p11 = pnand %p4831_p12, %p4825_p9 }
  0x75   : > { %4835 = shalt.err (!%p4832_p11)
}
  0x76   : > { %s6316_s1 = sld [smem:[#allocation45_spill]]  ;;  %s4847_s30 = scalar_lea.vmem %s391_s0, 1024 }
  0x77   : > { %p4848_p13 = scmp.ne.s32.totalorder %s391_s0, %s4847_s30  ;;  %p4855_p2 = scmp.lt.s32.totalorder %s391_s0, %s391_s0 }
  0x78   : > { %p4856_p0 = scmp.lt.s32.totalorder %s4847_s30, %s4847_s30 }
  0x79   : > { %p4850_p1 = pnand %p4848_p13, %p5336_p6 }
  0x7a   : > { %p4857_p4 = por %p4856_p0, %p4855_p2 }
  0x7b   : > { %p4851_p3 = pneg %p4850_p1 }
  0x7c   : > { %4512 = dma.hbm_to_vmem [thread:$0]  (!%p5328_p5), %s6316_s1, 64, %s370_s22, [#allocation5]  }
  0x7d   : > { %p4858_p8 = pnand %p4857_p4, %p4851_p3 }
  0x7f   : > { %4861 = shalt.err (!%p4858_p8)
}
  0x80   : > { %s6290_s20 = smov 128   ;;  %s6291_s18 = smov 8  }
  0x81   : > { %s6317_s3 = sld [smem:[#allocation47_spill]]  ;;  %s5139_s27 = smov [#allocation12]  }
  0x82   : > { %s414_s21 = sshll.u32 %s5139_s27, 4  ;;  %s415_s21 = int_to_ptr.vmem [resolvable:$true] %s414_s21 }
  0x83   : > { %s4873_s28 = scalar_lea.vmem %s415_s21, 16384  ;;  %p4881_p12 = scmp.lt.s32.totalorder %s415_s21, %s415_s21 }
  0x84   : > { %p4874_p9 = scmp.ne.s32.totalorder %s415_s21, %s4873_s28  ;;  %p4882_p11 = scmp.lt.s32.totalorder %s4873_s28, %s4873_s28 }
  0x86   : > { %p4876_p10 = pnand %p4874_p9, %p5336_p6  ;;  %p4883_p13 = por %p4882_p11, %p4881_p12 }
  0x87   : > { %4518 = dma.hbm_to_vmem [thread:$0]  (!%p5328_p5), %s6317_s3, 1024, %s391_s0, [#allocation8], %s6290_s20, %s6290_s20, %s6291_s18  }
  0x88   : > { %p4877_p7 = pneg %p4876_p10 }
  0x8a   : > { %p4884_p1 = pnand %p4883_p13, %p4877_p7 }
  0x8c   : > { %4887 = shalt.err (!%p4884_p1)
}
  0x8d   : > { %s5140_s30 = smov 1024   ;;  %s5141_s1 = smov 64  }
  0x8e   : > { %4524 = dma.hbm_to_vmem [thread:$0]  (!%p5328_p5), %s6269_s5, 16384, %s415_s21, [#allocation11], %s5140_s30, %s5140_s30, %s5141_s1  }
  0x8f   : > { %s5142_s13 = smov [#allocation15]  }
  0x90   : > { %s438_s27 = sshll.u32 %s5142_s13, 4  ;;  %s439_s27 = int_to_ptr.vmem [resolvable:$true] %s438_s27 }
  0x91   : > { %s4899_s20 = scalar_lea.vmem %s439_s27, 65536  ;;  %p4907_p4 = scmp.lt.s32.totalorder %s439_s27, %s439_s27 }
  0x92   : > { %p4900_p3 = scmp.ne.s32.totalorder %s439_s27, %s4899_s20  ;;  %p4908_p8 = scmp.lt.s32.totalorder %s4899_s20, %s4899_s20 }
  0x94   : > { %p4902_p2 = pnand %p4900_p3, %p5336_p6  ;;  %p4909_p9 = por %p4908_p8, %p4907_p4 }
  0x96   : > { %p4903_p0 = pneg %p4902_p2 }
  0x98   : > { %p4910_p10 = pnand %p4909_p9, %p4903_p0 }
  0x9a   : > { %4913 = shalt.err (!%p4910_p10)
}
  0x9b   : > { %s5143_s28 = smov 512   ;;  %s5144_s18 = smov 32  }
  0x9c   : > { %4530 = dma.hbm_to_vmem [thread:$0]  (!%p5328_p5), %s6271_s7, 65536, %s439_s27, [#allocation14], %s5143_s28, %s5143_s28, %s5144_s18  }
  0x9d   : > { %s5145_s21 = smov [#allocation18]  }
  0x9e   : > { %s462_s30 = sshll.u32 %s5145_s21, 4  ;;  %s463_s30 = int_to_ptr.vmem [resolvable:$true] %s462_s30 }
  0x9f   : > { %s4925_s0 = scalar_lea.vmem %s463_s30, 16384  ;;  %p4933_p13 = scmp.lt.s32.totalorder %s463_s30, %s463_s30 }
  0xa0   : > { %p4926_p7 = scmp.ne.s32.totalorder %s463_s30, %s4925_s0  ;;  %p4934_p1 = scmp.lt.s32.totalorder %s4925_s0, %s4925_s0 }
  0xa2   : > { %p4928_p12 = pnand %p4926_p7, %p5336_p6  ;;  %p4935_p3 = por %p4934_p1, %p4933_p13 }
  0xa4   : > { %p4929_p11 = pneg %p4928_p12 }
  0xa6   : > { %p4936_p2 = pnand %p4935_p3, %p4929_p11 }
  0xa8   : > { %4939 = shalt.err (!%p4936_p2)
}
  0xa9   : > { %s5146_s20 = smov 256   ;;  %s5147_s13 = smov 16  }
  0xaa   : > { %4536 = dma.hbm_to_vmem [thread:$0]  (!%p5328_p5), %s6273_s9, 16384, %s463_s30, [#allocation17], %s5146_s20, %s5146_s20, %s5147_s13  }
  0xab   : > { %s5148_s27 = smov [#allocation21]   ;;  %s5149_s1 = smov [#allocation22]  }
  0xac   : > { %s486_s28 = sshll.u32 %s5148_s27, 4  ;;  %s500_s21 = sshll.u32 %s5149_s1, 4  ;;  %s487_s28 = int_to_ptr.vmem [resolvable:$true] %s486_s28  ;;  %s501_s21 = int_to_ptr.vmem [resolvable:$true] %s500_s21 }
  0xad   : > { %s4951_s2 = scalar_lea.vmem %s487_s28, 4096  ;;  %p4959_p9 = scmp.lt.s32.totalorder %s487_s28, %s487_s28 }
  0xae   : > { %p4952_p0 = scmp.ne.s32.totalorder %s487_s28, %s4951_s2  ;;  %p4960_p10 = scmp.lt.s32.totalorder %s4951_s2, %s4951_s2 }
  0xb0   : > { %p4954_p4 = pnand %p4952_p0, %p5336_p6  ;;  %p4961_p7 = por %p4960_p10, %p4959_p9 }
  0xb2   : > { %p4955_p8 = pneg %p4954_p4 }
  0xb4   : > { %p4962_p12 = pnand %p4961_p7, %p4955_p8 }
  0xb6   : > { %4965 = shalt.err (!%p4962_p12)
}
  0xb7   : > { %s6318_s0 = smov 8   ;;  %s6319_s30 = smov 128  }
  0xb8   : > { %4542 = dma.hbm_to_vmem [thread:$0]  (!%p5328_p5), %s6275_s11, 4096, %s487_s28, [#allocation20], %s6319_s30, %s6319_s30, %s6318_s0  }
  0xb9   : > { %s4977_s22 = scalar_lea.vmem %s501_s21, 16  ;;  %s4984_s18 = scalar_lea.vmem %s501_s21, 32 }
  0xba   : > { %p4978_p11 = scmp.ne.s32.totalorder %s501_s21, %s4977_s22  ;;  %p4985_p3 = scmp.lt.s32.totalorder %s501_s21, %s501_s21 }
  0xbb   : > { %p4986_p2 = scmp.lt.s32.totalorder %s4984_s18, %s4977_s22 }
  0xbc   : > { %p4980_p13 = pnand %p4978_p11, %p5336_p6 }
  0xbd   : > { %p4987_p0 = por %p4986_p2, %p4985_p3 }
  0xbe   : > { %p4981_p1 = pneg %p4980_p13 }
  0xc0   : > { %p4988_p4 = pnand %p4987_p0, %p4981_p1 }
  0xc2   : > { %4991 = shalt.err (!%p4988_p4)
}
  0xc3   : > { %4545 = dma.hbm_to_vmem [thread:$0]  (!%p5328_p5), %s6276_s12, 16, %s501_s21, [#allocation23]  }
  0xc4   : > { %p4221_p8 = scmp.ge.s32.totalorder %s5128_s17, 8 }
  0xc5   : > { %s6320_s28 = sld [smem:[#allocation39_spill]] (!%p4221_p8) }
  0xc6   : > { %507 = sbr.rel (%p4221_p8) target bundleno = 223 (0xdf), region = 64 }
  0xcb   : > { %p6321_p9 = scmp.ne.s32.totalorder %s6320_s28, 0 }
  0xcc   : > { %s6322_s15 = sld [smem:[#allocation37_spill]] (%p6321_p9)  ;;  %s512_s1 = sand.u32 (%p6321_p9), 1, %s5108_s29  }
  0xcd   : > { %510 = sbr.rel (!%p6321_p9) target bundleno = 223 (0xdf), region = 68  ;;  %s4222_s30 = sshll.u32 (%p6321_p9), %s512_s1, 7 }
  0xce   : > { %s4284_s20 = sshll.u32 (%p6321_p9), %s5124_s16, 6  ;;  %s6323_s3 = sld [smem:[#allocation44_spill]] (%p6321_p9) }
  0xcf   : > { %s514_s21 = scalar_lea.vmem (%p6321_p9), [#allocation3], %s4222_s30 }
  0xd2   : > { %s4224_s0 = sshll.u32 %s6322_s15, 3 }
  0xd3   : > { %s518_s13 = sadd.s32 %s4284_s20, %s4224_s0 }
  0xd4   : > { %s4226_s22 = sshll.u32 %s518_s13, 3 }
  0xd5   : > { %s5444_s2 = scalar_lea.vmem %s6323_s3, %s4226_s22 }
  0xd6   : > { %v579_v0 = vld [vmem:[%s5444_s2] sm:$0xff]  ;;  %v581_v1 = vld [vmem:[%s5444_s2 + $0x8] sm:$0xff]  ;;  %v583_v2 = vld [vmem:[%s5444_s2 + $0x10] sm:$0xff] }
  0xd7   : > { %580 = vst [vmem:[%s514_s21] sm:$0xff] %v579_v0  ;;  %582 = vst [vmem:[%s514_s21 + $0x8] sm:$0xff] %v581_v1  ;;  %v585_v3 = vld [vmem:[%s5444_s2 + $0x18] sm:$0xff]  ;;  %v587_v4 = vld [vmem:[%s5444_s2 + $0x20] sm:$0xff] }
  0xd8   : > { %584 = vst [vmem:[%s514_s21 + $0x10] sm:$0xff] %v583_v2  ;;  %v589_v5 = vld [vmem:[%s5444_s2 + $0x28] sm:$0xff]  ;;  %586 = vst [vmem:[%s514_s21 + $0x18] sm:$0xff] %v585_v3  ;;  %v591_v6 = vld [vmem:[%s5444_s2 + $0x30] sm:$0xff] }
  0xd9   : > { %588 = vst [vmem:[%s514_s21 + $0x20] sm:$0xff] %v587_v4  ;;  %590 = vst [vmem:[%s514_s21 + $0x28] sm:$0xff] %v589_v5  ;;  %v593_v7 = vld [vmem:[%s5444_s2 + $0x38] sm:$0xff]  ;;  %v595_v8 = vld [vmem:[%s5444_s2 + $0x100] sm:$0xff] }
  0xda   : > { %592 = vst [vmem:[%s514_s21 + $0x30] sm:$0xff] %v591_v6  ;;  %594 = vst [vmem:[%s514_s21 + $0x38] sm:$0xff] %v593_v7  ;;  %v597_v9 = vld [vmem:[%s5444_s2 + $0x108] sm:$0xff]  ;;  %v599_v10 = vld [vmem:[%s5444_s2 + $0x110] sm:$0xff] }
  0xdb   : > { %596 = vst [vmem:[%s514_s21 + $0x40] sm:$0xff] %v595_v8  ;;  %v601_v11 = vld [vmem:[%s5444_s2 + $0x118] sm:$0xff]  ;;  %598 = vst [vmem:[%s514_s21 + $0x48] sm:$0xff] %v597_v9  ;;  %v603_v12 = vld [vmem:[%s5444_s2 + $0x120] sm:$0xff] }
  0xdc   : > { %600 = vst [vmem:[%s514_s21 + $0x50] sm:$0xff] %v599_v10  ;;  %602 = vst [vmem:[%s514_s21 + $0x58] sm:$0xff] %v601_v11  ;;  %v605_v13 = vld [vmem:[%s5444_s2 + $0x128] sm:$0xff]  ;;  %v607_v14 = vld [vmem:[%s5444_s2 + $0x130] sm:$0xff] }
  0xdd   : > { %604 = vst [vmem:[%s514_s21 + $0x60] sm:$0xff] %v603_v12  ;;  %606 = vst [vmem:[%s514_s21 + $0x68] sm:$0xff] %v605_v13  ;;  %v609_v15 = vld [vmem:[%s5444_s2 + $0x138] sm:$0xff] }
  0xde   : > { %608 = vst [vmem:[%s514_s21 + $0x70] sm:$0xff] %v607_v14  ;;  %610 = vst [vmem:[%s514_s21 + $0x78] sm:$0xff] %v609_v15 }
  0xdf PF: > { %p6324_p5 = scmp.ne.s32.totalorder %s6312_s19, 0 }
  0xe0   : > { %s6325_s3 = sld [smem:[#allocation34_spill]] (!%p6324_p5)  ;;  %p6326_p6 = scmp.ne.s32.totalorder (!%p6324_p5), %s6311_s24, 0 }
  0xe1   : > { %619 = sbr.rel (%p6324_p5) target bundleno = 1921 (0x781), region = 106 }
  0xe6   : > { %s622_s27 = sand.u32 1, %s6325_s3  }
  0xe7   : > { %s4228_s28 = sshll.u32 %s622_s27, 7 }
  0xe8   : > { %s5465_s15 = scalar_lea.vmem [#allocation3], %s4228_s28 }
  0xe9   : > { %5059 = dma.done.wait (%p6326_p6), [#allocation5], 64  }
  0xea   : > { %5061 = vsyncadd (%p6326_p6), [#allocation5], 4294967232 }
  0xeb   : > { %5063 = dma.done.wait (%p6326_p6), [#allocation8], 1040  }
  0xec   : > { %5065 = vsyncadd (%p6326_p6), [#allocation8], 4294966256 }
  0xed   : > { %5067 = dma.done.wait (%p6326_p6), [#allocation11], 16400  }
  0xee   : > { %5069 = vsyncadd (%p6326_p6), [#allocation11], 4294950896 }
  0xef   : > { %5071 = dma.done.wait (%p6326_p6), [#allocation14], 65664  }
  0xf0   : > { %5073 = vsyncadd (%p6326_p6), [#allocation14], 4294901632 }
  0xf1   : > { %5075 = dma.done.wait (%p6326_p6), [#allocation17], 16448  }
  0xf2   : > { %5077 = vsyncadd (%p6326_p6), [#allocation17], 4294950848 }
  0xf3   : > { %5079 = dma.done.wait (%p6326_p6), [#allocation20], 4128  }
  0xf4   : > { %5081 = vsyncadd (%p6326_p6), [#allocation20], 4294963168 }
  0xf5   : > { %5083 = dma.done.wait (%p6326_p6), [#allocation23], 16  }
  0xf6   : > { %5085 = vsyncadd (%p6326_p6), [#allocation23], 4294967280  ;;  %s710_s19 = sand.u32 1, %s5096_s26   ;;  %s6327_s30 = sld [smem:[#allocation35_spill]] }
  0xf7   : > { %s5498_s1 = sshll.u32 %s710_s19, 1 }
  0xf8   : > { %s712_s0 = scalar_lea.vmem [#allocation24], %s5498_s1 }
  0xfc   : > { %p4242_p10 = scmp.ne.s32.totalorder %s6327_s30, 0 }
  0xfe   : > { %718 = sbr.rel (%p4242_p10) target bundleno = 261 (0x105), region = 162 }
 0x103   : > { %v5150_v16 = vmov -inf  }
 0x104   : > { %719 = vst [vmem:[#allocation2] sm:$0xff] %v5150_v16  ;;  %720 = vst [vmem:[#allocation2 + $0x8] sm:$0xff] %v5150_v16 }
 0x105 PF: > { %v737_v17 = vld [vmem:[#allocation4] sm:$0xf]  ;;  %vm794_vm0 = vcmask 1043456   ;;  %vm745_vm1 = vcmask 31744   ;;  %v722_v19 = vld [vmem:[%s5465_s15 + $0x8] sm:$0xff]  ;;  %v723_v20 = vld [vmem:[%s5465_s15 + $0x10] sm:$0xff] }
 0x106   : > { %v721_v18 = vld [vmem:[%s5465_s15] sm:$0xff]  ;;  %4361 = vmatprep.subr.msk.mxu0 %vm794_vm0, %v737_v17  ;;  %v724_v21 = vld [vmem:[%s5465_s15 + $0x18] sm:$0xff]  ;;  %v964_v25 = vld [vmem:[#allocation9 + $0x28] sm:$0xff]  ;;  %vm974_vm2 = vcmask 523264   ;;  %vm2425_vm3 = vcmask 1041409   ;;  %vm2427_vm4 = vcmask 1043459  }
 0x107   : > { %4363 = vmatprep.mubr.msk.f32.mxu0 %vm745_vm1, %v721_v18  ;;  %4362 = vmatpush3.msk.msra.mxu0 %vm794_vm0, %v737_v17  ;;  %v725_v22 = vld [vmem:[%s5465_s15 + $0x20] sm:$0xff]  ;;  %v965_v24 = vld [vmem:[#allocation9 + $0x30] sm:$0xff]  ;;  %v726_v26 = vld [vmem:[%s5465_s15 + $0x28] sm:$0xff]  ;;  %vm2429_vm5 = vcmask 1045509   ;;  %vm2431_vm6 = vcmask 1047559   ;;  %s6328_s24 = sld [smem:[#allocation35_spill]] }
 0x108   : > { %4364 = vmatmul.mubr.msk.f32.vlgmr.msra.gmra.mxu0 %vm745_vm1, %v722_v19  ;;  %v966_v23 = vld [vmem:[#allocation9 + $0x38] sm:$0xff]  ;;  %v727_v27 = vld [vmem:[%s5465_s15 + $0x30] sm:$0xff]  ;;  %v963_v28 = vld [vmem:[#allocation9 + $0x20] sm:$0xff] }
 0x109   : > { %4366 = vmatprep.mubr.msk.f32.mxu0 %vm745_vm1, %v723_v20  ;;  %4387 = vmatprep.subr.mxu1 %v966_v23  ;;  %v728_v29 = vld [vmem:[%s5465_s15 + $0x38] sm:$0xff]  ;;  %v729_v30 = vld [vmem:[%s5465_s15 + $0x40] sm:$0xff]  ;;  %v730_v31 = vld [vmem:[%s5465_s15 + $0x48] sm:$0xff] }
 0x10a   : > { %4388 = vmatpush3.msra.mxu1 %v966_v23  ;;  %v731_v32 = vld [vmem:[%s5465_s15 + $0x50] sm:$0xff]  ;;  %v732_v33 = vld [vmem:[%s5465_s15 + $0x58] sm:$0xff]  ;;  %v733_v34 = vld [vmem:[%s5465_s15 + $0x60] sm:$0xff] }
 0x10b   : > { %4389 = vmatprep.subr.mxu1 %v965_v24  ;;  %v734_v35 = vld [vmem:[%s5465_s15 + $0x68] sm:$0xff]  ;;  %v735_v36 = vld [vmem:[%s5465_s15 + $0x70] sm:$0xff]  ;;  %v736_v37 = vld [vmem:[%s5465_s15 + $0x78] sm:$0xff] }
 0x10c   : > { %4367 = vmatmul.mubr.msk.f32.gmra.mxu0 %vm745_vm1, %v724_v21  ;;  %4390 = vmatpush3.msra.mxu1 %v965_v24  ;;  %v962_v38 = vld [vmem:[#allocation9 + $0x18] sm:$0xff]  ;;  %v961_v39 = vld [vmem:[#allocation9 + $0x10] sm:$0xff]  ;;  %v960_v40 = vld [vmem:[#allocation9 + $0x8] sm:$0xff] }
 0x10d   : > { %4369 = vmatprep.mubr.msk.f32.mxu0 %vm745_vm1, %v725_v22  ;;  %4391 = vmatprep.subr.mxu1 %v964_v25  ;;  %v959_v41 = vld [vmem:[#allocation9] sm:$0xff]  ;;  %v1305_v42 = vld [vmem:[#allocation12 + $0x3c8] sm:$0xff]  ;;  %v5534_v5 = vld [vmem:[#allocation7] ss:$0 sm:$0xff]  ;;  %p4278_p7 = scmp.ne.s32.totalorder %s6328_s24, 3 }
 0x10e   : > { %4392 = vmatpush3.msra.mxu1 %v964_v25  ;;  %v1304_v43 = vld [vmem:[#allocation12 + $0x3c0] sm:$0xff]  ;;  %v1307_v44 = vld [vmem:[#allocation12 + $0x3d8] sm:$0xff]  ;;  %1354 = vmatprep.subr.mxu0 %v1305_v42  ;;  %v1297_v45 = vld [vmem:[#allocation12 + $0x388] sm:$0xff] }
 0x10f   : > { %4393 = vmatprep.subr.mxu1 %v963_v28  ;;  %v1296_v46 = vld [vmem:[#allocation12 + $0x380] sm:$0xff]  ;;  %1355 = vmatpush1.msra.mxu0 %v1304_v43  ;;  %v1289_v47 = vld [vmem:[#allocation12 + $0x348] sm:$0xff]  ;;  %v1306_v15 = vld [vmem:[#allocation12 + $0x3d0] sm:$0xff] }
 0x110   : > { %4370 = vmatmul.mubr.msk.f32.gmra.mxu0 %vm745_vm1, %v726_v26  ;;  %4394 = vmatpush3.msra.mxu1 %v963_v28  ;;  %v1288_v48 = vld [vmem:[#allocation12 + $0x340] sm:$0xff]  ;;  %v1281_v49 = vld [vmem:[#allocation12 + $0x308] sm:$0xff]  ;;  %v1299_v17 = vld [vmem:[#allocation12 + $0x398] sm:$0xff] }
 0x111   : > { %4372 = vmatprep.mubr.msk.f32.mxu0 %vm745_vm1, %v727_v27  ;;  %4395 = vmatprep.subr.mxu1 %v962_v38  ;;  %v1280_v50 = vld [vmem:[#allocation12 + $0x300] sm:$0xff]  ;;  %v1273_v51 = vld [vmem:[#allocation12 + $0x2c8] sm:$0xff]  ;;  %v1298_v20 = vld [vmem:[#allocation12 + $0x390] sm:$0xff] }
 0x112   : > { %4396 = vmatpush3.msra.mxu1 %v962_v38  ;;  %1356 = vmatprep.subr.mxu0 %v1297_v45  ;;  %v1272_v52 = vld [vmem:[#allocation12 + $0x2c0] sm:$0xff]  ;;  %v1265_v53 = vld [vmem:[#allocation12 + $0x288] sm:$0xff]  ;;  %v1291_v23 = vld [vmem:[#allocation12 + $0x358] sm:$0xff] }
 0x113   : > { %4397 = vmatprep.subr.mxu1 %v961_v39  ;;  %1357 = vmatpush1.msra.mxu0 %v1296_v46  ;;  %v1264_v54 = vld [vmem:[#allocation12 + $0x280] sm:$0xff]  ;;  %v1257_v55 = vld [vmem:[#allocation12 + $0x248] sm:$0xff]  ;;  %v1290_v25 = vld [vmem:[#allocation12 + $0x350] sm:$0xff] }
 0x114   : > { %4373 = vmatmul.mubr.msk.f32.gmra.mxu0 %vm745_vm1, %v728_v29  ;;  %4398 = vmatpush3.msra.mxu1 %v961_v39  ;;  %v1256_v56 = vld [vmem:[#allocation12 + $0x240] sm:$0xff]  ;;  %v1249_v57 = vld [vmem:[#allocation12 + $0x208] sm:$0xff]  ;;  %v1283_v27 = vld [vmem:[#allocation12 + $0x318] sm:$0xff] }
 0x115   : > { %4375 = vmatprep.mubr.msk.f32.mxu0 %vm745_vm1, %v729_v30  ;;  %4399 = vmatprep.subr.mxu1 %v960_v40  ;;  %v1248_v58 = vld [vmem:[#allocation12 + $0x200] sm:$0xff]  ;;  %v1241_v59 = vld [vmem:[#allocation12 + $0x1c8] sm:$0xff]  ;;  %v1282_v30 = vld [vmem:[#allocation12 + $0x310] sm:$0xff] }
 0x116   : > { %4400 = vmatpush3.msra.mxu1 %v960_v40  ;;  %1358 = vmatprep.subr.mxu0 %v1289_v47  ;;  %v1240_v60 = vld [vmem:[#allocation12 + $0x1c0] sm:$0xff]  ;;  %v1233_v61 = vld [vmem:[#allocation12 + $0x188] sm:$0xff]  ;;  %v1266_v40 = vld [vmem:[#allocation12 + $0x290] sm:$0xff] }
 0x117   : > { %4401 = vmatprep.subr.mxu1 %v959_v41  ;;  %1359 = vmatpush1.msra.mxu0 %v1288_v48  ;;  %v1232_v62 = vld [vmem:[#allocation12 + $0x180] sm:$0xff]  ;;  %v1225_v63 = vld [vmem:[#allocation12 + $0x148] sm:$0xff]  ;;  %v1259_v43 = vld [vmem:[#allocation12 + $0x258] sm:$0xff] }
 0x118   : > { %4376 = vmatmul.mubr.msk.f32.gmra.mxu0 %vm745_vm1, %v730_v31  ;;  %4402 = vmatpush3.msra.mxu1 %v959_v41  ;;  %v1224_v0 = vld [vmem:[#allocation12 + $0x140] sm:$0xff]  ;;  %v1217_v1 = vld [vmem:[#allocation12 + $0x108] sm:$0xff]  ;;  %v1258_v45 = vld [vmem:[#allocation12 + $0x250] sm:$0xff] }
 0x119   : > { %4378 = vmatprep.mubr.msk.f32.mxu0 %vm745_vm1, %v731_v32  ;;  %1515 = vmatprep.subr.mxu1 %v1307_v44  ;;  %v1216_v2 = vld [vmem:[#allocation12 + $0x100] sm:$0xff]  ;;  %v1209_v3 = vld [vmem:[#allocation12 + $0xc8] sm:$0xff]  ;;  %v1251_v47 = vld [vmem:[#allocation12 + $0x218] sm:$0xff] }
 0x11a   : > { %1360 = vmatprep.subr.mxu0 %v1281_v49  ;;  %v1208_v4 = vld [vmem:[#allocation12 + $0xc0] sm:$0xff] }
 0x11b   : > { %1361 = vmatpush1.msra.mxu0 %v1280_v50  ;;  %v1250_v50 = vld [vmem:[#allocation12 + $0x210] sm:$0xff] }
 0x11c   : > { %4379 = vmatmul.mubr.msk.f32.gmra.mxu0 %vm745_vm1, %v732_v33  ;;  %1362 = vmatprep.subr.mxu0 %v1273_v51  ;;  %v1275_v33 = vld [vmem:[#allocation12 + $0x2d8] sm:$0xff] }
 0x11d   : > { %4381 = vmatprep.mubr.msk.f32.mxu0 %vm745_vm1, %v733_v34  ;;  %1363 = vmatpush1.msra.mxu0 %v1272_v52 }
 0x11e   : > { %1364 = vmatprep.subr.mxu0 %v1265_v53  ;;  %v1243_v53 = vld [vmem:[#allocation12 + $0x1d8] sm:$0xff] }
 0x11f   : > { %1365 = vmatpush1.msra.mxu0 %v1264_v54 }
 0x120   : > { %4382 = vmatmul.mubr.msk.f32.gmra.mxu0 %vm745_vm1, %v734_v35  ;;  %1366 = vmatprep.subr.mxu0 %v1257_v55  ;;  %v1274_v35 = vld [vmem:[#allocation12 + $0x2d0] sm:$0xff] }
 0x121   : > { %4384 = vmatprep.mubr.msk.f32.mxu0 %vm745_vm1, %v735_v36  ;;  %1367 = vmatpush1.msra.mxu0 %v1256_v56  ;;  %v1242_v55 = vld [vmem:[#allocation12 + $0x1d0] sm:$0xff] }
 0x122   : > { %1368 = vmatprep.subr.mxu0 %v1249_v57  ;;  %v1235_v57 = vld [vmem:[#allocation12 + $0x198] sm:$0xff] }
 0x123   : > { %1369 = vmatpush1.msra.mxu0 %v1248_v58 }
 0x124   : > { %4385 = vmatmul.mubr.msk.f32.gmra.mxu0 %vm745_vm1, %v736_v37  ;;  %1370 = vmatprep.subr.mxu0 %v1241_v59  ;;  %v1267_v37 = vld [vmem:[#allocation12 + $0x298] sm:$0xff] }
 0x125   : > { %1371 = vmatpush1.msra.mxu0 %v1240_v60  ;;  %v1234_v60 = vld [vmem:[#allocation12 + $0x190] sm:$0xff] }
 0x126   : > { %1372 = vmatprep.subr.mxu0 %v1233_v61 }
 0x127   : > { %1373 = vmatpush1.msra.mxu0 %v1232_v62 }
 0x128   : > { %1374 = vmatprep.subr.mxu0 %v1225_v63  ;;  %v1227_v63 = vld [vmem:[#allocation12 + $0x158] sm:$0xff] }
 0x129   : > { %1375 = vmatpush1.msra.mxu0 %v1224_v0 }
 0x12a   : > { %1376 = vmatprep.subr.mxu0 %v1217_v1  ;;  %v1226_v1 = vld [vmem:[#allocation12 + $0x150] sm:$0xff] }
 0x12b   : > { %1377 = vmatpush1.msra.mxu0 %v1216_v2 }
 0x12c   : > { %1378 = vmatprep.subr.mxu0 %v1209_v3  ;;  %v1219_v3 = vld [vmem:[#allocation12 + $0x118] sm:$0xff] }
 0x12d   : > { %1379 = vmatpush1.msra.mxu0 %v1208_v4 }
 0x1c8   : > { %v4365_v6 = vpop.f32.mrf.mxu0 }
 0x1c9   : > { %v870_v7 = vadd.f32 %v4365_v6, %v5534_v5 }
 0x1ca   : > { %v864_v8 = vpop.f32.mrf.mxu0 }
 0x1cb   : > { %v865_v9 = vadd.f32 %v5534_v5, %v864_v8  ;;  %v944_v13 = vmax.f32 %v870_v7, 0.0  ;;  %v1218_v7 = vld [vmem:[#allocation12 + $0x110] sm:$0xff] }
 0x1cc   : > { %v4368_v10 = vpop.f32.mrf.mxu0 }
 0x1cd   : > { %v943_v11 = vmax.f32 %v865_v9, 0.0  ;;  %v880_v12 = vadd.f32 %v4368_v10, %v5534_v5  ;;  %v1211_v10 = vld [vmem:[#allocation12 + $0xd8] sm:$0xff] }
 0x1ce   : > { %v874_v14 = vpop.f32.mrf.mxu0 }
 0x1cf   : > { %v875_v16 = vadd.f32 %v5534_v5, %v874_v14  ;;  %4403 = vmatprep.mubr.msk.f32.mxu1 %vm974_vm2, %v943_v11  ;;  %v946_v18 = vmax.f32 %v880_v12, 0.0 }
 0x1d0   : > { %4404 = vmatmul.mubr.msk.f32.vlgmr.msra.gmra.mxu1 %vm974_vm2, %v944_v13  ;;  %v4371_v19 = vpop.f32.mrf.mxu0 }
 0x1d1   : > { %v945_v21 = vmax.f32 %v875_v16, 0.0  ;;  %v890_v22 = vadd.f32 %v4371_v19, %v5534_v5  ;;  %1516 = vmatpush1.msra.mxu1 %v1306_v15  ;;  %v1210_v15 = vld [vmem:[#allocation12 + $0xd0] sm:$0xff]  ;;  %v1201_v16 = vld [vmem:[#allocation12 + $0x88] sm:$0xff] }
 0x1d2   : > { %v884_v24 = vpop.f32.mrf.mxu0  ;;  %1517 = vmatprep.subr.mxu1 %v1299_v17  ;;  %v1203_v17 = vld [vmem:[#allocation12 + $0x98] sm:$0xff]  ;;  %1380 = vmatprep.subr.mxu0 %v1201_v16  ;;  %v1202_v19 = vld [vmem:[#allocation12 + $0x90] sm:$0xff] }
 0x1d3   : > { %4406 = vmatprep.mubr.msk.f32.mxu1 %vm974_vm2, %v945_v21  ;;  %v885_v26 = vadd.f32 %v5534_v5, %v884_v24  ;;  %1518 = vmatpush1.msra.mxu1 %v1298_v20  ;;  %v948_v28 = vmax.f32 %v890_v22, 0.0  ;;  %v1195_v20 = vld [vmem:[#allocation12 + $0x58] sm:$0xff]  ;;  %v1192_v21 = vld [vmem:[#allocation12 + $0x40] sm:$0xff]  ;;  %v1194_v22 = vld [vmem:[#allocation12 + $0x50] sm:$0xff] }
 0x1d4   : > { %4407 = vmatmul.mubr.msk.f32.gmra.mxu1 %vm974_vm2, %v946_v18  ;;  %v4374_v29 = vpop.f32.mrf.mxu0  ;;  %1519 = vmatprep.subr.mxu1 %v1291_v23  ;;  %v1200_v18 = vld [vmem:[#allocation12 + $0x80] sm:$0xff]  ;;  %v1185_v23 = vld [vmem:[#allocation12 + $0x8] sm:$0xff]  ;;  %v1187_v24 = vld [vmem:[#allocation12 + $0x18] sm:$0xff] }
 0x1d5   : > { %v947_v31 = vmax.f32 %v885_v26, 0.0  ;;  %v900_v32 = vadd.f32 %v4374_v29, %v5534_v5  ;;  %1520 = vmatpush1.msra.mxu1 %v1290_v25  ;;  %1381 = vmatpush1.msra.mxu0 %v1200_v18  ;;  %v1184_v25 = vld [vmem:[#allocation12] sm:$0xff]  ;;  %v1186_v26 = vld [vmem:[#allocation12 + $0x10] sm:$0xff]  ;;  %v5570_v29 = vld [vmem:[#allocation12 + $0x3f8] sm:$0xff] }
 0x1d6   : > { %v894_v34 = vpop.f32.mrf.mxu0  ;;  %1521 = vmatprep.subr.mxu1 %v1283_v27  ;;  %v5151_v27 = vmov 0.0   ;;  %v5654_v18 = vld [vmem:[#allocation12 + $0x278] sm:$0xff] }
 0x1d7   : > { %4409 = vmatprep.mubr.msk.f32.mxu1 %vm974_vm2, %v947_v31  ;;  %v895_v36 = vadd.f32 %v5534_v5, %v894_v34  ;;  %1522 = vmatpush1.msra.mxu1 %v1282_v30  ;;  %v950_v38 = vmax.f32 %v900_v32, 0.0  ;;  %v5573_v31 = vld [vmem:[#allocation10] ss:$0 sm:$0xff] }
 0x1d8   : > { %4410 = vmatmul.mubr.msk.f32.gmra.mxu1 %vm974_vm2, %v948_v28  ;;  %v4377_v39 = vpop.f32.mrf.mxu0  ;;  %1523 = vmatprep.subr.mxu1 %v1275_v33  ;;  %v1309_v28 = vld [vmem:[#allocation12 + $0x3e8] sm:$0xff] }
 0x1d9   : > { %v949_v41 = vmax.f32 %v895_v36, 0.0  ;;  %v910_v42 = vadd.f32 %v4377_v39, %v5534_v5  ;;  %1524 = vmatpush1.msra.mxu1 %v1274_v35  ;;  %1418 = vmatprep.mubr.f32.mxu0 %v5151_v27  ;;  %v1301_v39 = vld [vmem:[#allocation12 + $0x3a8] sm:$0xff] }
 0x1da   : > { %v904_v44 = vpop.f32.mrf.mxu0  ;;  %1525 = vmatprep.subr.mxu1 %v1267_v37  ;;  %v1308_v37 = vld [vmem:[#allocation12 + $0x3e0] sm:$0xff] }
 0x1db   : > { %4412 = vmatprep.mubr.msk.f32.mxu1 %vm974_vm2, %v949_v41  ;;  %v905_v46 = vadd.f32 %v5534_v5, %v904_v44  ;;  %1526 = vmatpush1.msra.mxu1 %v1266_v40  ;;  %v952_v48 = vmax.f32 %v910_v42, 0.0  ;;  %v1300_v40 = vld [vmem:[#allocation12 + $0x3a0] sm:$0xff]  ;;  %v5581_v41 = vld [vmem:[#allocation12 + $0x3f0] sm:$0xff] }
 0x1dc   : > { %4413 = vmatmul.mubr.msk.f32.gmra.mxu1 %vm974_vm2, %v950_v38  ;;  %v4380_v49 = vpop.f32.mrf.mxu0  ;;  %1527 = vmatprep.subr.mxu1 %v1259_v43 }
 0x1dd   : > { %v951_v51 = vmax.f32 %v905_v46, 0.0  ;;  %v920_v52 = vadd.f32 %v4380_v49, %v5534_v5  ;;  %1528 = vmatpush1.msra.mxu1 %v1258_v45  ;;  %v1293_v45 = vld [vmem:[#allocation12 + $0x368] sm:$0xff]  ;;  %v5589_v46 = vld [vmem:[#allocation12 + $0x3b8] sm:$0xff] }
 0x1de   : > { %v914_v54 = vpop.f32.mrf.mxu0  ;;  %1529 = vmatprep.subr.mxu1 %v1251_v47  ;;  %v1292_v47 = vld [vmem:[#allocation12 + $0x360] sm:$0xff] }
 0x1df   : > { %4415 = vmatprep.mubr.msk.f32.mxu1 %vm974_vm2, %v951_v51  ;;  %v915_v56 = vadd.f32 %v5534_v5, %v914_v54  ;;  %1530 = vmatpush1.msra.mxu1 %v1250_v50  ;;  %v954_v58 = vmax.f32 %v920_v52, 0.0  ;;  %v1285_v52 = vld [vmem:[#allocation12 + $0x328] sm:$0xff]  ;;  %v1284_v54 = vld [vmem:[#allocation12 + $0x320] sm:$0xff] }
 0x1e0   : > { %4416 = vmatmul.mubr.msk.f32.gmra.mxu1 %vm974_vm2, %v952_v48  ;;  %v4383_v59 = vpop.f32.mrf.mxu0  ;;  %1531 = vmatprep.subr.mxu1 %v1243_v53  ;;  %v5593_v48 = vld [vmem:[#allocation12 + $0x3b0] sm:$0xff]  ;;  %v5602_v53 = vld [vmem:[#allocation12 + $0x378] sm:$0xff] }
 0x1e1   : > { %v953_v61 = vmax.f32 %v915_v56, 0.0  ;;  %v930_v62 = vadd.f32 %v4383_v59, %v5534_v5  ;;  %1532 = vmatpush1.msra.mxu1 %v1242_v55  ;;  %v5606_v55 = vld [vmem:[#allocation12 + $0x370] sm:$0xff]  ;;  %v1277_v59 = vld [vmem:[#allocation12 + $0x2e8] sm:$0xff] }
 0x1e2   : > { %v924_v0 = vpop.f32.mrf.mxu0  ;;  %1533 = vmatprep.subr.mxu1 %v1235_v57 }
 0x1e3   : > { %4418 = vmatprep.mubr.msk.f32.mxu1 %vm974_vm2, %v953_v61  ;;  %v925_v2 = vadd.f32 %v5534_v5, %v924_v0  ;;  %1534 = vmatpush1.msra.mxu1 %v1234_v60  ;;  %v956_v4 = vmax.f32 %v930_v62, 0.0  ;;  %v5615_v60 = vld [vmem:[#allocation12 + $0x338] sm:$0xff]  ;;  %v1276_v61 = vld [vmem:[#allocation12 + $0x2e0] sm:$0xff]  ;;  %v5619_v62 = vld [vmem:[#allocation12 + $0x330] sm:$0xff] }
 0x1e4   : > { %4419 = vmatmul.mubr.msk.f32.gmra.mxu1 %vm974_vm2, %v954_v58  ;;  %v4386_v6 = vpop.f32.mrf.mxu0  ;;  %1535 = vmatprep.subr.mxu1 %v1227_v63 }
 0x1e5   : > { %v955_v8 = vmax.f32 %v925_v2, 0.0  ;;  %v940_v9 = vadd.f32 %v4386_v6, %v5534_v5  ;;  %1536 = vmatpush1.msra.mxu1 %v1226_v1  ;;  %v1269_v2 = vld [vmem:[#allocation12 + $0x2a8] sm:$0xff]  ;;  %v5632_v6 = vld [vmem:[#allocation12 + $0x2f0] sm:$0xff] }
 0x1e6   : > { %v934_v11 = vpop.f32.mrf.mxu0  ;;  %1537 = vmatprep.subr.mxu1 %v1219_v3  ;;  %v5628_v3 = vld [vmem:[#allocation12 + $0x2f8] sm:$0xff] }
 0x1e7   : > { %4421 = vmatprep.mubr.msk.f32.mxu1 %vm974_vm2, %v955_v8  ;;  %v935_v12 = vadd.f32 %v5534_v5, %v934_v11  ;;  %1538 = vmatpush1.msra.mxu1 %v1218_v7  ;;  %v958_v13 = vmax.f32 %v940_v9, 0.0  ;;  %v1193_v5 = vld [vmem:[#allocation12 + $0x48] sm:$0xff]  ;;  %v5641_v11 = vld [vmem:[#allocation12 + $0x2b8] sm:$0xff] }
 0x1e8   : > { %4422 = vmatmul.mubr.msk.f32.gmra.mxu1 %vm974_vm2, %v956_v4  ;;  %1539 = vmatprep.subr.mxu1 %v1211_v10  ;;  %v1268_v4 = vld [vmem:[#allocation12 + $0x2a0] sm:$0xff]  ;;  %v1261_v10 = vld [vmem:[#allocation12 + $0x268] sm:$0xff] }
 0x1e9   : > { %v957_v14 = vmax.f32 %v935_v12, 0.0  ;;  %1540 = vmatpush1.msra.mxu1 %v1210_v15  ;;  %1382 = vmatprep.subr.mxu0 %v1193_v5  ;;  %v1260_v12 = vld [vmem:[#allocation12 + $0x260] sm:$0xff]  ;;  %v5658_v5 = vld [vmem:[#allocation12 + $0x270] sm:$0xff] }
 0x1ea   : > { %1541 = vmatprep.subr.mxu1 %v1203_v17  ;;  %1383 = vmatpush1.msra.mxu0 %v1192_v21  ;;  %v1253_v17 = vld [vmem:[#allocation12 + $0x228] sm:$0xff] }
 0x1eb   : > { %4424 = vmatprep.mubr.msk.f32.mxu1 %vm974_vm2, %v957_v14  ;;  %1542 = vmatpush1.msra.mxu1 %v1202_v19  ;;  %v1252_v19 = vld [vmem:[#allocation12 + $0x220] sm:$0xff] }
 0x1ec   : > { %4425 = vmatmul.mubr.msk.f32.gmra.mxu1 %vm974_vm2, %v958_v13  ;;  %1543 = vmatprep.subr.mxu1 %v1195_v20  ;;  %v5645_v13 = vld [vmem:[#allocation12 + $0x2b0] sm:$0xff] }
 0x1ed   : > { %1544 = vmatpush1.msra.mxu1 %v1194_v22  ;;  %1384 = vmatprep.subr.mxu0 %v1185_v23  ;;  %v1245_v23 = vld [vmem:[#allocation12 + $0x1e8] sm:$0xff] }
 0x1ee   : > { %1545 = vmatprep.subr.mxu1 %v1187_v24  ;;  %1385 = vmatpush1.msra.mxu0 %v1184_v25  ;;  %v5667_v24 = vld [vmem:[#allocation12 + $0x238] sm:$0xff]  ;;  %v1244_v25 = vld [vmem:[#allocation12 + $0x1e0] sm:$0xff] }
 0x1ef   : > { %1546 = vmatpush1.msra.mxu1 %v1186_v26  ;;  %1579 = vmatprep.mubr.f32.mxu1 %v5151_v27  ;;  %v5671_v26 = vld [vmem:[#allocation12 + $0x230] sm:$0xff] }
 0x1f0   : > { %1676 = vmatprep.subr.mxu0 %v1309_v28  ;;  %4427 = vmatprep.subr.mxu1 %v5570_v29 }
 0x290   : > { %v4405_v30 = vpop.f32.mrf.mxu1 }
 0x291   : > { %v1095_v35 = vadd.f32 %v4405_v30, %v5573_v31 }
 0x292   : > { %v1089_v32 = vpop.f32.mrf.mxu1 }
 0x293   : > { %v1090_v33 = vadd.f32 %v5573_v31, %v1089_v32  ;;  %v5584_v42 = vmax.f32 %v1095_v35, 0.0  ;;  %v1236_v35 = vld [vmem:[#allocation12 + $0x1a0] sm:$0xff] }
 0x294   : > { %v4408_v34 = vpop.f32.mrf.mxu1 }
 0x295   : > { %v5577_v36 = vmax.f32 %v1090_v33, 0.0  ;;  %v1105_v49 = vadd.f32 %v4408_v34, %v5573_v31  ;;  %v1237_v33 = vld [vmem:[#allocation12 + $0x1a8] sm:$0xff]  ;;  %v5680_v34 = vld [vmem:[#allocation12 + $0x1f8] sm:$0xff] }
 0x296   : > { %v1099_v38 = vpop.f32.mrf.mxu1 }
 0x297   : > { %1419 = vmatmul.mubr.f32.vlgmr.msra.gmra.mxu0 %v5577_v36  ;;  %1580 = vmatmul.mubr.f32.vlgmr.msra.gmra.mxu1 %v5577_v36  ;;  %v1100_v43 = vadd.f32 %v5573_v31, %v1099_v38  ;;  %v5610_v56 = vmax.f32 %v1105_v49, 0.0 }
 0x298   : > { %1677 = vmatpush1.msra.mxu0 %v1308_v37  ;;  %1424 = vmatprep.mubr.f32.mxu0 %v5151_v27  ;;  %v4411_v44 = vpop.f32.mrf.mxu1  ;;  %v5684_v37 = vld [vmem:[#allocation12 + $0x1f0] sm:$0xff] }
 0x299   : > { %1585 = vmatprep.mubr.f32.mxu1 %v5151_v27  ;;  %1678 = vmatprep.subr.mxu0 %v1301_v39  ;;  %v5598_v50 = vmax.f32 %v1100_v43, 0.0  ;;  %v1115_v63 = vadd.f32 %v4411_v44, %v5573_v31  ;;  %v1229_v43 = vld [vmem:[#allocation12 + $0x168] sm:$0xff]  ;;  %v5693_v44 = vld [vmem:[#allocation12 + $0x1b8] sm:$0xff] }
 0x29a   : > { %1679 = vmatpush1.msra.mxu0 %v1300_v40  ;;  %4443 = vmatpush1.msra.mxu1 %v5581_v41  ;;  %v1109_v51 = vpop.f32.mrf.mxu1 }
 0x29b   : > { %1425 = vmatmul.mubr.f32.gmra.mxu0 %v5584_v42  ;;  %1586 = vmatmul.mubr.f32.gmra.mxu1 %v5584_v42  ;;  %v1110_v57 = vadd.f32 %v5573_v31, %v1109_v51  ;;  %v5636_v7 = vmax.f32 %v1115_v63, 0.0 }
 0x29c   : > { %1430 = vmatprep.mubr.f32.mxu0 %v5151_v27  ;;  %1591 = vmatprep.mubr.f32.mxu1 %v5151_v27  ;;  %v4414_v58 = vpop.f32.mrf.mxu1 }
 0x29d   : > { %1680 = vmatprep.subr.mxu0 %v1293_v45  ;;  %4428 = vmatprep.subr.mxu1 %v5589_v46  ;;  %v5624_v0 = vmax.f32 %v1110_v57, 0.0  ;;  %v1125_v14 = vadd.f32 %v4414_v58, %v5573_v31  ;;  %v1228_v45 = vld [vmem:[#allocation12 + $0x160] sm:$0xff]  ;;  %v5706_v57 = vld [vmem:[#allocation12 + $0x178] sm:$0xff] }
 0x29e   : > { %1681 = vmatpush1.msra.mxu0 %v1292_v47  ;;  %4444 = vmatpush1.msra.mxu1 %v5593_v48  ;;  %v1119_v1 = vpop.f32.mrf.mxu1  ;;  %v5697_v47 = vld [vmem:[#allocation12 + $0x1b0] sm:$0xff]  ;;  %v1220_v58 = vld [vmem:[#allocation12 + $0x120] sm:$0xff] }
 0x29f   : > { %1431 = vmatmul.mubr.f32.gmra.mxu0 %v5598_v50  ;;  %1592 = vmatmul.mubr.f32.gmra.mxu1 %v5598_v50  ;;  %v1120_v8 = vadd.f32 %v5573_v31, %v1119_v1  ;;  %v5662_v20 = vmax.f32 %v1125_v14, 0.0 }
 0x2a0   : > { %1436 = vmatprep.mubr.f32.mxu0 %v5151_v27  ;;  %1597 = vmatprep.mubr.f32.mxu1 %v5151_v27  ;;  %v4417_v9 = vpop.f32.mrf.mxu1 }
 0x2a1   : > { %1682 = vmatprep.subr.mxu0 %v1285_v52  ;;  %4429 = vmatprep.subr.mxu1 %v5602_v53  ;;  %v5650_v15 = vmax.f32 %v1120_v8, 0.0  ;;  %v1135_v28 = vadd.f32 %v4417_v9, %v5573_v31  ;;  %v1212_v8 = vld [vmem:[#allocation12 + $0xe0] sm:$0xff]  ;;  %v5723_v9 = vld [vmem:[#allocation12 + $0x130] sm:$0xff] }
 0x2a2   : > { %1683 = vmatpush1.msra.mxu0 %v1284_v54  ;;  %4445 = vmatpush1.msra.mxu1 %v5606_v55  ;;  %v1129_v16 = vpop.f32.mrf.mxu1  ;;  %v1221_v54 = vld [vmem:[#allocation12 + $0x128] sm:$0xff] }
 0x2a3   : > { %1437 = vmatmul.mubr.f32.gmra.mxu0 %v5610_v56  ;;  %1598 = vmatmul.mubr.f32.gmra.mxu1 %v5610_v56  ;;  %v1130_v21 = vadd.f32 %v5573_v31, %v1129_v16  ;;  %v5688_v38 = vmax.f32 %v1135_v28, 0.0  ;;  %v1205_v16 = vld [vmem:[#allocation12 + $0xa8] sm:$0xff]  ;;  %v5745_v28 = vld [vmem:[#allocation12 + $0xb8] sm:$0xff] }
 0x2a4   : > { %1442 = vmatprep.mubr.f32.mxu0 %v5151_v27  ;;  %1603 = vmatprep.mubr.f32.mxu1 %v5151_v27  ;;  %v4420_v22 = vpop.f32.mrf.mxu1 }
 0x2a5   : > { %1684 = vmatprep.subr.mxu0 %v1277_v59  ;;  %4430 = vmatprep.subr.mxu1 %v5615_v60  ;;  %v5676_v30 = vmax.f32 %v1130_v21, 0.0  ;;  %v1145_v49 = vadd.f32 %v4420_v22, %v5573_v31  ;;  %v5710_v59 = vld [vmem:[#allocation12 + $0x170] sm:$0xff] }
 0x2a6   : > { %1685 = vmatpush1.msra.mxu0 %v1276_v61  ;;  %4446 = vmatpush1.msra.mxu1 %v5619_v62  ;;  %v1139_v32 = vpop.f32.mrf.mxu1  ;;  %v5736_v21 = vld [vmem:[#allocation12 + $0xf0] sm:$0xff] }
 0x2a7   : > { %1443 = vmatmul.mubr.f32.gmra.mxu0 %v5624_v0  ;;  %1604 = vmatmul.mubr.f32.gmra.mxu1 %v5624_v0  ;;  %v1140_v39 = vadd.f32 %v5573_v31, %v1139_v32  ;;  %v5714_v61 = vmax.f32 %v1145_v49, 0.0  ;;  %v1196_v32 = vld [vmem:[#allocation12 + $0x60] sm:$0xff]  ;;  %v5762_v49 = vld [vmem:[#allocation12 + $0x70] sm:$0xff] }
 0x2a8   : > { %1448 = vmatprep.mubr.f32.mxu0 %v5151_v27  ;;  %1609 = vmatprep.mubr.f32.mxu1 %v5151_v27  ;;  %v4423_v40 = vpop.f32.mrf.mxu1 }
 0x2a9   : > { %1686 = vmatprep.subr.mxu0 %v1269_v2  ;;  %4431 = vmatprep.subr.mxu1 %v5628_v3  ;;  %v5702_v51 = vmax.f32 %v1140_v39, 0.0  ;;  %v1213_v2 = vld [vmem:[#allocation12 + $0xe8] sm:$0xff] }
 0x2aa   : > { %1687 = vmatpush1.msra.mxu0 %v1268_v4  ;;  %4447 = vmatpush1.msra.mxu1 %v5632_v6  ;;  %v1149_v52 = vpop.f32.mrf.mxu1  ;;  %v5719_v4 = vld [vmem:[#allocation12 + $0x138] sm:$0xff] }
 0x2ab   : > { %1449 = vmatmul.mubr.f32.gmra.mxu0 %v5636_v7  ;;  %1610 = vmatmul.mubr.f32.gmra.mxu1 %v5636_v7  ;;  %v1150_v63 = vadd.f32 %v5573_v31, %v1149_v52  ;;  %v5769_v52 = vld [vmem:[#allocation12 + $0x38] sm:$0xff] }
 0x2ac   : > { %1454 = vmatprep.mubr.f32.mxu0 %v5151_v27  ;;  %1615 = vmatprep.mubr.f32.mxu1 %v5151_v27  ;;  %v4426_v1 = vpop.f32.mrf.mxu1 }
 0x2ad   : > { %1688 = vmatprep.subr.mxu0 %v1261_v10  ;;  %4432 = vmatprep.subr.mxu1 %v5641_v11  ;;  %v1155_v10 = vadd.f32 %v4423_v40, %v5573_v31  ;;  %v1189_v40 = vld [vmem:[#allocation12 + $0x28] sm:$0xff] }
 0x2ae   : > { %1689 = vmatpush1.msra.mxu0 %v1260_v12  ;;  %4448 = vmatpush1.msra.mxu1 %v5645_v13  ;;  %v5728_v12 = vmax.f32 %v1150_v63, 0.0  ;;  %v1159_v14 = vpop.f32.mrf.mxu1 }
 0x2af   : > { %1455 = vmatmul.mubr.f32.gmra.mxu0 %v5650_v15  ;;  %1616 = vmatmul.mubr.f32.gmra.mxu1 %v5650_v15  ;;  %v5740_v22 = vmax.f32 %v1155_v10, 0.0 }
 0x2b0   : > { %1460 = vmatprep.mubr.f32.mxu0 %v5151_v27  ;;  %1621 = vmatprep.mubr.f32.mxu1 %v5151_v27 }
 0x2b1   : > { %1690 = vmatprep.subr.mxu0 %v1253_v17  ;;  %4433 = vmatprep.subr.mxu1 %v5654_v18  ;;  %v5732_v17 = vld [vmem:[#allocation12 + $0xf8] sm:$0xff] }
 0x2b2   : > { %1691 = vmatpush1.msra.mxu0 %v1252_v19  ;;  %4449 = vmatpush1.msra.mxu1 %v5658_v5  ;;  %v1204_v19 = vld [vmem:[#allocation12 + $0xa0] sm:$0xff] }
 0x2b3   : > { %1461 = vmatmul.mubr.f32.gmra.mxu0 %v5662_v20  ;;  %1622 = vmatmul.mubr.f32.gmra.mxu1 %v5662_v20 }
 0x2b4   : > { %1466 = vmatprep.mubr.f32.mxu0 %v5151_v27  ;;  %1627 = vmatprep.mubr.f32.mxu1 %v5151_v27 }
 0x2b5   : > { %1692 = vmatprep.subr.mxu0 %v1245_v23  ;;  %4434 = vmatprep.subr.mxu1 %v5667_v24  ;;  %v1160_v23 = vadd.f32 %v5573_v31, %v1159_v14 }
 0x2b6   : > { %1693 = vmatpush1.msra.mxu0 %v1244_v25  ;;  %4450 = vmatpush1.msra.mxu1 %v5671_v26  ;;  %v1197_v25 = vld [vmem:[#allocation12 + $0x68] sm:$0xff] }
 0x2b7   : > { %1467 = vmatmul.mubr.f32.gmra.mxu0 %v5676_v30  ;;  %1628 = vmatmul.mubr.f32.gmra.mxu1 %v5676_v30  ;;  %v5754_v39 = vmax.f32 %v1160_v23, 0.0 }
 0x2b8   : > { %1472 = vmatprep.mubr.f32.mxu0 %v5151_v27  ;;  %1633 = vmatprep.mubr.f32.mxu1 %v5151_v27 }
 0x2b9   : > { %1694 = vmatprep.subr.mxu0 %v1237_v33  ;;  %4435 = vmatprep.subr.mxu1 %v5680_v34  ;;  %v5749_v33 = vld [vmem:[#allocation12 + $0xb0] sm:$0xff] }
 0x2ba   : > { %1695 = vmatpush1.msra.mxu0 %v1236_v35  ;;  %4451 = vmatpush1.msra.mxu1 %v5684_v37  ;;  %v1165_v35 = vadd.f32 %v4426_v1, %v5573_v31 }
 0x2bb   : > { %1473 = vmatmul.mubr.f32.gmra.mxu0 %v5688_v38  ;;  %1634 = vmatmul.mubr.f32.gmra.mxu1 %v5688_v38 }
 0x2bc   : > { %1478 = vmatprep.mubr.f32.mxu0 %v5151_v27  ;;  %1639 = vmatprep.mubr.f32.mxu1 %v5151_v27  ;;  %v5766_v31 = vmax.f32 %v1165_v35, 0.0 }
 0x2bd   : > { %1696 = vmatprep.subr.mxu0 %v1229_v43  ;;  %4436 = vmatprep.subr.mxu1 %v5693_v44  ;;  %v5758_v43 = vld [vmem:[#allocation12 + $0x78] sm:$0xff] }
 0x2be   : > { %1697 = vmatpush1.msra.mxu0 %v1228_v45  ;;  %4452 = vmatpush1.msra.mxu1 %v5697_v47  ;;  %v1188_v45 = vld [vmem:[#allocation12 + $0x20] sm:$0xff] }
 0x2bf   : > { %1479 = vmatmul.mubr.f32.gmra.mxu0 %v5702_v51  ;;  %1640 = vmatmul.mubr.f32.gmra.mxu1 %v5702_v51 }
 0x2c0   : > { %1484 = vmatprep.mubr.f32.mxu0 %v5151_v27  ;;  %1645 = vmatprep.mubr.f32.mxu1 %v5151_v27 }
 0x2c1   : > { %1698 = vmatprep.subr.mxu0 %v1221_v54  ;;  %4437 = vmatprep.subr.mxu1 %v5706_v57  ;;  %v5772_v54 = vld [vmem:[#allocation12 + $0x30] sm:$0xff] }
 0x2c2   : > { %1699 = vmatpush1.msra.mxu0 %v1220_v58  ;;  %4453 = vmatpush1.msra.mxu1 %v5710_v59 }
 0x2c3   : > { %1485 = vmatmul.mubr.f32.gmra.mxu0 %v5714_v61  ;;  %1646 = vmatmul.mubr.f32.gmra.mxu1 %v5714_v61 }
 0x2c4   : > { %1490 = vmatprep.mubr.f32.mxu0 %v5151_v27  ;;  %1651 = vmatprep.mubr.f32.mxu1 %v5151_v27 }
 0x2c5   : > { %1700 = vmatprep.subr.mxu0 %v1213_v2  ;;  %4438 = vmatprep.subr.mxu1 %v5719_v4 }
 0x2c6   : > { %1701 = vmatpush1.msra.mxu0 %v1212_v8  ;;  %4454 = vmatpush1.msra.mxu1 %v5723_v9 }
 0x2c7   : > { %1491 = vmatmul.mubr.f32.gmra.mxu0 %v5728_v12  ;;  %1652 = vmatmul.mubr.f32.gmra.mxu1 %v5728_v12 }
 0x2c8   : > { %1496 = vmatprep.mubr.f32.mxu0 %v5151_v27  ;;  %1657 = vmatprep.mubr.f32.mxu1 %v5151_v27 }
 0x2c9   : > { %1702 = vmatprep.subr.mxu0 %v1205_v16  ;;  %4439 = vmatprep.subr.mxu1 %v5732_v17 }
 0x2ca   : > { %1703 = vmatpush1.msra.mxu0 %v1204_v19  ;;  %4455 = vmatpush1.msra.mxu1 %v5736_v21 }
 0x2cb   : > { %1497 = vmatmul.mubr.f32.gmra.mxu0 %v5740_v22  ;;  %1658 = vmatmul.mubr.f32.gmra.mxu1 %v5740_v22 }
 0x2cc   : > { %1502 = vmatprep.mubr.f32.mxu0 %v5151_v27  ;;  %1663 = vmatprep.mubr.f32.mxu1 %v5151_v27 }
 0x2cd   : > { %1704 = vmatprep.subr.mxu0 %v1197_v25  ;;  %4440 = vmatprep.subr.mxu1 %v5745_v28 }
 0x2ce   : > { %1705 = vmatpush1.msra.mxu0 %v1196_v32  ;;  %4456 = vmatpush1.msra.mxu1 %v5749_v33 }
 0x2cf   : > { %1503 = vmatmul.mubr.f32.gmra.mxu0 %v5754_v39  ;;  %1664 = vmatmul.mubr.f32.gmra.mxu1 %v5754_v39 }
 0x2d0   : > { %1508 = vmatprep.mubr.f32.mxu0 %v5151_v27  ;;  %1669 = vmatprep.mubr.f32.mxu1 %v5151_v27 }
 0x2d1   : > { %1706 = vmatprep.subr.mxu0 %v1189_v40  ;;  %4441 = vmatprep.subr.mxu1 %v5758_v43 }
 0x2d2   : > { %1707 = vmatpush1.msra.mxu0 %v1188_v45  ;;  %4457 = vmatpush1.msra.mxu1 %v5762_v49 }
 0x2d3   : > { %1509 = vmatmul.mubr.f32.gmra.mxu0 %v5766_v31  ;;  %1670 = vmatmul.mubr.f32.gmra.mxu1 %v5766_v31 }
 0x2d4   : > { %4442 = vmatprep.subr.mxu1 %v5769_v52  ;;  %1740 = vmatprep.mubr.f32.mxu0 %v5151_v27 }
 0x2d5   : > { %1837 = vmatprep.subr.mxu0 %v5570_v29  ;;  %4458 = vmatpush1.msra.mxu1 %v5772_v54  ;;  %v1314_v29 = vlaneseq }
 0x2d6   : > { %1907 = vmatprep.mubr.f32.mxu1 %v5151_v27 }
 0x2d7   : > { %1741 = vmatmul.mubr.f32.vlgmr.msra.gmra.mxu0 %v5577_v36  ;;  %1908 = vmatmul.mubr.f32.vlgmr.msra.gmra.mxu1 %v5584_v42 }
 0x2d8   : > { %1838 = vmatpush1.msra.mxu0 %v5581_v41  ;;  %1746 = vmatprep.mubr.f32.mxu0 %v5151_v27  ;;  %v5874_v41 = vshrl.u32 %v1314_v29, 7 }
 0x2d9   : > { %1839 = vmatprep.subr.mxu0 %v5589_v46  ;;  %1913 = vmatprep.mubr.f32.mxu1 %v5151_v27 }
 0x2da   : > { %1840 = vmatpush1.msra.mxu0 %v5593_v48 }
 0x2db   : > { %1747 = vmatmul.mubr.f32.gmra.mxu0 %v5584_v42  ;;  %1914 = vmatmul.mubr.f32.gmra.mxu1 %v5598_v50 }
 0x2dc   : > { %1752 = vmatprep.mubr.f32.mxu0 %v5151_v27  ;;  %1841 = vmatprep.subr.mxu0 %v5602_v53  ;;  %v5877_v53 = vsub.s32 0, %v5874_v41 }
 0x2dd   : > { %1919 = vmatprep.mubr.f32.mxu1 %v5151_v27  ;;  %1842 = vmatpush1.msra.mxu0 %v5606_v55 }
 0x2de   : > { %1843 = vmatprep.subr.mxu0 %v5615_v60  ;;  %v5879_v60 = vld [vmem:[#allocation13] sm:$0xff] }
 0x2df   : > { %1753 = vmatmul.mubr.f32.gmra.mxu0 %v5598_v50  ;;  %1920 = vmatmul.mubr.f32.gmra.mxu1 %v5610_v56 }
 0x2e0   : > { %1758 = vmatprep.mubr.f32.mxu0 %v5151_v27  ;;  %1925 = vmatprep.mubr.f32.mxu1 %v5151_v27 }
 0x2e1   : > { %1844 = vmatpush1.msra.mxu0 %v5619_v62  ;;  %v1324_v62 = vsub.s32 2, %v5874_v41 }
 0x2e2   : > { %1845 = vmatprep.subr.mxu0 %v5628_v3  ;;  %v5887_v3 = vrot.slane %v5879_v60, %v5877_v53 }
 0x2e3   : > { %1759 = vmatmul.mubr.f32.gmra.mxu0 %v5610_v56  ;;  %1926 = vmatmul.mubr.f32.gmra.mxu1 %v5624_v0 }
 0x2e4   : > { %1764 = vmatprep.mubr.f32.mxu0 %v5151_v27  ;;  %1931 = vmatprep.mubr.f32.mxu1 %v5151_v27 }
 0x2e5   : > { %1846 = vmatpush1.msra.mxu0 %v5632_v6  ;;  %v1328_v6 = vsub.s32 3, %v5874_v41 }
 0x2e6   : > { %1847 = vmatprep.subr.mxu0 %v5641_v11 }
 0x2e7   : > { %1765 = vmatmul.mubr.f32.gmra.mxu0 %v5624_v0  ;;  %1932 = vmatmul.mubr.f32.gmra.mxu1 %v5636_v7 }
 0x2e8   : > { %1770 = vmatprep.mubr.f32.mxu0 %v5151_v27  ;;  %1937 = vmatprep.mubr.f32.mxu1 %v5151_v27 }
 0x2e9   : > { %1848 = vmatpush1.msra.mxu0 %v5645_v13  ;;  %v5893_v13 = vrot.slane %v5879_v60, %v1324_v62 }
 0x2ea   : > { %1849 = vmatprep.subr.mxu0 %v5654_v18 }
 0x2eb   : > { %1771 = vmatmul.mubr.f32.gmra.mxu0 %v5636_v7  ;;  %1938 = vmatmul.mubr.f32.gmra.mxu1 %v5650_v15 }
 0x2ec   : > { %1776 = vmatprep.mubr.f32.mxu0 %v5151_v27  ;;  %1943 = vmatprep.mubr.f32.mxu1 %v5151_v27 }
 0x2ed   : > { %1850 = vmatpush1.msra.mxu0 %v5658_v5 }
 0x2ee   : > { %1851 = vmatprep.subr.mxu0 %v5667_v24  ;;  %v5903_v24 = vrot.slane %v5879_v60, %v1328_v6 }
 0x2ef   : > { %1777 = vmatmul.mubr.f32.gmra.mxu0 %v5650_v15  ;;  %1944 = vmatmul.mubr.f32.gmra.mxu1 %v5662_v20 }
 0x2f0   : > { %1782 = vmatprep.mubr.f32.mxu0 %v5151_v27  ;;  %1949 = vmatprep.mubr.f32.mxu1 %v5151_v27 }
 0x2f1   : > { %1852 = vmatpush1.msra.mxu0 %v5671_v26 }
 0x2f2   : > { %1853 = vmatprep.subr.mxu0 %v5680_v34 }
 0x2f3   : > { %1783 = vmatmul.mubr.f32.gmra.mxu0 %v5662_v20  ;;  %1950 = vmatmul.mubr.f32.gmra.mxu1 %v5676_v30 }
 0x2f4   : > { %1788 = vmatprep.mubr.f32.mxu0 %v5151_v27  ;;  %1955 = vmatprep.mubr.f32.mxu1 %v5151_v27 }
 0x2f5   : > { %1854 = vmatpush1.msra.mxu0 %v5684_v37 }
 0x2f6   : > { %1855 = vmatprep.subr.mxu0 %v5693_v44 }
 0x2f7   : > { %1789 = vmatmul.mubr.f32.gmra.mxu0 %v5676_v30  ;;  %1956 = vmatmul.mubr.f32.gmra.mxu1 %v5688_v38 }
 0x2f8   : > { %1794 = vmatprep.mubr.f32.mxu0 %v5151_v27  ;;  %1961 = vmatprep.mubr.f32.mxu1 %v5151_v27 }
 0x2f9   : > { %1856 = vmatpush1.msra.mxu0 %v5697_v47 }
 0x2fa   : > { %1857 = vmatprep.subr.mxu0 %v5706_v57 }
 0x2fb   : > { %1795 = vmatmul.mubr.f32.gmra.mxu0 %v5688_v38  ;;  %1962 = vmatmul.mubr.f32.gmra.mxu1 %v5702_v51 }
 0x2fc   : > { %1800 = vmatprep.mubr.f32.mxu0 %v5151_v27  ;;  %1967 = vmatprep.mubr.f32.mxu1 %v5151_v27 }
 0x2fd   : > { %1858 = vmatpush1.msra.mxu0 %v5710_v59 }
 0x2fe   : > { %1859 = vmatprep.subr.mxu0 %v5719_v4 }
 0x2ff   : > { %1801 = vmatmul.mubr.f32.gmra.mxu0 %v5702_v51  ;;  %1968 = vmatmul.mubr.f32.gmra.mxu1 %v5714_v61 }
 0x300   : > { %1806 = vmatprep.mubr.f32.mxu0 %v5151_v27  ;;  %1973 = vmatprep.mubr.f32.mxu1 %v5151_v27 }
 0x301   : > { %1860 = vmatpush1.msra.mxu0 %v5723_v9 }
 0x302   : > { %1861 = vmatprep.subr.mxu0 %v5732_v17 }
 0x303   : > { %1807 = vmatmul.mubr.f32.gmra.mxu0 %v5714_v61  ;;  %1974 = vmatmul.mubr.f32.gmra.mxu1 %v5728_v12 }
 0x304   : > { %1812 = vmatprep.mubr.f32.mxu0 %v5151_v27  ;;  %1979 = vmatprep.mubr.f32.mxu1 %v5151_v27 }
 0x305   : > { %1862 = vmatpush1.msra.mxu0 %v5736_v21 }
 0x306   : > { %1863 = vmatprep.subr.mxu0 %v5745_v28 }
 0x307   : > { %1813 = vmatmul.mubr.f32.gmra.mxu0 %v5728_v12  ;;  %1980 = vmatmul.mubr.f32.gmra.mxu1 %v5740_v22 }
 0x308   : > { %1818 = vmatprep.mubr.f32.mxu0 %v5151_v27  ;;  %1985 = vmatprep.mubr.f32.mxu1 %v5151_v27 }
 0x309   : > { %1864 = vmatpush1.msra.mxu0 %v5749_v33 }
 0x30a   : > { %1865 = vmatprep.subr.mxu0 %v5758_v43 }
 0x30b   : > { %1819 = vmatmul.mubr.f32.gmra.mxu0 %v5740_v22  ;;  %1986 = vmatmul.mubr.f32.gmra.mxu1 %v5754_v39 }
 0x30c   : > { %1824 = vmatprep.mubr.f32.mxu0 %v5151_v27  ;;  %1991 = vmatprep.mubr.f32.mxu1 %v5151_v27 }
 0x30d   : > { %1866 = vmatpush1.msra.mxu0 %v5762_v49 }
 0x30e   : > { %1867 = vmatprep.subr.mxu0 %v5769_v52 }
 0x30f   : > { %1825 = vmatmul.mubr.f32.gmra.mxu0 %v5754_v39  ;;  %1992 = vmatmul.mubr.f32.gmra.mxu1 %v5766_v31 }
 0x310   : > { %1830 = vmatprep.mubr.f32.mxu0 %v5151_v27  ;;  %1868 = vmatpush1.msra.mxu0 %v5772_v54 }
 0x313   : > { %1831 = vmatmul.mubr.f32.gmra.mxu0 %v5766_v31 }
 0x314   : > { %1901 = vmatprep.mubr.f32.mxu0 %v5151_v27 }
 0x317   : > { %1902 = vmatmul.mubr.f32.vlgmr.msra.gmra.mxu0 %v5577_v36  ;;  %v5883_v36 = vsub.s32 1, %v5874_v41 }
 0x319   : > { %v5897_v5 = vrot.slane %v5879_v60, %v5883_v36 }
 0x357   : > { %v1420_v42 = vpop.f32.mrf.mxu0  ;;  %v1581_v46 = vpop.f32.mrf.mxu1 }
 0x358   : > { %v1421_v20 = vadd.f32 %v1420_v42, %v5887_v3  ;;  %v1582_v38 = vadd.f32 %v1581_v46, %v5893_v13 }
 0x359   : > { %v1422_v48 = vpop.f32.mrf.mxu0  ;;  %v1583_v50 = vpop.f32.mrf.mxu1 }
 0x35a   : > { %v1423_v59 = vadd.f32 %v1422_v48, %v5897_v5  ;;  %v1998_v61 = vmax.f32 %v1421_v20, 0.0  ;;  %v1584_v63 = vadd.f32 %v1583_v50, %v5903_v24  ;;  %v2000_v16 = vmax.f32 %v1582_v38, 0.0 }
 0x35b   : > { %v1426_v55 = vpop.f32.mrf.mxu0  ;;  %v1587_v56 = vpop.f32.mrf.mxu1 }
 0x35c   : > { %v1427_v26 = vadd.f32 %v1426_v55, %v5887_v3  ;;  %v1588_v37 = vadd.f32 %v1587_v56, %v5893_v13  ;;  %v1999_v25 = vmax.f32 %v1423_v59, 0.0  ;;  %v2001_v35 = vmax.f32 %v1584_v63, 0.0 }
 0x35d   : > { %v1428_v0 = vpop.f32.mrf.mxu0  ;;  %v1589_v27 = vpop.f32.mrf.mxu1 }
 0x35e   : > { %v1429_v44 = vadd.f32 %v1428_v0, %v5897_v5  ;;  %v1590_v47 = vadd.f32 %v1589_v27, %v5903_v24  ;;  %v2006_v1 = vmax.f32 %v1427_v26, 0.0  ;;  %v2008_v9 = vmax.f32 %v1588_v37, 0.0 }
 0x35f   : > { %v1432_v7 = vpop.f32.mrf.mxu0  ;;  %v1593_v11 = vpop.f32.mrf.mxu1 }
 0x360   : > { %v1433_v51 = vadd.f32 %v1432_v7, %v5887_v3  ;;  %v1594_v2 = vadd.f32 %v1593_v11, %v5893_v13  ;;  %v2007_v17 = vmax.f32 %v1429_v44, 0.0  ;;  %v2009_v19 = vmax.f32 %v1590_v47, 0.0 }
 0x361   : > { %v1434_v15 = vpop.f32.mrf.mxu0  ;;  %v1595_v18 = vpop.f32.mrf.mxu1  ;;  %v2126_v39 = vmax.f32 %v1998_v61, %v2006_v1  ;;  %v2152_v31 = vmax.f32 %v2000_v16, %v2008_v9 }
 0x362   : > { %v1435_v10 = vadd.f32 %v1434_v15, %v5897_v5  ;;  %v1596_v12 = vadd.f32 %v1595_v18, %v5903_v24  ;;  %v2014_v21 = vmax.f32 %v1433_v51, 0.0  ;;  %v2016_v40 = vmax.f32 %v1594_v2, 0.0 }
 0x363   : > { %v1438_v30 = vpop.f32.mrf.mxu0  ;;  %v1599_v34 = vpop.f32.mrf.mxu1  ;;  %v2139_v42 = vmax.f32 %v1999_v25, %v2007_v17  ;;  %v2165_v46 = vmax.f32 %v2001_v35, %v2009_v19 }
 0x364   : > { %v1439_v14 = vadd.f32 %v1438_v30, %v5887_v3  ;;  %v1600_v28 = vadd.f32 %v1599_v34, %v5893_v13  ;;  %v2015_v52 = vmax.f32 %v1435_v10, 0.0  ;;  %v2017_v54 = vmax.f32 %v1596_v12, 0.0 }
 0x365   : > { %v1440_v57 = vpop.f32.mrf.mxu0  ;;  %v1601_v58 = vpop.f32.mrf.mxu1  ;;  %v2127_v48 = vmax.f32 %v2126_v39, %v2014_v21  ;;  %v2153_v15 = vmax.f32 %v2152_v31, %v2016_v40 }
 0x366   : > { %v1441_v32 = vadd.f32 %v1440_v57, %v5897_v5  ;;  %v1602_v33 = vadd.f32 %v1601_v58, %v5903_v24  ;;  %v2022_v29 = vmax.f32 %v1439_v14, 0.0  ;;  %v2024_v0 = vmax.f32 %v1600_v28, 0.0 }
 0x367   : > { %v1444_v4 = vpop.f32.mrf.mxu0  ;;  %v1605_v8 = vpop.f32.mrf.mxu1  ;;  %v2140_v37 = vmax.f32 %v2139_v42, %v2015_v52  ;;  %v2166_v38 = vmax.f32 %v2165_v46, %v2017_v54 }
 0x368   : > { %v1445_v43 = vadd.f32 %v1444_v4, %v5887_v3  ;;  %v1606_v50 = vadd.f32 %v1605_v8, %v5893_v13  ;;  %v2023_v27 = vmax.f32 %v1441_v32, 0.0  ;;  %v2025_v7 = vmax.f32 %v1602_v33, 0.0 }
 0x369   : > { %v1446_v22 = vpop.f32.mrf.mxu0  ;;  %v1607_v23 = vpop.f32.mrf.mxu1  ;;  %v2128_v44 = vmax.f32 %v2127_v48, %v2022_v29  ;;  %v2154_v1 = vmax.f32 %v2153_v15, %v2024_v0 }
 0x36a   : > { %v1447_v11 = vadd.f32 %v1446_v22, %v5897_v5  ;;  %v2030_v18 = vmax.f32 %v1445_v43, 0.0  ;;  %v2032_v51 = vmax.f32 %v1606_v50, 0.0  ;;  %v1608_v57 = vadd.f32 %v1607_v23, %v5903_v24 }
 0x36b   : > { %v1450_v45 = vpop.f32.mrf.mxu0  ;;  %v1611_v49 = vpop.f32.mrf.mxu1  ;;  %v2141_v2 = vmax.f32 %v2140_v37, %v2023_v27  ;;  %v2167_v4 = vmax.f32 %v2166_v38, %v2025_v7 }
 0x36c   : > { %v1451_v20 = vadd.f32 %v1450_v45, %v5887_v3  ;;  %v1612_v26 = vadd.f32 %v1611_v49, %v5893_v13  ;;  %v2031_v8 = vmax.f32 %v1447_v11, 0.0  ;;  %v2129_v9 = vmax.f32 %v2128_v44, %v2030_v18 }
 0x36d   : > { %v1452_v55 = vpop.f32.mrf.mxu0  ;;  %v1613_v56 = vpop.f32.mrf.mxu1  ;;  %v2155_v25 = vmax.f32 %v2154_v1, %v2032_v51  ;;  %v2033_v28 = vmax.f32 %v1608_v57, 0.0 }
 0x36e   : > { %v1453_v47 = vadd.f32 %v1452_v55, %v5897_v5  ;;  %v2038_v10 = vmax.f32 %v1451_v20, 0.0  ;;  %v2040_v12 = vmax.f32 %v1612_v26, 0.0  ;;  %v1614_v21 = vadd.f32 %v1613_v56, %v5903_v24 }
 0x36f   : > { %v1456_v30 = vpop.f32.mrf.mxu0  ;;  %v1617_v34 = vpop.f32.mrf.mxu1  ;;  %v2142_v40 = vmax.f32 %v2141_v2, %v2031_v8  ;;  %v2168_v15 = vmax.f32 %v2167_v4, %v2033_v28 }
 0x370   : > { %v1457_v58 = vadd.f32 %v1456_v30, %v5887_v3  ;;  %v1618_v59 = vadd.f32 %v1617_v34, %v5893_v13  ;;  %v2039_v19 = vmax.f32 %v1453_v47, 0.0  ;;  %v2130_v31 = vmax.f32 %v2129_v9, %v2038_v10 }
 0x371   : > { %v1458_v61 = vpop.f32.mrf.mxu0  ;;  %v1619_v63 = vpop.f32.mrf.mxu1  ;;  %v2156_v52 = vmax.f32 %v2155_v25, %v2040_v12  ;;  %v2041_v50 = vmax.f32 %v1614_v21, 0.0 }
 0x372   : > { %v1459_v14 = vadd.f32 %v1458_v61, %v5897_v5  ;;  %v2046_v32 = vmax.f32 %v1457_v58, 0.0  ;;  %v2048_v33 = vmax.f32 %v1618_v59, 0.0  ;;  %v1620_v45 = vadd.f32 %v1619_v63, %v5903_v24 }
 0x373   : > { %v1462_v16 = vpop.f32.mrf.mxu0  ;;  %v1623_v17 = vpop.f32.mrf.mxu1  ;;  %v2143_v48 = vmax.f32 %v2142_v40, %v2039_v19  ;;  %v2169_v38 = vmax.f32 %v2168_v15, %v2041_v50 }
 0x374   : > { %v1463_v22 = vadd.f32 %v1462_v16, %v5887_v3  ;;  %v1624_v23 = vadd.f32 %v1623_v17, %v5893_v13  ;;  %v2047_v43 = vmax.f32 %v1459_v14, 0.0  ;;  %v2131_v0 = vmax.f32 %v2130_v31, %v2046_v32 }
 0x375   : > { %v1464_v35 = vpop.f32.mrf.mxu0  ;;  %v1625_v39 = vpop.f32.mrf.mxu1  ;;  %v2157_v27 = vmax.f32 %v2156_v52, %v2048_v33  ;;  %v2049_v20 = vmax.f32 %v1620_v45, 0.0 }
 0x376   : > { %v1465_v49 = vadd.f32 %v1464_v35, %v5897_v5  ;;  %v2054_v54 = vmax.f32 %v1463_v22, 0.0  ;;  %v2056_v29 = vmax.f32 %v1624_v23, 0.0  ;;  %v1626_v56 = vadd.f32 %v1625_v39, %v5903_v24 }
 0x377   : > { %v1468_v42 = vpop.f32.mrf.mxu0  ;;  %v1629_v46 = vpop.f32.mrf.mxu1  ;;  %v2144_v18 = vmax.f32 %v2143_v48, %v2047_v43  ;;  %v2170_v58 = vmax.f32 %v2169_v38, %v2049_v20 }
 0x378   : > { %v2055_v55 = vmax.f32 %v1465_v49, 0.0  ;;  %v2132_v26 = vmax.f32 %v2131_v0, %v2054_v54  ;;  %v2158_v30 = vmax.f32 %v2157_v27, %v2056_v29  ;;  %v2057_v47 = vmax.f32 %v1626_v56, 0.0 }
 0x379   : > { %v1470_v7 = vpop.f32.mrf.mxu0  ;;  %v1631_v11 = vpop.f32.mrf.mxu1  ;;  %v1469_v59 = vadd.f32 %v1468_v42, %v5887_v3  ;;  %v1630_v61 = vadd.f32 %v1629_v46, %v5893_v13 }
 0x37a   : > { %v2145_v44 = vmax.f32 %v2144_v18, %v2055_v55  ;;  %v2133_v63 = vrot.slane %v2132_v26, 4  ;;  %v2159_v1 = vrot.slane %v2158_v30, 4  ;;  %v2171_v9 = vmax.f32 %v2170_v58, %v2057_v47 }
 0x37b   : > { %v1474_v34 = vpop.f32.mrf.mxu0  ;;  %v1635_v37 = vpop.f32.mrf.mxu1  ;;  %v1471_v12 = vadd.f32 %v1470_v7, %v5897_v5  ;;  %v2062_v21 = vmax.f32 %v1469_v59, 0.0  ;;  %v2064_v22 = vmax.f32 %v1630_v61, 0.0  ;;  %v1632_v32 = vadd.f32 %v1631_v11, %v5903_v24 }
 0x37c   : > { %v2146_v8 = vrot.slane %v2145_v44, 4  ;;  %v1475_v10 = vadd.f32 %v1474_v34, %v5887_v3  ;;  %v1636_v14 = vadd.f32 %v1635_v37, %v5893_v13  ;;  %v5943_v25 = vmax.f32 %v2132_v26, %v2133_v63 }
 0x37d   : > { %v1476_v51 = vpop.f32.mrf.mxu0  ;;  %v1637_v57 = vpop.f32.mrf.mxu1  ;;  %v5945_v28 = vmax.f32 %v2158_v30, %v2159_v1  ;;  %v2172_v43 = vrot.slane %v2171_v9, 4  ;;  %v2063_v31 = vmax.f32 %v1471_v12, 0.0  ;;  %v2065_v7 = vmax.f32 %v1632_v32, 0.0 }
 0x37e   : > { %v1477_v16 = vadd.f32 %v1476_v51, %v5897_v5  ;;  %v1638_v23 = vadd.f32 %v1637_v57, %v5903_v24  ;;  %v5949_v40 = vmax.f32 %v2145_v44, %v2146_v8  ;;  %v2070_v45 = vmax.f32 %v1475_v10, 0.0 }
 0x37f   : > { %v1480_v2 = vpop.f32.mrf.mxu0  ;;  %v1641_v4 = vpop.f32.mrf.mxu1  ;;  %v2072_v52 = vmax.f32 %v1636_v14, 0.0  ;;  %v2135_v0 = vrot.slane %v5943_v25, 2  ;;  %v2161_v27 = vrot.slane %v5945_v28, 2  ;;  %v5959_v26 = vmax.f32 %v2171_v9, %v2172_v43 }
 0x380   : > { %v1481_v33 = vadd.f32 %v1480_v2, %v5887_v3  ;;  %v1642_v49 = vadd.f32 %v1641_v4, %v5893_v13  ;;  %v2071_v54 = vmax.f32 %v1477_v16, 0.0  ;;  %v2073_v48 = vmax.f32 %v1638_v23, 0.0 }
 0x381   : > { %v1482_v17 = vpop.f32.mrf.mxu0  ;;  %v1643_v19 = vpop.f32.mrf.mxu1  ;;  %v2148_v20 = vrot.slane %v5949_v40, 2  ;;  %v2230_v30 = vmax.f32 %v2062_v21, %v2070_v45  ;;  %v2256_v37 = vmax.f32 %v2064_v22, %v2072_v52 }
 0x382   : > { %v1483_v29 = vadd.f32 %v1482_v17, %v5897_v5  ;;  %v1644_v50 = vadd.f32 %v1643_v19, %v5903_v24  ;;  %v2078_v11 = vmax.f32 %v1481_v33, 0.0  ;;  %v2080_v34 = vmax.f32 %v1642_v49, 0.0 }
 0x383   : > { %v1486_v35 = vpop.f32.mrf.mxu0  ;;  %v1647_v39 = vpop.f32.mrf.mxu1  ;;  %v2243_v38 = vmax.f32 %v2063_v31, %v2071_v54  ;;  %v2269_v58 = vmax.f32 %v2065_v7, %v2073_v48  ;;  %v2174_v19 = vrot.slane %v5959_v26, 2 }
 0x384   : > { %v1487_v55 = vadd.f32 %v1486_v35, %v5887_v3  ;;  %v1648_v56 = vadd.f32 %v1647_v39, %v5893_v13  ;;  %v2079_v44 = vmax.f32 %v1483_v29, 0.0  ;;  %v2081_v59 = vmax.f32 %v1644_v50, 0.0 }
 0x385   : > { %v1488_v42 = vpop.f32.mrf.mxu0  ;;  %v1649_v46 = vpop.f32.mrf.mxu1  ;;  %v2231_v1 = vmax.f32 %v2230_v30, %v2078_v11  ;;  %v2257_v12 = vmax.f32 %v2256_v37, %v2080_v34 }
 0x386   : > { %v1489_v47 = vadd.f32 %v1488_v42, %v5897_v5  ;;  %v2086_v61 = vmax.f32 %v1487_v55, 0.0  ;;  %v2088_v63 = vmax.f32 %v1648_v56, 0.0  ;;  %v1650_v2 = vadd.f32 %v1649_v46, %v5903_v24 }
 0x387   : > { %v1492_v15 = vpop.f32.mrf.mxu0  ;;  %v1653_v18 = vpop.f32.mrf.mxu1  ;;  %v2244_v21 = vmax.f32 %v2243_v38, %v2079_v44  ;;  %v2270_v35 = vmax.f32 %v2269_v58, %v2081_v59 }
 0x388   : > { %v1493_v4 = vadd.f32 %v1492_v15, %v5887_v3  ;;  %v1654_v8 = vadd.f32 %v1653_v18, %v5893_v13  ;;  %v2087_v14 = vmax.f32 %v1489_v47, 0.0  ;;  %v2232_v39 = vmax.f32 %v2231_v1, %v2086_v61 }
 0x389   : > { %v1494_v51 = vpop.f32.mrf.mxu0  ;;  %v1655_v57 = vpop.f32.mrf.mxu1  ;;  %v2258_v43 = vmax.f32 %v2257_v12, %v2088_v63  ;;  %v2089_v49 = vmax.f32 %v1650_v2, 0.0 }
 0x38a   : > { %v1495_v16 = vadd.f32 %v1494_v51, %v5897_v5  ;;  %v2094_v22 = vmax.f32 %v1493_v4, 0.0  ;;  %v1656_v23 = vadd.f32 %v1655_v57, %v5903_v24  ;;  %v2096_v31 = vmax.f32 %v1654_v8, 0.0 }
 0x38b   : > { %v1498_v9 = vpop.f32.mrf.mxu0  ;;  %v1659_v10 = vpop.f32.mrf.mxu1  ;;  %v2245_v46 = vmax.f32 %v2244_v21, %v2087_v14  ;;  %v2271_v47 = vmax.f32 %v2270_v35, %v2089_v49 }
 0x38c   : > { %v1499_v17 = vadd.f32 %v1498_v9, %v5887_v3  ;;  %v1660_v45 = vadd.f32 %v1659_v10, %v5893_v13  ;;  %v2095_v48 = vmax.f32 %v1495_v16, 0.0  ;;  %v2233_v56 = vmax.f32 %v2232_v39, %v2094_v22 }
 0x38d   : > { %v1500_v32 = vpop.f32.mrf.mxu0  ;;  %v1661_v33 = vpop.f32.mrf.mxu1  ;;  %v2097_v7 = vmax.f32 %v1656_v23, 0.0  ;;  %v2259_v51 = vmax.f32 %v2258_v43, %v2096_v31 }
 0x38e   : > { %v1501_v52 = vadd.f32 %v1500_v32, %v5897_v5  ;;  %v1662_v54 = vadd.f32 %v1661_v33, %v5903_v24  ;;  %v2102_v50 = vmax.f32 %v1499_v17, 0.0  ;;  %v2104_v11 = vmax.f32 %v1660_v45, 0.0 }
 0x38f   : > { %v1504_v29 = vpop.f32.mrf.mxu0  ;;  %v1665_v42 = vpop.f32.mrf.mxu1  ;;  %v2246_v63 = vmax.f32 %v2245_v46, %v2095_v48  ;;  %v2272_v8 = vmax.f32 %v2271_v47, %v2097_v7 }
 0x390   : > { %v1505_v55 = vadd.f32 %v1504_v29, %v5887_v3  ;;  %v1666_v15 = vadd.f32 %v1665_v42, %v5893_v13  ;;  %v2103_v34 = vmax.f32 %v1501_v52, 0.0  ;;  %v2105_v57 = vmax.f32 %v1662_v54, 0.0 }
 0x391   : > { %v1506_v18 = vpop.f32.mrf.mxu0  ;;  %v1667_v30 = vpop.f32.mrf.mxu1  ;;  %v2234_v1 = vmax.f32 %v2233_v56, %v2102_v50  ;;  %v2260_v9 = vmax.f32 %v2259_v51, %v2104_v11  ;;  %v2175_v52 = vmax.f32 %v5959_v26, %v2174_v19  ;;  %v2136_v50 = vmax.f32 %v5943_v25, %v2135_v0 }
 0x392   : > { %v2110_v37 = vmax.f32 %v1505_v55, 0.0  ;;  %v1507_v38 = vadd.f32 %v1506_v18, %v5897_v5  ;;  %v1668_v44 = vadd.f32 %v1667_v30, %v5903_v24  ;;  %v2112_v58 = vmax.f32 %v1666_v15, 0.0 }
 0x393   : > { %v1510_v59 = vpop.f32.mrf.mxu0  ;;  %v1671_v61 = vpop.f32.mrf.mxu1  ;;  %v2247_v17 = vmax.f32 %v2246_v63, %v2103_v34  ;;  %v2273_v32 = vmax.f32 %v2272_v8, %v2105_v57  ;;  %v5152_v56 = vmov 1983009808   ;;  %v2176_v30 = vrot.slane %v2175_v52, 1 }
 0x394   : > { %v2111_v2 = vmax.f32 %v1507_v38, 0.0  ;;  %v1511_v4 = vadd.f32 %v1510_v59, %v5887_v3  ;;  %v2113_v10 = vmax.f32 %v1668_v44, 0.0  ;;  %v1672_v12 = vadd.f32 %v1671_v61, %v5893_v13 }
 0x395   : > { %v1512_v14 = vpop.f32.mrf.mxu0  ;;  %v1673_v16 = vpop.f32.mrf.mxu1  ;;  %v2235_v21 = vmax.f32 %v2234_v1, %v2110_v37  ;;  %v2261_v33 = vmax.f32 %v2260_v9, %v2112_v58  ;;  %v2149_v13 = vmax.f32 %v5949_v40, %v2148_v20  ;;  %v2162_v40 = vmax.f32 %v5945_v28, %v2161_v27 }
 0x396   : > { %v2118_v22 = vmax.f32 %v1511_v4, 0.0  ;;  %v1513_v23 = vadd.f32 %v1512_v14, %v5897_v5  ;;  %v2120_v35 = vmax.f32 %v1672_v12, 0.0  ;;  %v1674_v39 = vadd.f32 %v1673_v16, %v5903_v24 }
 0x397   : > { %v5980_v43 = vpop.f32.mrf.mxu0  ;;  %v5982_v3 = vpop.f32.mrf.mxu1  ;;  %v2248_v45 = vmax.f32 %v2247_v17, %v2111_v2  ;;  %v2274_v54 = vmax.f32 %v2273_v32, %v2113_v10  ;;  %v2355_v7 = vunpack.c.l.s4 %v5152_v56  ;;  %v2150_v18 = vrot.slane %v2149_v13, 1 }
 0x398   : > { %v2236_v49 = vmax.f32 %v2235_v21, %v2118_v22  ;;  %v2119_v31 = vmax.f32 %v1513_v23, 0.0  ;;  %v2262_v5 = vmax.f32 %v2261_v33, %v2120_v35  ;;  %v2121_v29 = vmax.f32 %v1674_v39, 0.0 }
 0x399   : > { %v5988_v42 = vpop.f32.mrf.mxu0  ;;  %v5990_v46 = vpop.f32.mrf.mxu1  ;;  %v1332_v28 = vsub.s32 4, %v5874_v41  ;;  %v1336_v27 = vsub.s32 5, %v5874_v41  ;;  %v2137_v47 = vrot.slane %v2136_v50, 1  ;;  %v2163_v51 = vrot.slane %v2162_v40, 1 }
 0x39a   : > { %v2237_v24 = vrot.slane %v2236_v49, 4  ;;  %v2249_v48 = vmax.f32 %v2248_v45, %v2119_v31  ;;  %v2263_v20 = vrot.slane %v2262_v5, 4  ;;  %v2275_v55 = vmax.f32 %v2274_v54, %v2121_v29 }
 0x39b   : > { %v1748_v26 = vpop.f32.mrf.mxu0  ;;  %v5998_v19 = vpop.f32.mrf.mxu1  ;;  %v2356_v63 = vunpack.c.0.s8 %v2355_v7  ;;  %v2151_v4 = vmax.f32 %v2149_v13, %v2150_v18  ;;  %v2177_v8 = vmax.f32 %v2175_v52, %v2176_v30  ;;  %v6009_v21 = vrot.slane %v5879_v60, %v1332_v28 }
 0x39c   : > { %v2238_v11 = vmax.f32 %v2236_v49, %v2237_v24  ;;  %v2250_v15 = vrot.slane %v2249_v48, 4  ;;  %v2264_v34 = vmax.f32 %v2262_v5, %v2263_v20  ;;  %v2276_v37 = vrot.slane %v2275_v55, 4 }
 0x39d   : > { %v1750_v38 = vpop.f32.mrf.mxu0  ;;  %v6000_v44 = vpop.f32.mrf.mxu1  ;;  %v6012_v22 = vrot.slane %v5879_v60, %v1336_v27  ;;  %v2138_v23 = vmax.f32 %v2136_v50, %v2137_v47  ;;  %v2164_v32 = vmax.f32 %v2162_v40, %v2163_v51  ;;  %v6017_v45 = vsub.s32 %v2356_v63, %v5874_v41 }
 0x39e   : > { %v2239_v25 = vrot.slane %v2238_v11, 2  ;;  %v2251_v0 = vmax.f32 %v2249_v48, %v2250_v15  ;;  %v2265_v57 = vrot.slane %v2264_v34, 2  ;;  %v2277_v58 = vmax.f32 %v2275_v55, %v2276_v37 }
 0x39f   : > { %v1754_v59 = vpop.f32.mrf.mxu0  ;;  %v6004_v61 = vpop.f32.mrf.mxu1  ;;  %v1749_v31 = vadd.f32 %v1748_v26, %v6009_v21  ;;  %v2352_v52 = vcombine.low %v2138_v23, %v2151_v4  ;;  %v2353_v54 = vcombine.low %v2164_v32, %v2177_v8  ;;  %v1751_v29 = vadd.f32 %v1750_v38, %v6012_v22 }
 0x3a0   : > { %v2240_v1 = vmax.f32 %v2238_v11, %v2239_v25  ;;  %v2252_v2 = vrot.slane %v2251_v0, 2  ;;  %v2266_v9 = vmax.f32 %v2264_v34, %v2265_v57  ;;  %v2278_v10 = vrot.slane %v2277_v58, 2 }
 0x3a1   : > { %v1756_v12 = vpop.f32.mrf.mxu0  ;;  %v6006_v14 = vpop.f32.mrf.mxu1  ;;  %v1743_v20 = vadd.f32 %v5980_v43, %v6009_v21  ;;  %v1755_v55 = vadd.f32 %v1754_v59, %v6009_v21  ;;  %v1745_v26 = vadd.f32 %v5988_v42, %v6012_v22  ;;  %v2010_v34 = vmax.f32 %v1749_v31, 0.0 }
 0x3a2   : > { %v2241_v16 = vrot.slane %v2240_v1, 1  ;;  %v2253_v17 = vmax.f32 %v2251_v0, %v2252_v2  ;;  %v2267_v33 = vrot.slane %v2266_v9, 1  ;;  %v2279_v35 = vmax.f32 %v2277_v58, %v2278_v10 }
 0x3a3   : > { %v1760_v39 = vpop.f32.mrf.mxu0  ;;  %v6014_v13 = vpop.f32.mrf.mxu1  ;;  %v1757_v11 = vadd.f32 %v1756_v12, %v6012_v22  ;;  %v2360_v38 = vrot.slane %v2352_v52, %v6017_v45  ;;  %v2011_v43 = vmax.f32 %v1751_v29, 0.0  ;;  %v2002_v47 = vmax.f32 %v1743_v20, 0.0 }
 0x3a4   : > { %v2254_v49 = vrot.slane %v2253_v17, 1  ;;  %v2280_v5 = vrot.slane %v2279_v35, 1  ;;  %v2242_v50 = vmax.f32 %v2240_v1, %v2241_v16  ;;  %v2268_v56 = vmax.f32 %v2266_v9, %v2267_v33 }
 0x3a5   : > { %v1762_v24 = vpop.f32.mrf.mxu0  ;;  %v6021_v48 = vpop.f32.mrf.mxu1  ;;  %v1761_v37 = vadd.f32 %v1760_v39, %v6009_v21  ;;  %v2018_v51 = vmax.f32 %v1755_v55, 0.0  ;;  %v2367_v58 = vrot.slane %v2353_v54, %v6017_v45  ;;  %v2003_v63 = vmax.f32 %v1745_v26, 0.0 }
 0x3a6   : > { %v2255_v40 = vmax.f32 %v2253_v17, %v2254_v49  ;;  %v2281_v7 = vmax.f32 %v2279_v35, %v2280_v5  ;;  %v1763_v0 = vadd.f32 %v1762_v24, %v6012_v22  ;;  %v2019_v1 = vmax.f32 %v1757_v11, 0.0  ;;  %v2334_v11 = vld [vmem:[#allocation2] sm:$0xff] }
 0x3a7   : > { %v1766_v15 = vpop.f32.mrf.mxu0  ;;  %v6029_v18 = vpop.f32.mrf.mxu1  ;;  %v2178_v8 = vmax.f32 %v2002_v47, %v2010_v34  ;;  %v2026_v9 = vmax.f32 %v1761_v37, 0.0  ;;  %v2191_v17 = vmax.f32 %v2003_v63, %v2011_v43  ;;  %v2368_v31 = vcombine.low %v2360_v38, %v2367_v58 }
 0x3a8   : > { %v2386_v30 = vcombine.low %v2242_v50, %v2255_v40  ;;  %v2387_v25 = vcombine.low %v2268_v56, %v2281_v7  ;;  %v1767_v57 = vadd.f32 %v1766_v15, %v6009_v21  ;;  %v2027_v23 = vmax.f32 %v1763_v0, 0.0 }
 0x3a9   : > { %v1768_v28 = vpop.f32.mrf.mxu0  ;;  %v6034_v27 = vpop.f32.mrf.mxu1  ;;  %v2179_v35 = vmax.f32 %v2178_v8, %v2018_v51  ;;  %v2192_v54 = vmax.f32 %v2191_v17, %v2019_v1  ;;  %v1344_v17 = vsub.s32 7, %v5874_v41 }
 0x3aa   : > { %v2394_v42 = vrot.slane %v2386_v30, %v6017_v45  ;;  %v2401_v59 = vrot.slane %v2387_v25, %v6017_v45  ;;  %v1769_v10 = vadd.f32 %v1768_v28, %v6012_v22  ;;  %v2034_v39 = vmax.f32 %v1767_v57, 0.0 }
 0x3ab   : > { %v1772_v2 = vpop.f32.mrf.mxu0  ;;  %v6040_v4 = vpop.f32.mrf.mxu1  ;;  %v2180_v24 = vmax.f32 %v2179_v35, %v2026_v9  ;;  %v2193_v56 = vmax.f32 %v2192_v54, %v2027_v23 }
 0x3ac   : > { %v1773_v12 = vadd.f32 %v1772_v2, %v6009_v21  ;;  %v2402_v16 = vcombine.low %v2394_v42, %v2401_v59  ;;  %v2035_v50 = vmax.f32 %v1769_v10, 0.0  ;;  %v1340_v10 = vsub.s32 6, %v5874_v41 }
 0x3ad   : > { %v1774_v32 = vpop.f32.mrf.mxu0  ;;  %v6044_v33 = vpop.f32.mrf.mxu1  ;;  %v2181_v30 = vmax.f32 %v2180_v24, %v2034_v39 }
 0x3ae   : > { %v1775_v49 = vadd.f32 %v1774_v32, %v6012_v22  ;;  %v2424_v52 = vrot.slane %v2402_v16, 7  ;;  %v2042_v40 = vmax.f32 %v1773_v12, 0.0  ;;  %v2194_v42 = vmax.f32 %v2193_v56, %v2035_v50 }
 0x3af   : > { %v1778_v5 = vpop.f32.mrf.mxu0  ;;  %v6047_v29 = vpop.f32.mrf.mxu1  ;;  %v6062_v24 = vrot.slane %v5879_v60, %v1340_v10  ;;  %v6065_v50 = vrot.slane %v5879_v60, %v1344_v17 }
 0x3b0   : > { %v1779_v20 = vadd.f32 %v1778_v5, %v6009_v21  ;;  %v2426_v55 = vsel %vm2425_vm3, %v2424_v52, %v2368_v31  ;;  %v2043_v34 = vmax.f32 %v1775_v49, 0.0  ;;  %v2182_v47 = vmax.f32 %v2181_v30, %v2042_v40 }
 0x3b1   : > { %v1780_v7 = vpop.f32.mrf.mxu0  ;;  %v6051_v26 = vpop.f32.mrf.mxu1  ;;  %v2428_v15 = vsel %vm2427_vm4, %v2424_v52, %v2426_v55 }
 0x3b2   : > { %v2050_v37 = vmax.f32 %v1779_v20, 0.0  ;;  %v2430_v38 = vsel %vm2429_vm5, %v2424_v52, %v2428_v15  ;;  %v1781_v25 = vadd.f32 %v1780_v7, %v6012_v22  ;;  %v2195_v1 = vmax.f32 %v2194_v42, %v2043_v34 }
 0x3b3   : > { %v1784_v43 = vpop.f32.mrf.mxu0  ;;  %v1951_v0 = vpop.f32.mrf.mxu1  ;;  %v2432_v28 = vsel %vm2431_vm6, %v2424_v52, %v2430_v38 }
 0x3b4   : > { %v1785_v51 = vadd.f32 %v1784_v43, %v6009_v21  ;;  %v2442_v57 = vmax.f32 %v2334_v11, %v2432_v28  ;;  %v2051_v58 = vmax.f32 %v1781_v25, 0.0  ;;  %v2183_v2 = vmax.f32 %v2182_v47, %v2050_v37 }
 0x3b5   : > { %v1786_v59 = vpop.f32.mrf.mxu0  ;;  %v1953_v63 = vpop.f32.mrf.mxu1  ;;  %v1952_v11 = vadd.f32 %v1951_v0, %v6062_v24  ;;  %v6075_v47 = vadd.f32 %v5982_v3, %v6062_v24 }
 0x3b6   : > { %v2058_v8 = vmax.f32 %v1785_v51, 0.0  ;;  %v1787_v9 = vadd.f32 %v1786_v59, %v6012_v22  ;;  %2444 = vst [vmem:[#allocation2] sm:$0xff] %v2442_v57  ;;  %v2196_v23 = vmax.f32 %v2195_v1, %v2051_v58  ;;  %v1954_v30 = vadd.f32 %v1953_v63, %v6065_v50 }
 0x3b7   : > { %v1790_v12 = vpop.f32.mrf.mxu0  ;;  %v1957_v16 = vpop.f32.mrf.mxu1  ;;  %v2068_v63 = vmax.f32 %v1952_v11, 0.0 }
 0x3b8   : > { %v2184_v32 = vmax.f32 %v2183_v2, %v2058_v8  ;;  %v2059_v35 = vmax.f32 %v1787_v9, 0.0  ;;  %v1958_v34 = vadd.f32 %v1957_v16, %v6062_v24  ;;  %v1791_v60 = vadd.f32 %v1790_v12, %v6009_v21 }
 0x3b9   : > { %v1792_v39 = vpop.f32.mrf.mxu0  ;;  %v1959_v49 = vpop.f32.mrf.mxu1  ;;  %v2069_v2 = vmax.f32 %v1954_v30, 0.0 }
 0x3ba   : > { %v2185_v31 = vrot.slane %v2184_v32, 4  ;;  %v2197_v52 = vmax.f32 %v2196_v23, %v2059_v35  ;;  %v1960_v37 = vadd.f32 %v1959_v49, %v6065_v50  ;;  %v1793_v42 = vadd.f32 %v1792_v39, %v6012_v22 }
 0x3bb   : > { %v1796_v54 = vpop.f32.mrf.mxu0  ;;  %v1963_v5 = vpop.f32.mrf.mxu1  ;;  %v2076_v8 = vmax.f32 %v1958_v34, 0.0  ;;  %v2066_v23 = vmax.f32 %v1791_v60, 0.0 }
 0x3bc   : > { %v2186_v40 = vmax.f32 %v2184_v32, %v2185_v31  ;;  %v2198_v20 = vrot.slane %v2197_v52, 4  ;;  %v1797_v0 = vadd.f32 %v1796_v54, %v6009_v21  ;;  %v1964_v51 = vadd.f32 %v1963_v5, %v6062_v24 }
 0x3bd   : > { %v1798_v55 = vpop.f32.mrf.mxu0  ;;  %v1965_v56 = vpop.f32.mrf.mxu1  ;;  %v2077_v9 = vmax.f32 %v1960_v37, 0.0  ;;  %v2067_v32 = vmax.f32 %v1793_v42, 0.0 }
 0x3be   : > { %v2187_v7 = vrot.slane %v2186_v40, 2  ;;  %v2199_v15 = vmax.f32 %v2197_v52, %v2198_v20  ;;  %v1799_v10 = vadd.f32 %v1798_v55, %v6012_v22  ;;  %v1966_v12 = vadd.f32 %v1965_v56, %v6065_v50 }
 0x3bf   : > { %v1802_v38 = vpop.f32.mrf.mxu0  ;;  %v1969_v25 = vpop.f32.mrf.mxu1  ;;  %v2074_v39 = vmax.f32 %v1797_v0, 0.0  ;;  %v2084_v49 = vmax.f32 %v1964_v51, 0.0  ;;  %v2321_v11 = vmax.f32 %v2069_v2, %v2077_v9 }
 0x3c0   : > { %v2188_v43 = vmax.f32 %v2186_v40, %v2187_v7  ;;  %v2200_v28 = vrot.slane %v2199_v15, 2  ;;  %v1803_v35 = vadd.f32 %v1802_v38, %v6009_v21  ;;  %v1970_v31 = vadd.f32 %v1969_v25, %v6062_v24 }
 0x3c1   : > { %v1804_v57 = vpop.f32.mrf.mxu0  ;;  %v1971_v58 = vpop.f32.mrf.mxu1  ;;  %v2308_v7 = vmax.f32 %v2068_v63, %v2076_v8  ;;  %v2085_v30 = vmax.f32 %v1966_v12, 0.0  ;;  %v2282_v60 = vmax.f32 %v2066_v23, %v2074_v39 }
 0x3c2   : > { %v2189_v59 = vrot.slane %v2188_v43, 1  ;;  %v2201_v1 = vmax.f32 %v2199_v15, %v2200_v28  ;;  %v1805_v52 = vadd.f32 %v1804_v57, %v6012_v22  ;;  %v1972_v55 = vadd.f32 %v1971_v58, %v6065_v50 }
 0x3c3   : > { %v1808_v16 = vpop.f32.mrf.mxu0  ;;  %v1975_v17 = vpop.f32.mrf.mxu1  ;;  %v2075_v15 = vmax.f32 %v1799_v10, 0.0  ;;  %v2082_v25 = vmax.f32 %v1803_v35, 0.0  ;;  %v2092_v42 = vmax.f32 %v1970_v31, 0.0  ;;  %v2322_v9 = vmax.f32 %v2321_v11, %v2085_v30 }
 0x3c4   : > { %v2202_v3 = vrot.slane %v2201_v1, 1  ;;  %v6084_v40 = vmax.f32 %v2188_v43, %v2189_v59  ;;  %v1809_v56 = vadd.f32 %v1808_v16, %v6009_v21  ;;  %v2083_v0 = vmax.f32 %v1805_v52, 0.0 }
 0x3c5   : > { %v1810_v54 = vpop.f32.mrf.mxu0  ;;  %v1977_v5 = vpop.f32.mrf.mxu1  ;;  %v2309_v59 = vmax.f32 %v2308_v7, %v2084_v49  ;;  %v2093_v63 = vmax.f32 %v1972_v55, 0.0  ;;  %v1976_v2 = vadd.f32 %v1975_v17, %v6062_v24  ;;  %v2295_v8 = vmax.f32 %v2067_v32, %v2075_v15 }
 0x3c6   : > { %v6086_v20 = vmax.f32 %v2201_v1, %v2202_v3  ;;  %v1811_v28 = vadd.f32 %v1810_v54, %v6012_v22  ;;  %v1978_v43 = vadd.f32 %v1977_v5, %v6065_v50  ;;  %v2090_v1 = vmax.f32 %v1809_v56, 0.0 }
 0x3c7   : > { %v1814_v34 = vpop.f32.mrf.mxu0  ;;  %v1981_v37 = vpop.f32.mrf.mxu1  ;;  %v2283_v23 = vmax.f32 %v2282_v60, %v2082_v25  ;;  %v2310_v52 = vmax.f32 %v2309_v59, %v2092_v42  ;;  %v2296_v54 = vmax.f32 %v2295_v8, %v2083_v0  ;;  %v2323_v32 = vmax.f32 %v2322_v9, %v2093_v63 }
 0x3c8   : > { %v2369_v38 = vcombine.low %v6084_v40, %v6086_v20  ;;  %v1815_v51 = vadd.f32 %v1814_v34, %v6009_v21  ;;  %v2091_v35 = vmax.f32 %v1811_v28, 0.0  ;;  %v2101_v39 = vmax.f32 %v1978_v43, 0.0 }
 0x3c9   : > { %v1816_v57 = vpop.f32.mrf.mxu0  ;;  %v1983_v58 = vpop.f32.mrf.mxu1  ;;  %v1982_v5 = vadd.f32 %v1981_v37, %v6062_v24  ;;  %v2284_v56 = vmax.f32 %v2283_v23, %v2090_v1  ;;  %v2100_v7 = vmax.f32 %v1976_v2, 0.0 }
 0x3ca   : > { %v1817_v10 = vadd.f32 %v1816_v57, %v6012_v22  ;;  %v1984_v12 = vadd.f32 %v1983_v58, %v6065_v50  ;;  %v2098_v49 = vmax.f32 %v1815_v51, 0.0  ;;  %v2297_v60 = vmax.f32 %v2296_v54, %v2091_v35 }
 0x3cb   : > { %v1820_v16 = vpop.f32.mrf.mxu0  ;;  %v1987_v3 = vpop.f32.mrf.mxu1  ;;  %v2324_v42 = vmax.f32 %v2323_v32, %v2101_v39  ;;  %v2108_v57 = vmax.f32 %v1982_v5, 0.0  ;;  %v1912_v5 = vadd.f32 %v5990_v46, %v6065_v50 }
 0x3cc   : > { %v1821_v31 = vadd.f32 %v1820_v16, %v6009_v21  ;;  %v2099_v15 = vmax.f32 %v1817_v10, 0.0  ;;  %v2109_v30 = vmax.f32 %v1984_v12, 0.0  ;;  %v1988_v34 = vadd.f32 %v1987_v3, %v6062_v24 }
 0x3cd   : > { %v1822_v55 = vpop.f32.mrf.mxu0  ;;  %v1989_v17 = vpop.f32.mrf.mxu1  ;;  %v2285_v51 = vmax.f32 %v2284_v56, %v2098_v49  ;;  %v2311_v12 = vmax.f32 %v2310_v52, %v2100_v7  ;;  %v1916_v7 = vadd.f32 %v5998_v19, %v6062_v24  ;;  %v1918_v19 = vadd.f32 %v6000_v44, %v6065_v50 }
 0x3ce   : > { %v1823_v11 = vadd.f32 %v1822_v55, %v6012_v22  ;;  %v1990_v25 = vadd.f32 %v1989_v17, %v6065_v50  ;;  %v2106_v0 = vmax.f32 %v1821_v31, 0.0  ;;  %v2298_v16 = vmax.f32 %v2297_v60, %v2099_v15 }
 0x3cf   : > { %v1826_v28 = vpop.f32.mrf.mxu0  ;;  %v1993_v43 = vpop.f32.mrf.mxu1  ;;  %v2325_v3 = vmax.f32 %v2324_v42, %v2109_v30  ;;  %v2116_v23 = vmax.f32 %v1988_v34, 0.0  ;;  %v2312_v55 = vmax.f32 %v2311_v12, %v2108_v57  ;;  %v1922_v42 = vadd.f32 %v6004_v61, %v6062_v24 }
 0x3d0   : > { %v1827_v37 = vadd.f32 %v1826_v28, %v6009_v21  ;;  %v2117_v58 = vmax.f32 %v1990_v25, 0.0  ;;  %v1994_v59 = vadd.f32 %v1993_v43, %v6062_v24  ;;  %v2107_v2 = vmax.f32 %v1823_v11, 0.0 }
 0x3d1   : > { %v1828_v63 = vpop.f32.mrf.mxu0  ;;  %v1995_v1 = vpop.f32.mrf.mxu1  ;;  %v2286_v39 = vmax.f32 %v2285_v51, %v2106_v0  ;;  %v2313_v15 = vmax.f32 %v2312_v55, %v2116_v23  ;;  %v2012_v51 = vmax.f32 %v6075_v47, 0.0  ;;  %v2013_v57 = vmax.f32 %v1912_v5, 0.0 }
 0x3d2   : > { %v2114_v8 = vmax.f32 %v1827_v37, 0.0  ;;  %v1829_v9 = vadd.f32 %v1828_v63, %v6012_v22  ;;  %v1996_v10 = vadd.f32 %v1995_v1, %v6065_v50  ;;  %v2326_v17 = vmax.f32 %v2325_v3, %v2117_v58 }
 0x3d3   : > { %v1832_v35 = vpop.f32.mrf.mxu0  ;;  %v2124_v32 = vmax.f32 %v1994_v59, 0.0  ;;  %v2299_v11 = vmax.f32 %v2298_v16, %v2107_v2  ;;  %v2020_v2 = vmax.f32 %v1916_v7, 0.0  ;;  %v1924_v47 = vadd.f32 %v6006_v14, %v6065_v50 }
 0x3d4   : > { %v2115_v31 = vmax.f32 %v1829_v9, 0.0  ;;  %v2125_v54 = vmax.f32 %v1996_v10, 0.0  ;;  %v1833_v49 = vadd.f32 %v1832_v35, %v6009_v21  ;;  %v2287_v25 = vmax.f32 %v2286_v39, %v2114_v8 }
 0x3d5   : > { %v1834_v56 = vpop.f32.mrf.mxu0  ;;  %v2314_v0 = vmax.f32 %v2313_v15, %v2124_v32  ;;  %v1928_v8 = vadd.f32 %v6014_v13, %v6062_v24  ;;  %v2028_v10 = vmax.f32 %v1922_v42, 0.0  ;;  %v1930_v3 = vadd.f32 %v6021_v48, %v6065_v50 }
 0x3d6   : > { %v2122_v28 = vmax.f32 %v1833_v49, 0.0  ;;  %v1835_v52 = vadd.f32 %v1834_v56, %v6012_v22  ;;  %v2327_v30 = vmax.f32 %v2326_v17, %v2125_v54  ;;  %v2300_v43 = vmax.f32 %v2299_v11, %v2115_v31 }
 0x3d7   : > { %v1903_v34 = vpop.f32.mrf.mxu0  ;;  %v2315_v12 = vrot.slane %v2314_v0, 4  ;;  %v1934_v44 = vadd.f32 %v6029_v18, %v6062_v24  ;;  %v2021_v39 = vmax.f32 %v1918_v19, 0.0  ;;  %v2036_v49 = vmax.f32 %v1928_v8, 0.0 }
 0x3d8   : > { %v2288_v21 = vmax.f32 %v2287_v25, %v2122_v28  ;;  %v2123_v60 = vmax.f32 %v1835_v52, 0.0  ;;  %v1904_v46 = vadd.f32 %v1903_v34, %v6062_v24  ;;  %v2328_v59 = vrot.slane %v2327_v30, 4 }
 0x3d9   : > { %v1905_v37 = vpop.f32.mrf.mxu0  ;;  %v1936_v5 = vadd.f32 %v6034_v27, %v6065_v50  ;;  %v1940_v14 = vadd.f32 %v6040_v4, %v6062_v24  ;;  %v2029_v17 = vmax.f32 %v1924_v47, 0.0  ;;  %v2316_v32 = vmax.f32 %v2314_v0, %v2315_v12 }
 0x3da   : > { %v2301_v22 = vmax.f32 %v2300_v43, %v2123_v60  ;;  %v2004_v58 = vmax.f32 %v1904_v46, 0.0  ;;  %v2289_v63 = vrot.slane %v2288_v21, 4  ;;  %v1906_v1 = vadd.f32 %v1905_v37, %v6065_v50 }
 0x3db   : > { %v2329_v31 = vmax.f32 %v2327_v30, %v2328_v59  ;;  %v2037_v11 = vmax.f32 %v1930_v3, 0.0  ;;  %v2044_v18 = vmax.f32 %v1934_v44, 0.0  ;;  %v1946_v25 = vadd.f32 %v6047_v29, %v6062_v24 }
 0x3dc   : > { %v2302_v9 = vrot.slane %v2301_v22, 4  ;;  %v2204_v61 = vmax.f32 %v2004_v58, %v2012_v51  ;;  %v2005_v16 = vmax.f32 %v1906_v1, 0.0  ;;  %v2290_v54 = vmax.f32 %v2288_v21, %v2289_v63 }
 0x3dd   : > { %v1942_v52 = vadd.f32 %v6044_v33, %v6065_v50  ;;  %v2330_v7 = vrot.slane %v2329_v31, 2  ;;  %v2045_v30 = vmax.f32 %v1936_v5, 0.0  ;;  %v2052_v34 = vmax.f32 %v1940_v14, 0.0 }
 0x3de   : > { %v2303_v23 = vmax.f32 %v2301_v22, %v2302_v9  ;;  %v2205_v35 = vmax.f32 %v2204_v61, %v2020_v2  ;;  %v2217_v13 = vmax.f32 %v2005_v16, %v2013_v57  ;;  %v2291_v15 = vrot.slane %v2290_v54, 2 }
 0x3df   : > { %v1948_v43 = vadd.f32 %v6051_v26, %v6065_v50  ;;  %v2317_v21 = vrot.slane %v2316_v32, 2  ;;  %v2060_v42 = vmax.f32 %v1946_v25, 0.0  ;;  %v2053_v37 = vmax.f32 %v1942_v52, 0.0  ;;  %v2335_v25 = vld [vmem:[#allocation2 + $0x8] sm:$0xff] }
 0x3e0   : > { %v2206_v55 = vmax.f32 %v2205_v35, %v2028_v10  ;;  %v2304_v48 = vrot.slane %v2303_v23, 2  ;;  %v2218_v56 = vmax.f32 %v2217_v13, %v2021_v39  ;;  %v2331_v29 = vmax.f32 %v2329_v31, %v2330_v7 }
 0x3e1   : > { %v2292_v24 = vmax.f32 %v2290_v54, %v2291_v15  ;;  %v2061_v33 = vmax.f32 %v1948_v43, 0.0  ;;  %v2318_v22 = vmax.f32 %v2316_v32, %v2317_v21  ;;  %v2377_v32 = vrot.slane %v2369_v38, %v6017_v45 }
 0x3e2   : > { %v2207_v28 = vmax.f32 %v2206_v55, %v2036_v49  ;;  %v2219_v27 = vmax.f32 %v2218_v56, %v2029_v17  ;;  %v2305_v60 = vmax.f32 %v2303_v23, %v2304_v48  ;;  %v2332_v63 = vrot.slane %v2331_v29, 1 }
 0x3e3   : > { %v2293_v1 = vrot.slane %v2292_v24, 1  ;;  %v2319_v26 = vrot.slane %v2318_v22, 1 }
 0x3e4   : > { %v2208_v4 = vmax.f32 %v2207_v28, %v2044_v18  ;;  %v2220_v46 = vmax.f32 %v2219_v27, %v2037_v11  ;;  %v2306_v58 = vrot.slane %v2305_v60, 1  ;;  %v2333_v10 = vmax.f32 %v2331_v29, %v2332_v63 }
 0x3e5   : > { %v2294_v47 = vmax.f32 %v2292_v24, %v2293_v1  ;;  %v2320_v3 = vmax.f32 %v2318_v22, %v2319_v26 }
 0x3e6   : > { %v2209_v0 = vmax.f32 %v2208_v4, %v2052_v34  ;;  %v2221_v51 = vmax.f32 %v2220_v46, %v2045_v30  ;;  %v2307_v50 = vmax.f32 %v2305_v60, %v2306_v58 }
 0x3e7   : > { %v2404_v35 = vcombine.low %v2320_v3, %v2333_v10 }
 0x3e8   : > { %v2210_v57 = vmax.f32 %v2209_v0, %v2060_v42  ;;  %v2222_v19 = vmax.f32 %v2221_v51, %v2053_v37  ;;  %v2403_v44 = vcombine.low %v2294_v47, %v2307_v50 }
 0x3e9   : > { %v2418_v49 = vrot.slane %v2404_v35, %v6017_v45 }
 0x3ea   : > { %v2211_v59 = vrot.slane %v2210_v57, 4  ;;  %v2223_v2 = vmax.f32 %v2222_v19, %v2061_v33  ;;  %v2411_v54 = vrot.slane %v2403_v44, %v6017_v45 }
 0x3ec   : > { %v2212_v8 = vmax.f32 %v2210_v57, %v2211_v59  ;;  %v2224_v9 = vrot.slane %v2223_v2, 4  ;;  %v2419_v55 = vcombine.low %v2411_v54, %v2418_v49 }
 0x3ee   : > { %v2213_v61 = vrot.slane %v2212_v8, 2  ;;  %v2225_v12 = vmax.f32 %v2223_v2, %v2224_v9  ;;  %v2435_v56 = vrot.slane %v2419_v55, 7 }
 0x3f0   : > { %v2214_v16 = vmax.f32 %v2212_v8, %v2213_v61  ;;  %v2226_v23 = vrot.slane %v2225_v12, 2 }
 0x3f2   : > { %v2215_v39 = vrot.slane %v2214_v16, 1  ;;  %v2227_v31 = vmax.f32 %v2225_v12, %v2226_v23 }
 0x3f4   : > { %v2228_v13 = vrot.slane %v2227_v31, 1  ;;  %v2216_v5 = vmax.f32 %v2214_v16, %v2215_v39 }
 0x3f6   : > { %v2229_v14 = vmax.f32 %v2227_v31, %v2228_v13 }
 0x3f8   : > { %v2370_v17 = vcombine.low %v2216_v5, %v2229_v14 }
 0x3fa   : > { %v2384_v48 = vrot.slane %v2370_v17, %v6017_v45 }
 0x3fc   : > { %v2385_v11 = vcombine.low %v2377_v32, %v2384_v48 }
 0x3fe   : > { %v2436_v18 = vsel %vm2425_vm3, %v2435_v56, %v2385_v11 }
 0x3ff   : > { %v2437_v28 = vsel %vm2427_vm4, %v2435_v56, %v2436_v18 }
 0x400   : > { %v2438_v52 = vsel %vm2429_vm5, %v2435_v56, %v2437_v28  ;;  %2449 = sbr.rel (%p4278_p7) target bundleno = 1895 (0x767), region = 166 }
 0x401   : > { %v2439_v7 = vsel %vm2431_vm6, %v2435_v56, %v2438_v52 }
 0x402   : > { %v2443_v15 = vmax.f32 %v2335_v25, %v2439_v7 }
 0x404   : > { %2445 = vst [vmem:[#allocation2 + $0x8] sm:$0xff] %v2443_v15 }
 0x405   : > { %v2513_v40 = vld [vmem:[#allocation15 + $0x1e8] sm:$0xff]  ;;  %v2512_v38 = vld [vmem:[#allocation15 + $0x1e0] sm:$0xff] }
 0x406   : > { %v2641_v20 = vld [vmem:[#allocation15 + $0x5e8] sm:$0xff]  ;;  %3030 = vmatprep.subr.mxu0 %v2513_v40  ;;  %v2640_v27 = vld [vmem:[#allocation15 + $0x5e0] sm:$0xff] }
 0x407   : > { %3101 = vmatprep.subr.mxu1 %v2641_v20  ;;  %v2509_v30 = vld [vmem:[#allocation15 + $0x1c8] sm:$0xff]  ;;  %3031 = vmatpush1.msra.mxu0 %v2512_v38  ;;  %v2508_v4 = vld [vmem:[#allocation15 + $0x1c0] sm:$0xff] }
 0x408   : > { %v2637_v34 = vld [vmem:[#allocation15 + $0x5c8] sm:$0xff]  ;;  %3102 = vmatpush1.msra.mxu1 %v2640_v27  ;;  %v2636_v43 = vld [vmem:[#allocation15 + $0x5c0] sm:$0xff]  ;;  %3032 = vmatprep.subr.mxu0 %v2509_v30 }
 0x409   : > { %v2505_v21 = vld [vmem:[#allocation15 + $0x1a8] sm:$0xff]  ;;  %3103 = vmatprep.subr.mxu1 %v2637_v34  ;;  %v2504_v46 = vld [vmem:[#allocation15 + $0x1a0] sm:$0xff]  ;;  %3033 = vmatpush1.msra.mxu0 %v2508_v4 }
 0x40a   : > { %v2633_v60 = vld [vmem:[#allocation15 + $0x5a8] sm:$0xff]  ;;  %v2632_v42 = vld [vmem:[#allocation15 + $0x5a0] sm:$0xff]  ;;  %3104 = vmatpush1.msra.mxu1 %v2636_v43  ;;  %3034 = vmatprep.subr.mxu0 %v2505_v21 }
 0x40b   : > { %v2501_v0 = vld [vmem:[#allocation15 + $0x188] sm:$0xff]  ;;  %3105 = vmatprep.subr.mxu1 %v2633_v60  ;;  %v2500_v29 = vld [vmem:[#allocation15 + $0x180] sm:$0xff]  ;;  %3035 = vmatpush1.msra.mxu0 %v2504_v46 }
 0x40c   : > { %v2629_v37 = vld [vmem:[#allocation15 + $0x588] sm:$0xff]  ;;  %v2628_v24 = vld [vmem:[#allocation15 + $0x580] sm:$0xff]  ;;  %3106 = vmatpush1.msra.mxu1 %v2632_v42  ;;  %3036 = vmatprep.subr.mxu0 %v2501_v0 }
 0x40d   : > { %v2497_v51 = vld [vmem:[#allocation15 + $0x168] sm:$0xff]  ;;  %3107 = vmatprep.subr.mxu1 %v2629_v37  ;;  %v2496_v33 = vld [vmem:[#allocation15 + $0x160] sm:$0xff]  ;;  %3037 = vmatpush1.msra.mxu0 %v2500_v29 }
 0x40e   : > { %v2625_v57 = vld [vmem:[#allocation15 + $0x568] sm:$0xff]  ;;  %v2624_v22 = vld [vmem:[#allocation15 + $0x560] sm:$0xff]  ;;  %3108 = vmatpush1.msra.mxu1 %v2628_v24  ;;  %3038 = vmatprep.subr.mxu0 %v2497_v51 }
 0x40f   : > { %v2493_v58 = vld [vmem:[#allocation15 + $0x148] sm:$0xff]  ;;  %3109 = vmatprep.subr.mxu1 %v2625_v57  ;;  %v2492_v59 = vld [vmem:[#allocation15 + $0x140] sm:$0xff]  ;;  %3039 = vmatpush1.msra.mxu0 %v2496_v33 }
 0x410   : > { %v2621_v19 = vld [vmem:[#allocation15 + $0x548] sm:$0xff]  ;;  %v2620_v63 = vld [vmem:[#allocation15 + $0x540] sm:$0xff]  ;;  %3110 = vmatpush1.msra.mxu1 %v2624_v22  ;;  %3040 = vmatprep.subr.mxu0 %v2493_v58 }
 0x411   : > { %v2489_v1 = vld [vmem:[#allocation15 + $0x128] sm:$0xff]  ;;  %3111 = vmatprep.subr.mxu1 %v2621_v19  ;;  %v2488_v8 = vld [vmem:[#allocation15 + $0x120] sm:$0xff]  ;;  %3041 = vmatpush1.msra.mxu0 %v2492_v59 }
 0x412   : > { %v2617_v2 = vld [vmem:[#allocation15 + $0x528] sm:$0xff]  ;;  %v2616_v26 = vld [vmem:[#allocation15 + $0x520] sm:$0xff]  ;;  %3112 = vmatpush1.msra.mxu1 %v2620_v63  ;;  %3042 = vmatprep.subr.mxu0 %v2489_v1 }
 0x413   : > { %v2485_v50 = vld [vmem:[#allocation15 + $0x108] sm:$0xff]  ;;  %3113 = vmatprep.subr.mxu1 %v2617_v2  ;;  %v2484_v61 = vld [vmem:[#allocation15 + $0x100] sm:$0xff]  ;;  %3043 = vmatpush1.msra.mxu0 %v2488_v8 }
 0x414   : > { %v2613_v9 = vld [vmem:[#allocation15 + $0x508] sm:$0xff]  ;;  %v2612_v10 = vld [vmem:[#allocation15 + $0x500] sm:$0xff]  ;;  %3114 = vmatpush1.msra.mxu1 %v2616_v26  ;;  %3044 = vmatprep.subr.mxu0 %v2485_v50 }
 0x415   : > { %v2481_v47 = vld [vmem:[#allocation15 + $0xe8] sm:$0xff]  ;;  %3115 = vmatprep.subr.mxu1 %v2613_v9  ;;  %v2480_v16 = vld [vmem:[#allocation15 + $0xe0] sm:$0xff]  ;;  %3045 = vmatpush1.msra.mxu0 %v2484_v61 }
 0x416   : > { %v2609_v12 = vld [vmem:[#allocation15 + $0x4e8] sm:$0xff]  ;;  %v2608_v3 = vld [vmem:[#allocation15 + $0x4e0] sm:$0xff]  ;;  %3116 = vmatpush1.msra.mxu1 %v2612_v10  ;;  %3046 = vmatprep.subr.mxu0 %v2481_v47 }
 0x417   : > { %v2477_v44 = vld [vmem:[#allocation15 + $0xc8] sm:$0xff]  ;;  %3117 = vmatprep.subr.mxu1 %v2609_v12  ;;  %v2476_v35 = vld [vmem:[#allocation15 + $0xc0] sm:$0xff]  ;;  %3047 = vmatpush1.msra.mxu0 %v2480_v16 }
 0x418   : > { %v2605_v23 = vld [vmem:[#allocation15 + $0x4c8] sm:$0xff]  ;;  %v2604_v39 = vld [vmem:[#allocation15 + $0x4c0] sm:$0xff]  ;;  %3118 = vmatpush1.msra.mxu1 %v2608_v3  ;;  %3048 = vmatprep.subr.mxu0 %v2477_v44 }
 0x419   : > { %v2473_v31 = vld [vmem:[#allocation15 + $0xa8] sm:$0xff]  ;;  %3119 = vmatprep.subr.mxu1 %v2605_v23  ;;  %v2472_v13 = vld [vmem:[#allocation15 + $0xa0] sm:$0xff]  ;;  %3049 = vmatpush1.msra.mxu0 %v2476_v35 }
 0x41a   : > { %v2601_v54 = vld [vmem:[#allocation15 + $0x4a8] sm:$0xff]  ;;  %v2600_v49 = vld [vmem:[#allocation15 + $0x4a0] sm:$0xff]  ;;  %3120 = vmatpush1.msra.mxu1 %v2604_v39  ;;  %3050 = vmatprep.subr.mxu0 %v2473_v31 }
 0x41b   : > { %v2469_v5 = vld [vmem:[#allocation15 + $0x88] sm:$0xff]  ;;  %3121 = vmatprep.subr.mxu1 %v2601_v54  ;;  %v2468_v55 = vld [vmem:[#allocation15 + $0x80] sm:$0xff]  ;;  %3051 = vmatpush1.msra.mxu0 %v2472_v13 }
 0x41c   : > { %v2597_v14 = vld [vmem:[#allocation15 + $0x488] sm:$0xff]  ;;  %v2596_v17 = vld [vmem:[#allocation15 + $0x480] sm:$0xff]  ;;  %3122 = vmatpush1.msra.mxu1 %v2600_v49  ;;  %3052 = vmatprep.subr.mxu0 %v2469_v5 }
 0x41d   : > { %v2465_v32 = vld [vmem:[#allocation15 + $0x68] sm:$0xff]  ;;  %3123 = vmatprep.subr.mxu1 %v2597_v14  ;;  %v2464_v56 = vld [vmem:[#allocation15 + $0x60] sm:$0xff]  ;;  %3053 = vmatpush1.msra.mxu0 %v2468_v55 }
 0x41e   : > { %v2593_v48 = vld [vmem:[#allocation15 + $0x468] sm:$0xff]  ;;  %v2592_v11 = vld [vmem:[#allocation15 + $0x460] sm:$0xff]  ;;  %3124 = vmatpush1.msra.mxu1 %v2596_v17  ;;  %3054 = vmatprep.subr.mxu0 %v2465_v32 }
 0x41f   : > { %v2461_v18 = vld [vmem:[#allocation15 + $0x48] sm:$0xff]  ;;  %3125 = vmatprep.subr.mxu1 %v2593_v48  ;;  %v2460_v28 = vld [vmem:[#allocation15 + $0x40] sm:$0xff]  ;;  %3055 = vmatpush1.msra.mxu0 %v2464_v56 }
 0x420   : > { %v2589_v25 = vld [vmem:[#allocation15 + $0x448] sm:$0xff]  ;;  %v2588_v52 = vld [vmem:[#allocation15 + $0x440] sm:$0xff]  ;;  %3126 = vmatpush1.msra.mxu1 %v2592_v11  ;;  %3056 = vmatprep.subr.mxu0 %v2461_v18 }
 0x421   : > { %v2457_v7 = vld [vmem:[#allocation15 + $0x28] sm:$0xff]  ;;  %3127 = vmatprep.subr.mxu1 %v2589_v25  ;;  %v2456_v40 = vld [vmem:[#allocation15 + $0x20] sm:$0xff]  ;;  %3057 = vmatpush1.msra.mxu0 %v2460_v28 }
 0x422   : > { %v2585_v15 = vld [vmem:[#allocation15 + $0x428] sm:$0xff]  ;;  %v2584_v20 = vld [vmem:[#allocation15 + $0x420] sm:$0xff]  ;;  %3128 = vmatpush1.msra.mxu1 %v2588_v52  ;;  %3058 = vmatprep.subr.mxu0 %v2457_v7 }
 0x423   : > { %v2453_v38 = vld [vmem:[#allocation15 + $0x8] sm:$0xff]  ;;  %3129 = vmatprep.subr.mxu1 %v2585_v15  ;;  %v2452_v30 = vld [vmem:[#allocation15] sm:$0xff]  ;;  %3059 = vmatpush1.msra.mxu0 %v2456_v40 }
 0x424   : > { %v2581_v27 = vld [vmem:[#allocation15 + $0x408] sm:$0xff]  ;;  %v2580_v34 = vld [vmem:[#allocation15 + $0x400] sm:$0xff]  ;;  %3130 = vmatpush1.msra.mxu1 %v2584_v20  ;;  %3060 = vmatprep.subr.mxu0 %v2453_v38 }
 0x425   : > { %v2577_v4 = vld [vmem:[#allocation15 + $0x3e8] sm:$0xff]  ;;  %3131 = vmatprep.subr.mxu1 %v2581_v27  ;;  %v2576_v21 = vld [vmem:[#allocation15 + $0x3e0] sm:$0xff]  ;;  %3061 = vmatpush1.msra.mxu0 %v2452_v30 }
 0x426   : > { %v2705_v43 = vld [vmem:[#allocation15 + $0x7e8] sm:$0xff]  ;;  %v2704_v60 = vld [vmem:[#allocation15 + $0x7e0] sm:$0xff]  ;;  %3132 = vmatpush1.msra.mxu1 %v2580_v34  ;;  %3062 = vmatprep.subr.mxu0 %v2577_v4 }
 0x427   : > { %v2573_v46 = vld [vmem:[#allocation15 + $0x3c8] sm:$0xff]  ;;  %3133 = vmatprep.subr.mxu1 %v2705_v43  ;;  %v2572_v0 = vld [vmem:[#allocation15 + $0x3c0] sm:$0xff]  ;;  %3063 = vmatpush2.msra.mxu0 %v2576_v21 }
 0x428   : > { %v2701_v42 = vld [vmem:[#allocation15 + $0x7c8] sm:$0xff]  ;;  %v2700_v37 = vld [vmem:[#allocation15 + $0x7c0] sm:$0xff]  ;;  %3134 = vmatpush2.msra.mxu1 %v2704_v60  ;;  %3064 = vmatprep.subr.mxu0 %v2573_v46 }
 0x429   : > { %v2569_v29 = vld [vmem:[#allocation15 + $0x3a8] sm:$0xff]  ;;  %3135 = vmatprep.subr.mxu1 %v2701_v42  ;;  %v2568_v51 = vld [vmem:[#allocation15 + $0x3a0] sm:$0xff]  ;;  %3065 = vmatpush2.msra.mxu0 %v2572_v0 }
 0x42a   : > { %v2697_v24 = vld [vmem:[#allocation15 + $0x7a8] sm:$0xff]  ;;  %v2696_v57 = vld [vmem:[#allocation15 + $0x7a0] sm:$0xff]  ;;  %3136 = vmatpush2.msra.mxu1 %v2700_v37  ;;  %3066 = vmatprep.subr.mxu0 %v2569_v29 }
 0x42b   : > { %v2565_v33 = vld [vmem:[#allocation15 + $0x388] sm:$0xff]  ;;  %3137 = vmatprep.subr.mxu1 %v2697_v24  ;;  %v2564_v58 = vld [vmem:[#allocation15 + $0x380] sm:$0xff]  ;;  %3067 = vmatpush2.msra.mxu0 %v2568_v51 }
 0x42c   : > { %v2693_v22 = vld [vmem:[#allocation15 + $0x788] sm:$0xff]  ;;  %v2692_v19 = vld [vmem:[#allocation15 + $0x780] sm:$0xff]  ;;  %3138 = vmatpush2.msra.mxu1 %v2696_v57  ;;  %3068 = vmatprep.subr.mxu0 %v2565_v33 }
 0x42d   : > { %v2561_v59 = vld [vmem:[#allocation15 + $0x368] sm:$0xff]  ;;  %3139 = vmatprep.subr.mxu1 %v2693_v22  ;;  %v2560_v1 = vld [vmem:[#allocation15 + $0x360] sm:$0xff]  ;;  %3069 = vmatpush2.msra.mxu0 %v2564_v58 }
 0x42e   : > { %v2689_v63 = vld [vmem:[#allocation15 + $0x768] sm:$0xff]  ;;  %v2688_v2 = vld [vmem:[#allocation15 + $0x760] sm:$0xff]  ;;  %3140 = vmatpush2.msra.mxu1 %v2692_v19  ;;  %3070 = vmatprep.subr.mxu0 %v2561_v59 }
 0x42f   : > { %v2557_v8 = vld [vmem:[#allocation15 + $0x348] sm:$0xff]  ;;  %3141 = vmatprep.subr.mxu1 %v2689_v63  ;;  %v2556_v50 = vld [vmem:[#allocation15 + $0x340] sm:$0xff]  ;;  %3071 = vmatpush2.msra.mxu0 %v2560_v1 }
 0x430   : > { %v2685_v26 = vld [vmem:[#allocation15 + $0x748] sm:$0xff]  ;;  %v2684_v9 = vld [vmem:[#allocation15 + $0x740] sm:$0xff]  ;;  %3142 = vmatpush2.msra.mxu1 %v2688_v2  ;;  %3072 = vmatprep.subr.mxu0 %v2557_v8 }
 0x431   : > { %v2553_v61 = vld [vmem:[#allocation15 + $0x328] sm:$0xff]  ;;  %3143 = vmatprep.subr.mxu1 %v2685_v26  ;;  %v2552_v47 = vld [vmem:[#allocation15 + $0x320] sm:$0xff]  ;;  %3073 = vmatpush2.msra.mxu0 %v2556_v50 }
 0x432   : > { %v2681_v10 = vld [vmem:[#allocation15 + $0x728] sm:$0xff]  ;;  %v2680_v12 = vld [vmem:[#allocation15 + $0x720] sm:$0xff]  ;;  %3144 = vmatpush2.msra.mxu1 %v2684_v9  ;;  %3074 = vmatprep.subr.mxu0 %v2553_v61 }
 0x433   : > { %v2549_v16 = vld [vmem:[#allocation15 + $0x308] sm:$0xff]  ;;  %3145 = vmatprep.subr.mxu1 %v2681_v10  ;;  %v2548_v44 = vld [vmem:[#allocation15 + $0x300] sm:$0xff]  ;;  %3075 = vmatpush2.msra.mxu0 %v2552_v47 }
 0x434   : > { %v2677_v3 = vld [vmem:[#allocation15 + $0x708] sm:$0xff]  ;;  %v2676_v23 = vld [vmem:[#allocation15 + $0x700] sm:$0xff]  ;;  %3146 = vmatpush2.msra.mxu1 %v2680_v12  ;;  %3076 = vmatprep.subr.mxu0 %v2549_v16 }
 0x435   : > { %v2545_v35 = vld [vmem:[#allocation15 + $0x2e8] sm:$0xff]  ;;  %3147 = vmatprep.subr.mxu1 %v2677_v3  ;;  %v2544_v31 = vld [vmem:[#allocation15 + $0x2e0] sm:$0xff]  ;;  %3077 = vmatpush2.msra.mxu0 %v2548_v44 }
 0x436   : > { %v2673_v39 = vld [vmem:[#allocation15 + $0x6e8] sm:$0xff]  ;;  %v2672_v54 = vld [vmem:[#allocation15 + $0x6e0] sm:$0xff]  ;;  %3148 = vmatpush2.msra.mxu1 %v2676_v23  ;;  %3078 = vmatprep.subr.mxu0 %v2545_v35 }
 0x437   : > { %v2541_v13 = vld [vmem:[#allocation15 + $0x2c8] sm:$0xff]  ;;  %3149 = vmatprep.subr.mxu1 %v2673_v39  ;;  %v2540_v5 = vld [vmem:[#allocation15 + $0x2c0] sm:$0xff]  ;;  %3079 = vmatpush2.msra.mxu0 %v2544_v31 }
 0x438   : > { %v2669_v49 = vld [vmem:[#allocation15 + $0x6c8] sm:$0xff]  ;;  %v2668_v14 = vld [vmem:[#allocation15 + $0x6c0] sm:$0xff]  ;;  %3150 = vmatpush2.msra.mxu1 %v2672_v54  ;;  %3080 = vmatprep.subr.mxu0 %v2541_v13 }
 0x439   : > { %v2537_v55 = vld [vmem:[#allocation15 + $0x2a8] sm:$0xff]  ;;  %3151 = vmatprep.subr.mxu1 %v2669_v49  ;;  %v2536_v32 = vld [vmem:[#allocation15 + $0x2a0] sm:$0xff]  ;;  %3081 = vmatpush2.msra.mxu0 %v2540_v5 }
 0x43a   : > { %v2665_v17 = vld [vmem:[#allocation15 + $0x6a8] sm:$0xff]  ;;  %v2664_v48 = vld [vmem:[#allocation15 + $0x6a0] sm:$0xff]  ;;  %3152 = vmatpush2.msra.mxu1 %v2668_v14  ;;  %3082 = vmatprep.subr.mxu0 %v2537_v55 }
 0x43b   : > { %v2450_v56 = vld [vmem:[#allocation2] sm:$0xff]  ;;  %v2533_v11 = vld [vmem:[#allocation15 + $0x288] sm:$0xff]  ;;  %3153 = vmatprep.subr.mxu1 %v2665_v17  ;;  %3083 = vmatpush2.msra.mxu0 %v2536_v32 }
 0x43c   : > { %v2661_v18 = vld [vmem:[#allocation15 + $0x688] sm:$0xff]  ;;  %v2532_v25 = vld [vmem:[#allocation15 + $0x280] sm:$0xff]  ;;  %3154 = vmatpush2.msra.mxu1 %v2664_v48  ;;  %v2988_v15 = vcombine.high %v2450_v56, %v2450_v56  ;;  %3084 = vmatprep.subr.mxu0 %v2533_v11  ;;  %v6151_v30 = vrot.slane %v2450_v56, %v6017_v45 }
 0x43d   : > { %v2660_v28 = vld [vmem:[#allocation15 + $0x680] sm:$0xff]  ;;  %v2529_v52 = vld [vmem:[#allocation15 + $0x268] sm:$0xff]  ;;  %3155 = vmatprep.subr.mxu1 %v2661_v18  ;;  %3085 = vmatpush2.msra.mxu0 %v2532_v25 }
 0x43e   : > { %v2657_v7 = vld [vmem:[#allocation15 + $0x668] sm:$0xff]  ;;  %v2528_v40 = vld [vmem:[#allocation15 + $0x260] sm:$0xff]  ;;  %3156 = vmatpush2.msra.mxu1 %v2660_v28  ;;  %3086 = vmatprep.subr.mxu0 %v2529_v52  ;;  %v6154_v60 = vrot.slane %v2988_v15, %v6017_v45  ;;  %v6158_v29 = vcombine.high %v6151_v30, %v6151_v30 }
 0x43f   : > { %v2656_v20 = vld [vmem:[#allocation15 + $0x660] sm:$0xff]  ;;  %v2525_v38 = vld [vmem:[#allocation15 + $0x248] sm:$0xff]  ;;  %3157 = vmatprep.subr.mxu1 %v2657_v7  ;;  %3087 = vmatpush2.msra.mxu0 %v2528_v40 }
 0x440   : > { %v2653_v27 = vld [vmem:[#allocation15 + $0x648] sm:$0xff]  ;;  %v2524_v34 = vld [vmem:[#allocation15 + $0x240] sm:$0xff]  ;;  %3158 = vmatpush2.msra.mxu1 %v2656_v20  ;;  %3088 = vmatprep.subr.mxu0 %v2525_v38  ;;  %v6162_v57 = vcombine.high %v6154_v60, %v6154_v60 }
 0x441   : > { %v2652_v4 = vld [vmem:[#allocation15 + $0x640] sm:$0xff]  ;;  %v2521_v43 = vld [vmem:[#allocation15 + $0x228] sm:$0xff]  ;;  %3159 = vmatprep.subr.mxu1 %v2653_v27  ;;  %3089 = vmatpush2.msra.mxu0 %v2524_v34 }
 0x442   : > { %v2649_v21 = vld [vmem:[#allocation15 + $0x628] sm:$0xff]  ;;  %v2520_v46 = vld [vmem:[#allocation15 + $0x220] sm:$0xff]  ;;  %3160 = vmatpush2.msra.mxu1 %v2652_v4  ;;  %3090 = vmatprep.subr.mxu0 %v2521_v43 }
 0x443   : > { %v2648_v42 = vld [vmem:[#allocation15 + $0x620] sm:$0xff]  ;;  %v2517_v0 = vld [vmem:[#allocation15 + $0x208] sm:$0xff]  ;;  %3161 = vmatprep.subr.mxu1 %v2649_v21  ;;  %3091 = vmatpush2.msra.mxu0 %v2520_v46 }
 0x444   : > { %v2645_v37 = vld [vmem:[#allocation15 + $0x608] sm:$0xff]  ;;  %v2516_v24 = vld [vmem:[#allocation15 + $0x200] sm:$0xff]  ;;  %3162 = vmatpush2.msra.mxu1 %v2648_v42  ;;  %3092 = vmatprep.subr.mxu0 %v2517_v0 }
 0x445   : > { %v2644_v51 = vld [vmem:[#allocation15 + $0x600] sm:$0xff]  ;;  %3163 = vmatprep.subr.mxu1 %v2645_v37  ;;  %v2769_v33 = vld [vmem:[#allocation15 + $0x9e8] sm:$0xff]  ;;  %3093 = vmatpush2.msra.mxu0 %v2516_v24 }
 0x446   : > { %3094 = vmatprep.mubr.f32.mxu0 %v6158_v29  ;;  %v2897_v22 = vld [vmem:[#allocation15 + $0xde8] sm:$0xff]  ;;  %3164 = vmatpush2.msra.mxu1 %v2644_v51  ;;  %v2768_v58 = vld [vmem:[#allocation15 + $0x9e0] sm:$0xff] }
 0x447   : > { %3095 = vmatmul.mubr.f32.vlgmr.msra.gmra.mxu0 %v6151_v30  ;;  %v2896_v19 = vld [vmem:[#allocation15 + $0xde0] sm:$0xff]  ;;  %3165 = vmatprep.mubr.f32.mxu1 %v6162_v57  ;;  %v2765_v59 = vld [vmem:[#allocation15 + $0x9c8] sm:$0xff] }
 0x448   : > { %3172 = vmatprep.subr.mxu0 %v2769_v33  ;;  %v2893_v63 = vld [vmem:[#allocation15 + $0xdc8] sm:$0xff]  ;;  %3243 = vmatprep.subr.mxu1 %v2897_v22  ;;  %v2764_v1 = vld [vmem:[#allocation15 + $0x9c0] sm:$0xff] }
 0x449   : > { %3166 = vmatmul.mubr.f32.vlgmr.msra.gmra.mxu1 %v6154_v60  ;;  %v2892_v2 = vld [vmem:[#allocation15 + $0xdc0] sm:$0xff]  ;;  %3173 = vmatpush1.msra.mxu0 %v2768_v58  ;;  %v2761_v8 = vld [vmem:[#allocation15 + $0x9a8] sm:$0xff] }
 0x44a   : > { %3244 = vmatpush1.msra.mxu1 %v2896_v19  ;;  %v2889_v26 = vld [vmem:[#allocation15 + $0xda8] sm:$0xff]  ;;  %3174 = vmatprep.subr.mxu0 %v2765_v59  ;;  %v2760_v50 = vld [vmem:[#allocation15 + $0x9a0] sm:$0xff] }
 0x44b   : > { %3245 = vmatprep.subr.mxu1 %v2893_v63  ;;  %v2888_v9 = vld [vmem:[#allocation15 + $0xda0] sm:$0xff]  ;;  %3175 = vmatpush1.msra.mxu0 %v2764_v1  ;;  %v2757_v61 = vld [vmem:[#allocation15 + $0x988] sm:$0xff] }
 0x44c   : > { %3246 = vmatpush1.msra.mxu1 %v2892_v2  ;;  %v2885_v10 = vld [vmem:[#allocation15 + $0xd88] sm:$0xff]  ;;  %3176 = vmatprep.subr.mxu0 %v2761_v8  ;;  %v2756_v47 = vld [vmem:[#allocation15 + $0x980] sm:$0xff] }
 0x44d   : > { %3247 = vmatprep.subr.mxu1 %v2889_v26  ;;  %v2884_v12 = vld [vmem:[#allocation15 + $0xd80] sm:$0xff]  ;;  %3177 = vmatpush1.msra.mxu0 %v2760_v50  ;;  %v2753_v16 = vld [vmem:[#allocation15 + $0x968] sm:$0xff] }
 0x44e   : > { %3248 = vmatpush1.msra.mxu1 %v2888_v9  ;;  %v2881_v3 = vld [vmem:[#allocation15 + $0xd68] sm:$0xff]  ;;  %3178 = vmatprep.subr.mxu0 %v2757_v61  ;;  %v2752_v44 = vld [vmem:[#allocation15 + $0x960] sm:$0xff] }
 0x44f   : > { %3249 = vmatprep.subr.mxu1 %v2885_v10  ;;  %v2880_v23 = vld [vmem:[#allocation15 + $0xd60] sm:$0xff]  ;;  %3179 = vmatpush1.msra.mxu0 %v2756_v47  ;;  %v2749_v35 = vld [vmem:[#allocation15 + $0x948] sm:$0xff] }
 0x450   : > { %3250 = vmatpush1.msra.mxu1 %v2884_v12  ;;  %v2877_v39 = vld [vmem:[#allocation15 + $0xd48] sm:$0xff]  ;;  %3180 = vmatprep.subr.mxu0 %v2753_v16  ;;  %v2748_v31 = vld [vmem:[#allocation15 + $0x940] sm:$0xff] }
 0x451   : > { %3251 = vmatprep.subr.mxu1 %v2881_v3  ;;  %v2876_v54 = vld [vmem:[#allocation15 + $0xd40] sm:$0xff]  ;;  %3181 = vmatpush1.msra.mxu0 %v2752_v44  ;;  %v2745_v13 = vld [vmem:[#allocation15 + $0x928] sm:$0xff] }
 0x452   : > { %3252 = vmatpush1.msra.mxu1 %v2880_v23  ;;  %v2873_v49 = vld [vmem:[#allocation15 + $0xd28] sm:$0xff]  ;;  %3182 = vmatprep.subr.mxu0 %v2749_v35  ;;  %v2744_v5 = vld [vmem:[#allocation15 + $0x920] sm:$0xff] }
 0x453   : > { %3253 = vmatprep.subr.mxu1 %v2877_v39  ;;  %v2872_v14 = vld [vmem:[#allocation15 + $0xd20] sm:$0xff]  ;;  %3183 = vmatpush1.msra.mxu0 %v2748_v31  ;;  %v2741_v55 = vld [vmem:[#allocation15 + $0x908] sm:$0xff] }
 0x454   : > { %3254 = vmatpush1.msra.mxu1 %v2876_v54  ;;  %v2869_v17 = vld [vmem:[#allocation15 + $0xd08] sm:$0xff]  ;;  %3184 = vmatprep.subr.mxu0 %v2745_v13  ;;  %v2740_v32 = vld [vmem:[#allocation15 + $0x900] sm:$0xff] }
 0x455   : > { %3255 = vmatprep.subr.mxu1 %v2873_v49  ;;  %v2868_v48 = vld [vmem:[#allocation15 + $0xd00] sm:$0xff]  ;;  %3185 = vmatpush1.msra.mxu0 %v2744_v5  ;;  %v2737_v56 = vld [vmem:[#allocation15 + $0x8e8] sm:$0xff] }
 0x456   : > { %3256 = vmatpush1.msra.mxu1 %v2872_v14  ;;  %v2865_v11 = vld [vmem:[#allocation15 + $0xce8] sm:$0xff]  ;;  %3186 = vmatprep.subr.mxu0 %v2741_v55  ;;  %v2736_v18 = vld [vmem:[#allocation15 + $0x8e0] sm:$0xff] }
 0x457   : > { %3257 = vmatprep.subr.mxu1 %v2869_v17  ;;  %v2864_v25 = vld [vmem:[#allocation15 + $0xce0] sm:$0xff]  ;;  %3187 = vmatpush1.msra.mxu0 %v2740_v32  ;;  %v2733_v28 = vld [vmem:[#allocation15 + $0x8c8] sm:$0xff] }
 0x458   : > { %3258 = vmatpush1.msra.mxu1 %v2868_v48  ;;  %v2861_v52 = vld [vmem:[#allocation15 + $0xcc8] sm:$0xff]  ;;  %3188 = vmatprep.subr.mxu0 %v2737_v56  ;;  %v2732_v7 = vld [vmem:[#allocation15 + $0x8c0] sm:$0xff] }
 0x459   : > { %3259 = vmatprep.subr.mxu1 %v2865_v11  ;;  %v2860_v15 = vld [vmem:[#allocation15 + $0xcc0] sm:$0xff]  ;;  %3189 = vmatpush1.msra.mxu0 %v2736_v18  ;;  %v2729_v40 = vld [vmem:[#allocation15 + $0x8a8] sm:$0xff] }
 0x45a   : > { %3260 = vmatpush1.msra.mxu1 %v2864_v25  ;;  %v2857_v20 = vld [vmem:[#allocation15 + $0xca8] sm:$0xff]  ;;  %3190 = vmatprep.subr.mxu0 %v2733_v28  ;;  %v2728_v38 = vld [vmem:[#allocation15 + $0x8a0] sm:$0xff] }
 0x45b   : > { %3261 = vmatprep.subr.mxu1 %v2861_v52  ;;  %v2856_v27 = vld [vmem:[#allocation15 + $0xca0] sm:$0xff]  ;;  %3191 = vmatpush1.msra.mxu0 %v2732_v7  ;;  %v2725_v34 = vld [vmem:[#allocation15 + $0x888] sm:$0xff] }
 0x45c   : > { %3262 = vmatpush1.msra.mxu1 %v2860_v15  ;;  %v2853_v4 = vld [vmem:[#allocation15 + $0xc88] sm:$0xff]  ;;  %3192 = vmatprep.subr.mxu0 %v2729_v40  ;;  %v2724_v43 = vld [vmem:[#allocation15 + $0x880] sm:$0xff] }
 0x45d   : > { %3263 = vmatprep.subr.mxu1 %v2857_v20  ;;  %v2852_v21 = vld [vmem:[#allocation15 + $0xc80] sm:$0xff]  ;;  %3193 = vmatpush1.msra.mxu0 %v2728_v38  ;;  %v2721_v46 = vld [vmem:[#allocation15 + $0x868] sm:$0xff] }
 0x45e   : > { %3264 = vmatpush1.msra.mxu1 %v2856_v27  ;;  %v2849_v42 = vld [vmem:[#allocation15 + $0xc68] sm:$0xff]  ;;  %3194 = vmatprep.subr.mxu0 %v2725_v34  ;;  %v2720_v0 = vld [vmem:[#allocation15 + $0x860] sm:$0xff] }
 0x45f   : > { %3265 = vmatprep.subr.mxu1 %v2853_v4  ;;  %v2848_v37 = vld [vmem:[#allocation15 + $0xc60] sm:$0xff]  ;;  %3195 = vmatpush1.msra.mxu0 %v2724_v43  ;;  %v2717_v24 = vld [vmem:[#allocation15 + $0x848] sm:$0xff] }
 0x460   : > { %3266 = vmatpush1.msra.mxu1 %v2852_v21  ;;  %v2845_v51 = vld [vmem:[#allocation15 + $0xc48] sm:$0xff]  ;;  %3196 = vmatprep.subr.mxu0 %v2721_v46  ;;  %v2716_v33 = vld [vmem:[#allocation15 + $0x840] sm:$0xff] }
 0x461   : > { %3267 = vmatprep.subr.mxu1 %v2849_v42  ;;  %v2844_v22 = vld [vmem:[#allocation15 + $0xc40] sm:$0xff]  ;;  %3197 = vmatpush1.msra.mxu0 %v2720_v0  ;;  %v2713_v58 = vld [vmem:[#allocation15 + $0x828] sm:$0xff] }
 0x462   : > { %3268 = vmatpush1.msra.mxu1 %v2848_v37  ;;  %v2841_v19 = vld [vmem:[#allocation15 + $0xc28] sm:$0xff]  ;;  %3198 = vmatprep.subr.mxu0 %v2717_v24  ;;  %v2712_v59 = vld [vmem:[#allocation15 + $0x820] sm:$0xff] }
 0x463   : > { %3269 = vmatprep.subr.mxu1 %v2845_v51  ;;  %v2840_v63 = vld [vmem:[#allocation15 + $0xc20] sm:$0xff]  ;;  %3199 = vmatpush1.msra.mxu0 %v2716_v33  ;;  %v2709_v1 = vld [vmem:[#allocation15 + $0x808] sm:$0xff] }
 0x464   : > { %3270 = vmatpush1.msra.mxu1 %v2844_v22  ;;  %v2837_v2 = vld [vmem:[#allocation15 + $0xc08] sm:$0xff]  ;;  %3200 = vmatprep.subr.mxu0 %v2713_v58  ;;  %v2708_v8 = vld [vmem:[#allocation15 + $0x800] sm:$0xff] }
 0x465   : > { %3271 = vmatprep.subr.mxu1 %v2841_v19  ;;  %v2836_v26 = vld [vmem:[#allocation15 + $0xc00] sm:$0xff]  ;;  %3201 = vmatpush1.msra.mxu0 %v2712_v59  ;;  %v2833_v50 = vld [vmem:[#allocation15 + $0xbe8] sm:$0xff] }
 0x466   : > { %3272 = vmatpush1.msra.mxu1 %v2840_v63  ;;  %v2961_v9 = vld [vmem:[#allocation15 + $0xfe8] sm:$0xff]  ;;  %3202 = vmatprep.subr.mxu0 %v2709_v1  ;;  %v2832_v61 = vld [vmem:[#allocation15 + $0xbe0] sm:$0xff] }
 0x467   : > { %3273 = vmatprep.subr.mxu1 %v2837_v2  ;;  %v2960_v10 = vld [vmem:[#allocation15 + $0xfe0] sm:$0xff]  ;;  %3203 = vmatpush1.msra.mxu0 %v2708_v8  ;;  %v2829_v47 = vld [vmem:[#allocation15 + $0xbc8] sm:$0xff] }
 0x468   : > { %3274 = vmatpush1.msra.mxu1 %v2836_v26  ;;  %v2957_v12 = vld [vmem:[#allocation15 + $0xfc8] sm:$0xff]  ;;  %3204 = vmatprep.subr.mxu0 %v2833_v50  ;;  %v2828_v16 = vld [vmem:[#allocation15 + $0xbc0] sm:$0xff] }
 0x469   : > { %3275 = vmatprep.subr.mxu1 %v2961_v9  ;;  %v2956_v3 = vld [vmem:[#allocation15 + $0xfc0] sm:$0xff]  ;;  %3205 = vmatpush2.msra.mxu0 %v2832_v61  ;;  %v2825_v44 = vld [vmem:[#allocation15 + $0xba8] sm:$0xff] }
 0x46a   : > { %3276 = vmatpush2.msra.mxu1 %v2960_v10  ;;  %v2953_v23 = vld [vmem:[#allocation15 + $0xfa8] sm:$0xff]  ;;  %3206 = vmatprep.subr.mxu0 %v2829_v47  ;;  %v2824_v35 = vld [vmem:[#allocation15 + $0xba0] sm:$0xff] }
 0x46b   : > { %3277 = vmatprep.subr.mxu1 %v2957_v12  ;;  %v2952_v39 = vld [vmem:[#allocation15 + $0xfa0] sm:$0xff]  ;;  %3207 = vmatpush2.msra.mxu0 %v2828_v16  ;;  %v2821_v31 = vld [vmem:[#allocation15 + $0xb88] sm:$0xff] }
 0x46c   : > { %3278 = vmatpush2.msra.mxu1 %v2956_v3  ;;  %v2949_v54 = vld [vmem:[#allocation15 + $0xf88] sm:$0xff]  ;;  %3208 = vmatprep.subr.mxu0 %v2825_v44  ;;  %v2820_v13 = vld [vmem:[#allocation15 + $0xb80] sm:$0xff] }
 0x46d   : > { %3279 = vmatprep.subr.mxu1 %v2953_v23  ;;  %v2948_v49 = vld [vmem:[#allocation15 + $0xf80] sm:$0xff]  ;;  %3209 = vmatpush2.msra.mxu0 %v2824_v35  ;;  %v2817_v5 = vld [vmem:[#allocation15 + $0xb68] sm:$0xff] }
 0x46e   : > { %3280 = vmatpush2.msra.mxu1 %v2952_v39  ;;  %v2945_v14 = vld [vmem:[#allocation15 + $0xf68] sm:$0xff]  ;;  %3210 = vmatprep.subr.mxu0 %v2821_v31  ;;  %v2816_v55 = vld [vmem:[#allocation15 + $0xb60] sm:$0xff] }
 0x46f   : > { %3281 = vmatprep.subr.mxu1 %v2949_v54  ;;  %v2944_v17 = vld [vmem:[#allocation15 + $0xf60] sm:$0xff]  ;;  %3211 = vmatpush2.msra.mxu0 %v2820_v13  ;;  %v2813_v32 = vld [vmem:[#allocation15 + $0xb48] sm:$0xff] }
 0x470   : > { %3282 = vmatpush2.msra.mxu1 %v2948_v49  ;;  %v2941_v48 = vld [vmem:[#allocation15 + $0xf48] sm:$0xff]  ;;  %3212 = vmatprep.subr.mxu0 %v2817_v5  ;;  %v2812_v56 = vld [vmem:[#allocation15 + $0xb40] sm:$0xff]  ;;  %v2515_v49 = vld [vmem:[#allocation15 + $0x1f8] sm:$0xff] }
 0x471   : > { %3283 = vmatprep.subr.mxu1 %v2945_v14  ;;  %v2940_v11 = vld [vmem:[#allocation15 + $0xf40] sm:$0xff]  ;;  %3213 = vmatpush2.msra.mxu0 %v2816_v55  ;;  %v2809_v18 = vld [vmem:[#allocation15 + $0xb28] sm:$0xff]  ;;  %v2643_v5 = vld [vmem:[#allocation15 + $0x5f8] sm:$0xff] }
 0x472   : > { %3284 = vmatpush2.msra.mxu1 %v2944_v17  ;;  %v2937_v25 = vld [vmem:[#allocation15 + $0xf28] sm:$0xff]  ;;  %3214 = vmatprep.subr.mxu0 %v2813_v32  ;;  %v2808_v28 = vld [vmem:[#allocation15 + $0xb20] sm:$0xff]  ;;  %v2514_v14 = vld [vmem:[#allocation15 + $0x1f0] sm:$0xff] }
 0x473   : > { %3285 = vmatprep.subr.mxu1 %v2941_v48  ;;  %v2936_v52 = vld [vmem:[#allocation15 + $0xf20] sm:$0xff]  ;;  %3215 = vmatpush2.msra.mxu0 %v2812_v56  ;;  %v2805_v7 = vld [vmem:[#allocation15 + $0xb08] sm:$0xff]  ;;  %v2642_v55 = vld [vmem:[#allocation15 + $0x5f0] sm:$0xff] }
 0x474   : > { %3286 = vmatpush2.msra.mxu1 %v2940_v11  ;;  %v2933_v15 = vld [vmem:[#allocation15 + $0xf08] sm:$0xff]  ;;  %3216 = vmatprep.subr.mxu0 %v2809_v18  ;;  %v2804_v40 = vld [vmem:[#allocation15 + $0xb00] sm:$0xff]  ;;  %v2511_v17 = vld [vmem:[#allocation15 + $0x1d8] sm:$0xff] }
 0x475   : > { %3287 = vmatprep.subr.mxu1 %v2937_v25  ;;  %v2932_v20 = vld [vmem:[#allocation15 + $0xf00] sm:$0xff]  ;;  %3217 = vmatpush2.msra.mxu0 %v2808_v28  ;;  %v2801_v38 = vld [vmem:[#allocation15 + $0xae8] sm:$0xff]  ;;  %v2639_v32 = vld [vmem:[#allocation15 + $0x5d8] sm:$0xff] }
 0x476   : > { %3288 = vmatpush2.msra.mxu1 %v2936_v52  ;;  %v2929_v27 = vld [vmem:[#allocation15 + $0xee8] sm:$0xff]  ;;  %3218 = vmatprep.subr.mxu0 %v2805_v7  ;;  %v2800_v34 = vld [vmem:[#allocation15 + $0xae0] sm:$0xff]  ;;  %v2510_v48 = vld [vmem:[#allocation15 + $0x1d0] sm:$0xff] }
 0x477   : > { %3289 = vmatprep.subr.mxu1 %v2933_v15  ;;  %v2928_v4 = vld [vmem:[#allocation15 + $0xee0] sm:$0xff]  ;;  %3219 = vmatpush2.msra.mxu0 %v2804_v40  ;;  %v2797_v43 = vld [vmem:[#allocation15 + $0xac8] sm:$0xff]  ;;  %v2638_v56 = vld [vmem:[#allocation15 + $0x5d0] sm:$0xff] }
 0x478   : > { %3290 = vmatpush2.msra.mxu1 %v2932_v20  ;;  %v2925_v21 = vld [vmem:[#allocation15 + $0xec8] sm:$0xff]  ;;  %3220 = vmatprep.subr.mxu0 %v2801_v38  ;;  %v2796_v46 = vld [vmem:[#allocation15 + $0xac0] sm:$0xff]  ;;  %v2507_v11 = vld [vmem:[#allocation15 + $0x1b8] sm:$0xff] }
 0x479   : > { %3291 = vmatprep.subr.mxu1 %v2929_v27  ;;  %v2924_v42 = vld [vmem:[#allocation15 + $0xec0] sm:$0xff]  ;;  %3221 = vmatpush2.msra.mxu0 %v2800_v34  ;;  %v2793_v0 = vld [vmem:[#allocation15 + $0xaa8] sm:$0xff]  ;;  %v2635_v18 = vld [vmem:[#allocation15 + $0x5b8] sm:$0xff] }
 0x47a   : > { %3292 = vmatpush2.msra.mxu1 %v2928_v4  ;;  %v2921_v37 = vld [vmem:[#allocation15 + $0xea8] sm:$0xff]  ;;  %3222 = vmatprep.subr.mxu0 %v2797_v43  ;;  %v2792_v24 = vld [vmem:[#allocation15 + $0xaa0] sm:$0xff]  ;;  %v2506_v25 = vld [vmem:[#allocation15 + $0x1b0] sm:$0xff] }
 0x47b   : > { %3293 = vmatprep.subr.mxu1 %v2925_v21  ;;  %v2920_v51 = vld [vmem:[#allocation15 + $0xea0] sm:$0xff]  ;;  %v2451_v33 = vld [vmem:[#allocation2 + $0x8] sm:$0xff]  ;;  %3223 = vmatpush2.msra.mxu0 %v2796_v46  ;;  %v2634_v28 = vld [vmem:[#allocation15 + $0x5b0] sm:$0xff] }
 0x47c   : > { %3294 = vmatpush2.msra.mxu1 %v2924_v42  ;;  %v2789_v22 = vld [vmem:[#allocation15 + $0xa88] sm:$0xff]  ;;  %3224 = vmatprep.subr.mxu0 %v2793_v0  ;;  %v2788_v19 = vld [vmem:[#allocation15 + $0xa80] sm:$0xff]  ;;  %v3005_v2 = vcombine.high %v2451_v33, %v2451_v33  ;;  %v6169_v61 = vrot.slane %v2451_v33, %v6017_v45  ;;  %v2503_v52 = vld [vmem:[#allocation15 + $0x198] sm:$0xff] }
 0x47d   : > { %v2917_v58 = vld [vmem:[#allocation15 + $0xe88] sm:$0xff]  ;;  %3295 = vmatprep.subr.mxu1 %v2921_v37  ;;  %v2916_v59 = vld [vmem:[#allocation15 + $0xe80] sm:$0xff]  ;;  %3225 = vmatpush2.msra.mxu0 %v2792_v24  ;;  %v2631_v7 = vld [vmem:[#allocation15 + $0x598] sm:$0xff] }
 0x47e   : > { %3296 = vmatpush2.msra.mxu1 %v2920_v51  ;;  %v2785_v63 = vld [vmem:[#allocation15 + $0xa68] sm:$0xff]  ;;  %3226 = vmatprep.subr.mxu0 %v2789_v22  ;;  %v2784_v8 = vld [vmem:[#allocation15 + $0xa60] sm:$0xff]  ;;  %v6172_v3 = vrot.slane %v3005_v2, %v6017_v45  ;;  %v6176_v31 = vcombine.high %v6169_v61, %v6169_v61  ;;  %v2502_v15 = vld [vmem:[#allocation15 + $0x190] sm:$0xff] }
 0x47f   : > { %v2913_v1 = vld [vmem:[#allocation15 + $0xe68] sm:$0xff]  ;;  %3297 = vmatprep.subr.mxu1 %v2917_v58  ;;  %v2912_v26 = vld [vmem:[#allocation15 + $0xe60] sm:$0xff]  ;;  %3227 = vmatpush2.msra.mxu0 %v2788_v19  ;;  %v2630_v40 = vld [vmem:[#allocation15 + $0x590] sm:$0xff] }
 0x480   : > { %3298 = vmatpush2.msra.mxu1 %v2916_v59  ;;  %v2781_v50 = vld [vmem:[#allocation15 + $0xa48] sm:$0xff]  ;;  %3228 = vmatprep.subr.mxu0 %v2785_v63  ;;  %v2780_v10 = vld [vmem:[#allocation15 + $0xa40] sm:$0xff]  ;;  %v6180_v45 = vcombine.high %v6172_v3, %v6172_v3  ;;  %v2499_v20 = vld [vmem:[#allocation15 + $0x178] sm:$0xff] }
 0x481   : > { %v2909_v9 = vld [vmem:[#allocation15 + $0xe48] sm:$0xff]  ;;  %3299 = vmatprep.subr.mxu1 %v2913_v1  ;;  %v2908_v47 = vld [vmem:[#allocation15 + $0xe40] sm:$0xff]  ;;  %3229 = vmatpush2.msra.mxu0 %v2784_v8  ;;  %v2627_v38 = vld [vmem:[#allocation15 + $0x578] sm:$0xff] }
 0x482   : > { %3300 = vmatpush2.msra.mxu1 %v2912_v26  ;;  %v2777_v12 = vld [vmem:[#allocation15 + $0xa28] sm:$0xff]  ;;  %3230 = vmatprep.subr.mxu0 %v2781_v50  ;;  %v2776_v44 = vld [vmem:[#allocation15 + $0xa20] sm:$0xff]  ;;  %v2498_v27 = vld [vmem:[#allocation15 + $0x170] sm:$0xff] }
 0x483   : > { %v2905_v16 = vld [vmem:[#allocation15 + $0xe28] sm:$0xff]  ;;  %3301 = vmatprep.subr.mxu1 %v2909_v9  ;;  %v2904_v23 = vld [vmem:[#allocation15 + $0xe20] sm:$0xff]  ;;  %3231 = vmatpush2.msra.mxu0 %v2780_v10  ;;  %v2626_v34 = vld [vmem:[#allocation15 + $0x570] sm:$0xff] }
 0x484   : > { %3302 = vmatpush2.msra.mxu1 %v2908_v47  ;;  %v2773_v35 = vld [vmem:[#allocation15 + $0xa08] sm:$0xff]  ;;  %3232 = vmatprep.subr.mxu0 %v2777_v12  ;;  %v2772_v54 = vld [vmem:[#allocation15 + $0xa00] sm:$0xff]  ;;  %v2495_v4 = vld [vmem:[#allocation15 + $0x158] sm:$0xff] }
 0x485   : > { %v2901_v39 = vld [vmem:[#allocation15 + $0xe08] sm:$0xff]  ;;  %3303 = vmatprep.subr.mxu1 %v2905_v16  ;;  %3233 = vmatpush2.msra.mxu0 %v2776_v44  ;;  %v2900_v13 = vld [vmem:[#allocation15 + $0xe00] sm:$0xff]  ;;  %v2623_v43 = vld [vmem:[#allocation15 + $0x558] sm:$0xff] }
 0x486   : > { %3304 = vmatpush2.msra.mxu1 %v2904_v23  ;;  %3234 = vmatprep.subr.mxu0 %v2773_v35  ;;  %v2494_v21 = vld [vmem:[#allocation15 + $0x150] sm:$0xff]  ;;  %v2491_v42 = vld [vmem:[#allocation15 + $0x138] sm:$0xff] }
 0x487   : > { %3305 = vmatprep.subr.mxu1 %v2901_v39  ;;  %3235 = vmatpush2.msra.mxu0 %v2772_v54  ;;  %v2622_v46 = vld [vmem:[#allocation15 + $0x550] sm:$0xff]  ;;  %v2619_v0 = vld [vmem:[#allocation15 + $0x538] sm:$0xff] }
 0x488   : > { %3236 = vmatprep.mubr.f32.mxu0 %v6176_v31  ;;  %3306 = vmatpush2.msra.mxu1 %v2900_v13  ;;  %v2490_v37 = vld [vmem:[#allocation15 + $0x130] sm:$0xff]  ;;  %v2487_v51 = vld [vmem:[#allocation15 + $0x118] sm:$0xff] }
 0x489   : > { %3237 = vmatmul.mubr.f32.vlgmr.msra.gmra.mxu0 %v6169_v61  ;;  %3307 = vmatprep.mubr.f32.mxu1 %v6180_v45  ;;  %v2618_v24 = vld [vmem:[#allocation15 + $0x530] sm:$0xff]  ;;  %v2615_v33 = vld [vmem:[#allocation15 + $0x518] sm:$0xff] }
 0x48a   : > { %3314 = vmatprep.subr.mxu0 %v2515_v49  ;;  %3385 = vmatprep.subr.mxu1 %v2643_v5  ;;  %v2486_v22 = vld [vmem:[#allocation15 + $0x110] sm:$0xff]  ;;  %v2483_v19 = vld [vmem:[#allocation15 + $0xf8] sm:$0xff] }
 0x48b   : > { %3308 = vmatmul.mubr.f32.vlgmr.msra.gmra.mxu1 %v6172_v3  ;;  %3315 = vmatpush1.msra.mxu0 %v2514_v14  ;;  %v2614_v58 = vld [vmem:[#allocation15 + $0x510] sm:$0xff]  ;;  %v2611_v59 = vld [vmem:[#allocation15 + $0x4f8] sm:$0xff] }
 0x48c   : > { %3386 = vmatpush1.msra.mxu1 %v2642_v55  ;;  %3316 = vmatprep.subr.mxu0 %v2511_v17  ;;  %v2482_v63 = vld [vmem:[#allocation15 + $0xf0] sm:$0xff]  ;;  %v2479_v2 = vld [vmem:[#allocation15 + $0xd8] sm:$0xff] }
 0x48d   : > { %3387 = vmatprep.subr.mxu1 %v2639_v32  ;;  %3317 = vmatpush1.msra.mxu0 %v2510_v48  ;;  %v2610_v1 = vld [vmem:[#allocation15 + $0x4f0] sm:$0xff]  ;;  %v2607_v8 = vld [vmem:[#allocation15 + $0x4d8] sm:$0xff] }
 0x48e   : > { %3388 = vmatpush1.msra.mxu1 %v2638_v56  ;;  %3318 = vmatprep.subr.mxu0 %v2507_v11  ;;  %v2478_v26 = vld [vmem:[#allocation15 + $0xd0] sm:$0xff]  ;;  %v2475_v9 = vld [vmem:[#allocation15 + $0xb8] sm:$0xff] }
 0x48f   : > { %3389 = vmatprep.subr.mxu1 %v2635_v18  ;;  %3319 = vmatpush1.msra.mxu0 %v2506_v25  ;;  %v2606_v50 = vld [vmem:[#allocation15 + $0x4d0] sm:$0xff]  ;;  %v2603_v10 = vld [vmem:[#allocation15 + $0x4b8] sm:$0xff] }
 0x490   : > { %3390 = vmatpush1.msra.mxu1 %v2634_v28  ;;  %3320 = vmatprep.subr.mxu0 %v2503_v52  ;;  %v2474_v47 = vld [vmem:[#allocation15 + $0xb0] sm:$0xff]  ;;  %v2471_v16 = vld [vmem:[#allocation15 + $0x98] sm:$0xff] }
 0x491   : > { %3391 = vmatprep.subr.mxu1 %v2631_v7  ;;  %3321 = vmatpush1.msra.mxu0 %v2502_v15  ;;  %v2602_v12 = vld [vmem:[#allocation15 + $0x4b0] sm:$0xff]  ;;  %v2599_v44 = vld [vmem:[#allocation15 + $0x498] sm:$0xff] }
 0x492   : > { %3392 = vmatpush1.msra.mxu1 %v2630_v40  ;;  %3322 = vmatprep.subr.mxu0 %v2499_v20  ;;  %v2470_v23 = vld [vmem:[#allocation15 + $0x90] sm:$0xff]  ;;  %v2467_v39 = vld [vmem:[#allocation15 + $0x78] sm:$0xff] }
 0x493   : > { %3393 = vmatprep.subr.mxu1 %v2627_v38  ;;  %3323 = vmatpush1.msra.mxu0 %v2498_v27  ;;  %v2598_v35 = vld [vmem:[#allocation15 + $0x490] sm:$0xff]  ;;  %v2595_v54 = vld [vmem:[#allocation15 + $0x478] sm:$0xff] }
 0x494   : > { %3394 = vmatpush1.msra.mxu1 %v2626_v34  ;;  %3324 = vmatprep.subr.mxu0 %v2495_v4  ;;  %v2466_v13 = vld [vmem:[#allocation15 + $0x70] sm:$0xff]  ;;  %v2463_v5 = vld [vmem:[#allocation15 + $0x58] sm:$0xff] }
 0x495   : > { %3395 = vmatprep.subr.mxu1 %v2623_v43  ;;  %3325 = vmatpush1.msra.mxu0 %v2494_v21  ;;  %v2594_v49 = vld [vmem:[#allocation15 + $0x470] sm:$0xff]  ;;  %v2591_v14 = vld [vmem:[#allocation15 + $0x458] sm:$0xff] }
 0x496   : > { %3396 = vmatpush1.msra.mxu1 %v2622_v46  ;;  %3326 = vmatprep.subr.mxu0 %v2491_v42  ;;  %v2462_v55 = vld [vmem:[#allocation15 + $0x50] sm:$0xff]  ;;  %v2459_v32 = vld [vmem:[#allocation15 + $0x38] sm:$0xff] }
 0x497   : > { %3397 = vmatprep.subr.mxu1 %v2619_v0  ;;  %3327 = vmatpush1.msra.mxu0 %v2490_v37  ;;  %v2590_v17 = vld [vmem:[#allocation15 + $0x450] sm:$0xff]  ;;  %v2587_v48 = vld [vmem:[#allocation15 + $0x438] sm:$0xff] }
 0x498   : > { %3398 = vmatpush1.msra.mxu1 %v2618_v24  ;;  %3328 = vmatprep.subr.mxu0 %v2487_v51  ;;  %v2458_v56 = vld [vmem:[#allocation15 + $0x30] sm:$0xff]  ;;  %v2455_v18 = vld [vmem:[#allocation15 + $0x18] sm:$0xff] }
 0x499   : > { %3399 = vmatprep.subr.mxu1 %v2615_v33  ;;  %3329 = vmatpush1.msra.mxu0 %v2486_v22  ;;  %v2586_v11 = vld [vmem:[#allocation15 + $0x430] sm:$0xff]  ;;  %v2583_v25 = vld [vmem:[#allocation15 + $0x418] sm:$0xff] }
 0x49a   : > { %3400 = vmatpush1.msra.mxu1 %v2614_v58  ;;  %3330 = vmatprep.subr.mxu0 %v2483_v19  ;;  %v2454_v28 = vld [vmem:[#allocation15 + $0x10] sm:$0xff]  ;;  %v2579_v7 = vld [vmem:[#allocation15 + $0x3f8] sm:$0xff] }
 0x49b   : > { %3401 = vmatprep.subr.mxu1 %v2611_v59  ;;  %3331 = vmatpush1.msra.mxu0 %v2482_v63  ;;  %v2582_v52 = vld [vmem:[#allocation15 + $0x410] sm:$0xff]  ;;  %v2707_v15 = vld [vmem:[#allocation15 + $0x7f8] sm:$0xff] }
 0x49c   : > { %3402 = vmatpush1.msra.mxu1 %v2610_v1  ;;  %3332 = vmatprep.subr.mxu0 %v2479_v2  ;;  %v2578_v40 = vld [vmem:[#allocation15 + $0x3f0] sm:$0xff]  ;;  %v2575_v38 = vld [vmem:[#allocation15 + $0x3d8] sm:$0xff] }
 0x49d   : > { %3403 = vmatprep.subr.mxu1 %v2607_v8  ;;  %3333 = vmatpush1.msra.mxu0 %v2478_v26  ;;  %v2706_v20 = vld [vmem:[#allocation15 + $0x7f0] sm:$0xff]  ;;  %v2703_v27 = vld [vmem:[#allocation15 + $0x7d8] sm:$0xff] }
 0x49e   : > { %3404 = vmatpush1.msra.mxu1 %v2606_v50  ;;  %3334 = vmatprep.subr.mxu0 %v2475_v9  ;;  %v2574_v34 = vld [vmem:[#allocation15 + $0x3d0] sm:$0xff]  ;;  %v2571_v43 = vld [vmem:[#allocation15 + $0x3b8] sm:$0xff] }
 0x49f   : > { %3405 = vmatprep.subr.mxu1 %v2603_v10  ;;  %3335 = vmatpush1.msra.mxu0 %v2474_v47  ;;  %v2702_v4 = vld [vmem:[#allocation15 + $0x7d0] sm:$0xff]  ;;  %v2699_v21 = vld [vmem:[#allocation15 + $0x7b8] sm:$0xff] }
 0x4a0   : > { %3406 = vmatpush1.msra.mxu1 %v2602_v12  ;;  %3336 = vmatprep.subr.mxu0 %v2471_v16  ;;  %v2570_v46 = vld [vmem:[#allocation15 + $0x3b0] sm:$0xff]  ;;  %v2567_v0 = vld [vmem:[#allocation15 + $0x398] sm:$0xff] }
 0x4a1   : > { %3407 = vmatprep.subr.mxu1 %v2599_v44  ;;  %3337 = vmatpush1.msra.mxu0 %v2470_v23  ;;  %v2698_v42 = vld [vmem:[#allocation15 + $0x7b0] sm:$0xff]  ;;  %v2695_v37 = vld [vmem:[#allocation15 + $0x798] sm:$0xff] }
 0x4a2   : > { %3408 = vmatpush1.msra.mxu1 %v2598_v35  ;;  %3338 = vmatprep.subr.mxu0 %v2467_v39  ;;  %v2566_v24 = vld [vmem:[#allocation15 + $0x390] sm:$0xff]  ;;  %v2563_v33 = vld [vmem:[#allocation15 + $0x378] sm:$0xff] }
 0x4a3   : > { %3409 = vmatprep.subr.mxu1 %v2595_v54  ;;  %3339 = vmatpush1.msra.mxu0 %v2466_v13  ;;  %v2694_v51 = vld [vmem:[#allocation15 + $0x790] sm:$0xff]  ;;  %v2691_v22 = vld [vmem:[#allocation15 + $0x778] sm:$0xff] }
 0x4a4   : > { %3410 = vmatpush1.msra.mxu1 %v2594_v49  ;;  %3340 = vmatprep.subr.mxu0 %v2463_v5  ;;  %v2562_v58 = vld [vmem:[#allocation15 + $0x370] sm:$0xff]  ;;  %v2559_v59 = vld [vmem:[#allocation15 + $0x358] sm:$0xff] }
 0x4a5   : > { %3411 = vmatprep.subr.mxu1 %v2591_v14  ;;  %3341 = vmatpush1.msra.mxu0 %v2462_v55  ;;  %v2690_v19 = vld [vmem:[#allocation15 + $0x770] sm:$0xff]  ;;  %v2687_v63 = vld [vmem:[#allocation15 + $0x758] sm:$0xff] }
 0x4a6   : > { %3412 = vmatpush1.msra.mxu1 %v2590_v17  ;;  %3342 = vmatprep.subr.mxu0 %v2459_v32  ;;  %v2558_v1 = vld [vmem:[#allocation15 + $0x350] sm:$0xff]  ;;  %v2555_v8 = vld [vmem:[#allocation15 + $0x338] sm:$0xff] }
 0x4a7   : > { %3413 = vmatprep.subr.mxu1 %v2587_v48  ;;  %3343 = vmatpush1.msra.mxu0 %v2458_v56  ;;  %v2686_v2 = vld [vmem:[#allocation15 + $0x750] sm:$0xff]  ;;  %v2683_v26 = vld [vmem:[#allocation15 + $0x738] sm:$0xff] }
 0x4a8   : > { %3414 = vmatpush1.msra.mxu1 %v2586_v11  ;;  %3344 = vmatprep.subr.mxu0 %v2455_v18  ;;  %v2554_v50 = vld [vmem:[#allocation15 + $0x330] sm:$0xff]  ;;  %v2551_v10 = vld [vmem:[#allocation15 + $0x318] sm:$0xff] }
 0x4a9   : > { %3415 = vmatprep.subr.mxu1 %v2583_v25  ;;  %3345 = vmatpush1.msra.mxu0 %v2454_v28  ;;  %v2682_v9 = vld [vmem:[#allocation15 + $0x730] sm:$0xff]  ;;  %v2679_v47 = vld [vmem:[#allocation15 + $0x718] sm:$0xff] }
 0x4aa   : > { %3416 = vmatpush1.msra.mxu1 %v2582_v52  ;;  %3346 = vmatprep.subr.mxu0 %v2579_v7  ;;  %v2550_v12 = vld [vmem:[#allocation15 + $0x310] sm:$0xff]  ;;  %v2547_v44 = vld [vmem:[#allocation15 + $0x2f8] sm:$0xff] }
 0x4ab   : > { %3417 = vmatprep.subr.mxu1 %v2707_v15  ;;  %3347 = vmatpush2.msra.mxu0 %v2578_v40  ;;  %v2678_v16 = vld [vmem:[#allocation15 + $0x710] sm:$0xff]  ;;  %v2675_v23 = vld [vmem:[#allocation15 + $0x6f8] sm:$0xff] }
 0x4ac   : > { %3418 = vmatpush2.msra.mxu1 %v2706_v20  ;;  %3348 = vmatprep.subr.mxu0 %v2575_v38  ;;  %v2546_v35 = vld [vmem:[#allocation15 + $0x2f0] sm:$0xff]  ;;  %v2543_v54 = vld [vmem:[#allocation15 + $0x2d8] sm:$0xff] }
 0x4ad   : > { %3419 = vmatprep.subr.mxu1 %v2703_v27  ;;  %3349 = vmatpush2.msra.mxu0 %v2574_v34  ;;  %v2674_v39 = vld [vmem:[#allocation15 + $0x6f0] sm:$0xff]  ;;  %v2671_v13 = vld [vmem:[#allocation15 + $0x6d8] sm:$0xff] }
 0x4ae   : > { %3420 = vmatpush2.msra.mxu1 %v2702_v4  ;;  %3350 = vmatprep.subr.mxu0 %v2571_v43  ;;  %v2542_v49 = vld [vmem:[#allocation15 + $0x2d0] sm:$0xff]  ;;  %v2539_v14 = vld [vmem:[#allocation15 + $0x2b8] sm:$0xff] }
 0x4af   : > { %3421 = vmatprep.subr.mxu1 %v2699_v21  ;;  %3351 = vmatpush2.msra.mxu0 %v2570_v46  ;;  %v2670_v5 = vld [vmem:[#allocation15 + $0x6d0] sm:$0xff]  ;;  %v2667_v55 = vld [vmem:[#allocation15 + $0x6b8] sm:$0xff] }
 0x4b0   : > { %3422 = vmatpush2.msra.mxu1 %v2698_v42  ;;  %3352 = vmatprep.subr.mxu0 %v2567_v0  ;;  %v2538_v17 = vld [vmem:[#allocation15 + $0x2b0] sm:$0xff]  ;;  %v2535_v48 = vld [vmem:[#allocation15 + $0x298] sm:$0xff] }
 0x4b1   : > { %3423 = vmatprep.subr.mxu1 %v2695_v37  ;;  %3353 = vmatpush2.msra.mxu0 %v2566_v24  ;;  %v2666_v32 = vld [vmem:[#allocation15 + $0x6b0] sm:$0xff]  ;;  %v2663_v56 = vld [vmem:[#allocation15 + $0x698] sm:$0xff] }
 0x4b2   : > { %3424 = vmatpush2.msra.mxu1 %v2694_v51  ;;  %3354 = vmatprep.subr.mxu0 %v2563_v33  ;;  %v2534_v11 = vld [vmem:[#allocation15 + $0x290] sm:$0xff]  ;;  %v2531_v25 = vld [vmem:[#allocation15 + $0x278] sm:$0xff] }
 0x4b3   : > { %3425 = vmatprep.subr.mxu1 %v2691_v22  ;;  %3355 = vmatpush2.msra.mxu0 %v2562_v58  ;;  %v2662_v18 = vld [vmem:[#allocation15 + $0x690] sm:$0xff]  ;;  %v2659_v28 = vld [vmem:[#allocation15 + $0x678] sm:$0xff] }
 0x4b4   : > { %3426 = vmatpush2.msra.mxu1 %v2690_v19  ;;  %3356 = vmatprep.subr.mxu0 %v2559_v59  ;;  %v2530_v52 = vld [vmem:[#allocation15 + $0x270] sm:$0xff]  ;;  %v2527_v15 = vld [vmem:[#allocation15 + $0x258] sm:$0xff] }
 0x4b5   : > { %3427 = vmatprep.subr.mxu1 %v2687_v63  ;;  %3357 = vmatpush2.msra.mxu0 %v2558_v1  ;;  %v2658_v7 = vld [vmem:[#allocation15 + $0x670] sm:$0xff]  ;;  %v2655_v40 = vld [vmem:[#allocation15 + $0x658] sm:$0xff] }
 0x4b6   : > { %3428 = vmatpush2.msra.mxu1 %v2686_v2  ;;  %3358 = vmatprep.subr.mxu0 %v2555_v8  ;;  %v2526_v20 = vld [vmem:[#allocation15 + $0x250] sm:$0xff]  ;;  %v2523_v27 = vld [vmem:[#allocation15 + $0x238] sm:$0xff] }
 0x4b7   : > { %3429 = vmatprep.subr.mxu1 %v2683_v26  ;;  %3359 = vmatpush2.msra.mxu0 %v2554_v50  ;;  %v2654_v38 = vld [vmem:[#allocation15 + $0x650] sm:$0xff]  ;;  %v2651_v34 = vld [vmem:[#allocation15 + $0x638] sm:$0xff] }
 0x4b8   : > { %3430 = vmatpush2.msra.mxu1 %v2682_v9  ;;  %3360 = vmatprep.subr.mxu0 %v2551_v10  ;;  %v2522_v4 = vld [vmem:[#allocation15 + $0x230] sm:$0xff]  ;;  %v2519_v21 = vld [vmem:[#allocation15 + $0x218] sm:$0xff] }
 0x4b9   : > { %3431 = vmatprep.subr.mxu1 %v2679_v47  ;;  %3361 = vmatpush2.msra.mxu0 %v2550_v12  ;;  %v2650_v43 = vld [vmem:[#allocation15 + $0x630] sm:$0xff]  ;;  %v2647_v46 = vld [vmem:[#allocation15 + $0x618] sm:$0xff] }
 0x4ba   : > { %3432 = vmatpush2.msra.mxu1 %v2678_v16  ;;  %3362 = vmatprep.subr.mxu0 %v2547_v44  ;;  %v2518_v42 = vld [vmem:[#allocation15 + $0x210] sm:$0xff]  ;;  %v2771_v37 = vld [vmem:[#allocation15 + $0x9f8] sm:$0xff] }
 0x4bb   : > { %3433 = vmatprep.subr.mxu1 %v2675_v23  ;;  %3363 = vmatpush2.msra.mxu0 %v2546_v35  ;;  %v2646_v0 = vld [vmem:[#allocation15 + $0x610] sm:$0xff]  ;;  %v2899_v24 = vld [vmem:[#allocation15 + $0xdf8] sm:$0xff] }
 0x4bc   : > { %3434 = vmatpush2.msra.mxu1 %v2674_v39  ;;  %3364 = vmatprep.subr.mxu0 %v2543_v54  ;;  %v2770_v51 = vld [vmem:[#allocation15 + $0x9f0] sm:$0xff]  ;;  %v2767_v22 = vld [vmem:[#allocation15 + $0x9d8] sm:$0xff] }
 0x4bd   : > { %3435 = vmatprep.subr.mxu1 %v2671_v13  ;;  %3365 = vmatpush2.msra.mxu0 %v2542_v49  ;;  %v2898_v33 = vld [vmem:[#allocation15 + $0xdf0] sm:$0xff]  ;;  %v2895_v58 = vld [vmem:[#allocation15 + $0xdd8] sm:$0xff] }
 0x4be   : > { %3436 = vmatpush2.msra.mxu1 %v2670_v5  ;;  %3366 = vmatprep.subr.mxu0 %v2539_v14  ;;  %v2766_v19 = vld [vmem:[#allocation15 + $0x9d0] sm:$0xff]  ;;  %v2763_v63 = vld [vmem:[#allocation15 + $0x9b8] sm:$0xff] }
 0x4bf   : > { %3437 = vmatprep.subr.mxu1 %v2667_v55  ;;  %3367 = vmatpush2.msra.mxu0 %v2538_v17  ;;  %v2894_v59 = vld [vmem:[#allocation15 + $0xdd0] sm:$0xff]  ;;  %v2759_v2 = vld [vmem:[#allocation15 + $0x998] sm:$0xff] }
 0x4c0   : > { %3438 = vmatpush2.msra.mxu1 %v2666_v32  ;;  %3368 = vmatprep.subr.mxu0 %v2535_v48  ;;  %v2762_v1 = vld [vmem:[#allocation15 + $0x9b0] sm:$0xff]  ;;  %v2883_v50 = vld [vmem:[#allocation15 + $0xd78] sm:$0xff] }
 0x4c1   : > { %3439 = vmatprep.subr.mxu1 %v2663_v56  ;;  %3369 = vmatpush2.msra.mxu0 %v2534_v11  ;;  %v2758_v8 = vld [vmem:[#allocation15 + $0x990] sm:$0xff]  ;;  %v2751_v47 = vld [vmem:[#allocation15 + $0x958] sm:$0xff] }
 0x4c2   : > { %3440 = vmatpush2.msra.mxu1 %v2662_v18  ;;  %3370 = vmatprep.subr.mxu0 %v2531_v25  ;;  %v2886_v26 = vld [vmem:[#allocation15 + $0xd90] sm:$0xff]  ;;  %v2879_v12 = vld [vmem:[#allocation15 + $0xd58] sm:$0xff] }
 0x4c3   : > { %3441 = vmatprep.subr.mxu1 %v2659_v28  ;;  %3371 = vmatpush2.msra.mxu0 %v2530_v52  ;;  %v2754_v9 = vld [vmem:[#allocation15 + $0x970] sm:$0xff]  ;;  %v2747_v23 = vld [vmem:[#allocation15 + $0x938] sm:$0xff] }
 0x4c4   : > { %3442 = vmatpush2.msra.mxu1 %v2658_v7  ;;  %3372 = vmatprep.subr.mxu0 %v2527_v15  ;;  %v2882_v10 = vld [vmem:[#allocation15 + $0xd70] sm:$0xff]  ;;  %v2875_v35 = vld [vmem:[#allocation15 + $0xd38] sm:$0xff] }
 0x4c5   : > { %3443 = vmatprep.subr.mxu1 %v2655_v40  ;;  %3373 = vmatpush2.msra.mxu0 %v2526_v20  ;;  %v2750_v16 = vld [vmem:[#allocation15 + $0x950] sm:$0xff]  ;;  %v2743_v13 = vld [vmem:[#allocation15 + $0x918] sm:$0xff] }
 0x4c6   : > { %3444 = vmatpush2.msra.mxu1 %v2654_v38  ;;  %3374 = vmatprep.subr.mxu0 %v2523_v27  ;;  %v2878_v44 = vld [vmem:[#allocation15 + $0xd50] sm:$0xff]  ;;  %v2871_v49 = vld [vmem:[#allocation15 + $0xd18] sm:$0xff] }
 0x4c7   : > { %3445 = vmatprep.subr.mxu1 %v2651_v34  ;;  %3375 = vmatpush2.msra.mxu0 %v2522_v4  ;;  %v2746_v39 = vld [vmem:[#allocation15 + $0x930] sm:$0xff]  ;;  %v2739_v55 = vld [vmem:[#allocation15 + $0x8f8] sm:$0xff] }
 0x4c8   : > { %3446 = vmatpush2.msra.mxu1 %v2650_v43  ;;  %3376 = vmatprep.subr.mxu0 %v2519_v21  ;;  %v2874_v54 = vld [vmem:[#allocation15 + $0xd30] sm:$0xff]  ;;  %v2867_v17 = vld [vmem:[#allocation15 + $0xcf8] sm:$0xff] }
 0x4c9   : > { %3447 = vmatprep.subr.mxu1 %v2647_v46  ;;  %3377 = vmatpush2.msra.mxu0 %v2518_v42  ;;  %v2742_v5 = vld [vmem:[#allocation15 + $0x910] sm:$0xff]  ;;  %v2735_v56 = vld [vmem:[#allocation15 + $0x8d8] sm:$0xff] }
 0x4ca   : > { %3378 = vmatprep.mubr.f32.mxu0 %v6158_v29  ;;  %3448 = vmatpush2.msra.mxu1 %v2646_v0  ;;  %v2891_v29 = vld [vmem:[#allocation15 + $0xdb8] sm:$0xff]  ;;  %v2870_v14 = vld [vmem:[#allocation15 + $0xd10] sm:$0xff] }
 0x4cb   : > { %3379 = vmatmul.mubr.f32.vlgmr.msra.gmra.mxu0 %v6151_v30  ;;  %3449 = vmatprep.mubr.f32.mxu1 %v6162_v57  ;;  %v2890_v30 = vld [vmem:[#allocation15 + $0xdb0] sm:$0xff]  ;;  %v2887_v57 = vld [vmem:[#allocation15 + $0xd98] sm:$0xff] }
 0x4cc   : > { %3456 = vmatprep.subr.mxu0 %v2771_v37  ;;  %3527 = vmatprep.subr.mxu1 %v2899_v24  ;;  %v2738_v32 = vld [vmem:[#allocation15 + $0x8f0] sm:$0xff]  ;;  %v2863_v11 = vld [vmem:[#allocation15 + $0xcd8] sm:$0xff] }
 0x4cd   : > { %3450 = vmatmul.mubr.f32.vlgmr.msra.gmra.mxu1 %v6154_v60  ;;  %3457 = vmatpush1.msra.mxu0 %v2770_v51  ;;  %v2755_v60 = vld [vmem:[#allocation15 + $0x978] sm:$0xff]  ;;  %v2866_v48 = vld [vmem:[#allocation15 + $0xcf0] sm:$0xff] }
 0x4ce   : > { %3528 = vmatpush1.msra.mxu1 %v2898_v33  ;;  %3458 = vmatprep.subr.mxu0 %v2767_v22  ;;  %v2734_v18 = vld [vmem:[#allocation15 + $0x8d0] sm:$0xff]  ;;  %v2731_v28 = vld [vmem:[#allocation15 + $0x8b8] sm:$0xff] }
 0x4cf   : > { %3529 = vmatprep.subr.mxu1 %v2895_v58  ;;  %3459 = vmatpush1.msra.mxu0 %v2766_v19  ;;  %v2862_v25 = vld [vmem:[#allocation15 + $0xcd0] sm:$0xff]  ;;  %v2859_v52 = vld [vmem:[#allocation15 + $0xcb8] sm:$0xff] }
 0x4d0   : > { %3530 = vmatpush1.msra.mxu1 %v2894_v59  ;;  %3460 = vmatprep.subr.mxu0 %v2763_v63  ;;  %v2730_v7 = vld [vmem:[#allocation15 + $0x8b0] sm:$0xff]  ;;  %v2727_v40 = vld [vmem:[#allocation15 + $0x898] sm:$0xff] }
 0x4d1   : > { %3531 = vmatprep.subr.mxu1 %v2891_v29  ;;  %3461 = vmatpush1.msra.mxu0 %v2762_v1  ;;  %v2858_v15 = vld [vmem:[#allocation15 + $0xcb0] sm:$0xff]  ;;  %v2855_v20 = vld [vmem:[#allocation15 + $0xc98] sm:$0xff] }
 0x4d2   : > { %3532 = vmatpush1.msra.mxu1 %v2890_v30  ;;  %3462 = vmatprep.subr.mxu0 %v2759_v2  ;;  %v2726_v38 = vld [vmem:[#allocation15 + $0x890] sm:$0xff]  ;;  %v2723_v34 = vld [vmem:[#allocation15 + $0x878] sm:$0xff] }
 0x4d3   : > { %3533 = vmatprep.subr.mxu1 %v2887_v57  ;;  %3463 = vmatpush1.msra.mxu0 %v2758_v8  ;;  %v2854_v27 = vld [vmem:[#allocation15 + $0xc90] sm:$0xff]  ;;  %v2851_v4 = vld [vmem:[#allocation15 + $0xc78] sm:$0xff] }
 0x4d4   : > { %3534 = vmatpush1.msra.mxu1 %v2886_v26  ;;  %3464 = vmatprep.subr.mxu0 %v2755_v60  ;;  %v2722_v43 = vld [vmem:[#allocation15 + $0x870] sm:$0xff]  ;;  %v2719_v46 = vld [vmem:[#allocation15 + $0x858] sm:$0xff] }
 0x4d5   : > { %3535 = vmatprep.subr.mxu1 %v2883_v50  ;;  %3465 = vmatpush1.msra.mxu0 %v2754_v9  ;;  %v2850_v21 = vld [vmem:[#allocation15 + $0xc70] sm:$0xff]  ;;  %v2847_v42 = vld [vmem:[#allocation15 + $0xc58] sm:$0xff] }
 0x4d6   : > { %3536 = vmatpush1.msra.mxu1 %v2882_v10  ;;  %3466 = vmatprep.subr.mxu0 %v2751_v47  ;;  %v2718_v0 = vld [vmem:[#allocation15 + $0x850] sm:$0xff]  ;;  %v2715_v24 = vld [vmem:[#allocation15 + $0x838] sm:$0xff] }
 0x4d7   : > { %3537 = vmatprep.subr.mxu1 %v2879_v12  ;;  %3467 = vmatpush1.msra.mxu0 %v2750_v16  ;;  %v2846_v37 = vld [vmem:[#allocation15 + $0xc50] sm:$0xff]  ;;  %v2843_v51 = vld [vmem:[#allocation15 + $0xc38] sm:$0xff] }
 0x4d8   : > { %3538 = vmatpush1.msra.mxu1 %v2878_v44  ;;  %3468 = vmatprep.subr.mxu0 %v2747_v23  ;;  %v2714_v33 = vld [vmem:[#allocation15 + $0x830] sm:$0xff]  ;;  %v2711_v58 = vld [vmem:[#allocation15 + $0x818] sm:$0xff] }
 0x4d9   : > { %3539 = vmatprep.subr.mxu1 %v2875_v35  ;;  %3469 = vmatpush1.msra.mxu0 %v2746_v39  ;;  %v2842_v22 = vld [vmem:[#allocation15 + $0xc30] sm:$0xff]  ;;  %v2839_v19 = vld [vmem:[#allocation15 + $0xc18] sm:$0xff] }
 0x4da   : > { %3540 = vmatpush1.msra.mxu1 %v2874_v54  ;;  %3470 = vmatprep.subr.mxu0 %v2743_v13  ;;  %v2710_v59 = vld [vmem:[#allocation15 + $0x810] sm:$0xff]  ;;  %v2835_v29 = vld [vmem:[#allocation15 + $0xbf8] sm:$0xff] }
 0x4db   : > { %3541 = vmatprep.subr.mxu1 %v2871_v49  ;;  %3471 = vmatpush1.msra.mxu0 %v2742_v5  ;;  %v2838_v63 = vld [vmem:[#allocation15 + $0xc10] sm:$0xff]  ;;  %v2963_v1 = vld [vmem:[#allocation15 + $0xff8] sm:$0xff] }
 0x4dc   : > { %3542 = vmatpush1.msra.mxu1 %v2870_v14  ;;  %3472 = vmatprep.subr.mxu0 %v2739_v55  ;;  %v2834_v30 = vld [vmem:[#allocation15 + $0xbf0] sm:$0xff]  ;;  %v2831_v57 = vld [vmem:[#allocation15 + $0xbd8] sm:$0xff] }
 0x4dd   : > { %3543 = vmatprep.subr.mxu1 %v2867_v17  ;;  %3473 = vmatpush1.msra.mxu0 %v2738_v32  ;;  %v2962_v2 = vld [vmem:[#allocation15 + $0xff0] sm:$0xff]  ;;  %v2959_v8 = vld [vmem:[#allocation15 + $0xfd8] sm:$0xff] }
 0x4de   : > { %3544 = vmatpush1.msra.mxu1 %v2866_v48  ;;  %3474 = vmatprep.subr.mxu0 %v2735_v56  ;;  %v2830_v26 = vld [vmem:[#allocation15 + $0xbd0] sm:$0xff]  ;;  %v2827_v50 = vld [vmem:[#allocation15 + $0xbb8] sm:$0xff] }
 0x4df   : > { %3545 = vmatprep.subr.mxu1 %v2863_v11  ;;  %3475 = vmatpush1.msra.mxu0 %v2734_v18  ;;  %v2958_v60 = vld [vmem:[#allocation15 + $0xfd0] sm:$0xff]  ;;  %v2955_v9 = vld [vmem:[#allocation15 + $0xfb8] sm:$0xff] }
 0x4e0   : > { %3546 = vmatpush1.msra.mxu1 %v2862_v25  ;;  %3476 = vmatprep.subr.mxu0 %v2731_v28  ;;  %v2826_v10 = vld [vmem:[#allocation15 + $0xbb0] sm:$0xff]  ;;  %v2823_v12 = vld [vmem:[#allocation15 + $0xb98] sm:$0xff] }
 0x4e1   : > { %3547 = vmatprep.subr.mxu1 %v2859_v52  ;;  %3477 = vmatpush1.msra.mxu0 %v2730_v7  ;;  %v2954_v47 = vld [vmem:[#allocation15 + $0xfb0] sm:$0xff]  ;;  %v2951_v16 = vld [vmem:[#allocation15 + $0xf98] sm:$0xff] }
 0x4e2   : > { %3548 = vmatpush1.msra.mxu1 %v2858_v15  ;;  %3478 = vmatprep.subr.mxu0 %v2727_v40  ;;  %v2822_v44 = vld [vmem:[#allocation15 + $0xb90] sm:$0xff]  ;;  %v2819_v35 = vld [vmem:[#allocation15 + $0xb78] sm:$0xff] }
 0x4e3   : > { %3549 = vmatprep.subr.mxu1 %v2855_v20  ;;  %3479 = vmatpush1.msra.mxu0 %v2726_v38  ;;  %v2950_v23 = vld [vmem:[#allocation15 + $0xf90] sm:$0xff]  ;;  %v2947_v39 = vld [vmem:[#allocation15 + $0xf78] sm:$0xff] }
 0x4e4   : > { %3550 = vmatpush1.msra.mxu1 %v2854_v27  ;;  %3480 = vmatprep.subr.mxu0 %v2723_v34  ;;  %v2818_v54 = vld [vmem:[#allocation15 + $0xb70] sm:$0xff]  ;;  %v2815_v49 = vld [vmem:[#allocation15 + $0xb58] sm:$0xff] }
 0x4e5   : > { %3551 = vmatprep.subr.mxu1 %v2851_v4  ;;  %3481 = vmatpush1.msra.mxu0 %v2722_v43  ;;  %v2946_v13 = vld [vmem:[#allocation15 + $0xf70] sm:$0xff]  ;;  %v2943_v5 = vld [vmem:[#allocation15 + $0xf58] sm:$0xff] }
 0x4e6   : > { %3552 = vmatpush1.msra.mxu1 %v2850_v21  ;;  %3482 = vmatprep.subr.mxu0 %v2719_v46  ;;  %v2814_v14 = vld [vmem:[#allocation15 + $0xb50] sm:$0xff]  ;;  %v2811_v17 = vld [vmem:[#allocation15 + $0xb38] sm:$0xff] }
 0x4e7   : > { %3553 = vmatprep.subr.mxu1 %v2847_v42  ;;  %3483 = vmatpush1.msra.mxu0 %v2718_v0  ;;  %v2942_v55 = vld [vmem:[#allocation15 + $0xf50] sm:$0xff]  ;;  %v2939_v32 = vld [vmem:[#allocation15 + $0xf38] sm:$0xff] }
 0x4e8   : > { %3554 = vmatpush1.msra.mxu1 %v2846_v37  ;;  %3484 = vmatprep.subr.mxu0 %v2715_v24  ;;  %v2810_v48 = vld [vmem:[#allocation15 + $0xb30] sm:$0xff]  ;;  %v2807_v11 = vld [vmem:[#allocation15 + $0xb18] sm:$0xff] }
 0x4e9   : > { %3555 = vmatprep.subr.mxu1 %v2843_v51  ;;  %3485 = vmatpush1.msra.mxu0 %v2714_v33  ;;  %v2938_v56 = vld [vmem:[#allocation15 + $0xf30] sm:$0xff]  ;;  %v2935_v18 = vld [vmem:[#allocation15 + $0xf18] sm:$0xff] }
 0x4ea   : > { %3556 = vmatpush1.msra.mxu1 %v2842_v22  ;;  %3486 = vmatprep.subr.mxu0 %v2711_v58  ;;  %v2806_v25 = vld [vmem:[#allocation15 + $0xb10] sm:$0xff]  ;;  %v2803_v52 = vld [vmem:[#allocation15 + $0xaf8] sm:$0xff] }
 0x4eb   : > { %3557 = vmatprep.subr.mxu1 %v2839_v19  ;;  %3487 = vmatpush1.msra.mxu0 %v2710_v59  ;;  %v2934_v28 = vld [vmem:[#allocation15 + $0xf10] sm:$0xff]  ;;  %v2931_v7 = vld [vmem:[#allocation15 + $0xef8] sm:$0xff] }
 0x4ec   : > { %3558 = vmatpush1.msra.mxu1 %v2838_v63  ;;  %3488 = vmatprep.subr.mxu0 %v2835_v29  ;;  %v2802_v15 = vld [vmem:[#allocation15 + $0xaf0] sm:$0xff]  ;;  %v2799_v20 = vld [vmem:[#allocation15 + $0xad8] sm:$0xff] }
 0x4ed   : > { %3559 = vmatprep.subr.mxu1 %v2963_v1  ;;  %3489 = vmatpush2.msra.mxu0 %v2834_v30  ;;  %v2930_v40 = vld [vmem:[#allocation15 + $0xef0] sm:$0xff]  ;;  %v2927_v38 = vld [vmem:[#allocation15 + $0xed8] sm:$0xff] }
 0x4ee   : > { %3560 = vmatpush2.msra.mxu1 %v2962_v2  ;;  %3490 = vmatprep.subr.mxu0 %v2831_v57  ;;  %v2798_v27 = vld [vmem:[#allocation15 + $0xad0] sm:$0xff]  ;;  %v2795_v4 = vld [vmem:[#allocation15 + $0xab8] sm:$0xff] }
 0x4ef   : > { %3561 = vmatprep.subr.mxu1 %v2959_v8  ;;  %3491 = vmatpush2.msra.mxu0 %v2830_v26  ;;  %v2926_v34 = vld [vmem:[#allocation15 + $0xed0] sm:$0xff]  ;;  %v2923_v43 = vld [vmem:[#allocation15 + $0xeb8] sm:$0xff] }
 0x4f0   : > { %3562 = vmatpush2.msra.mxu1 %v2958_v60  ;;  %3492 = vmatprep.subr.mxu0 %v2827_v50  ;;  %v2794_v21 = vld [vmem:[#allocation15 + $0xab0] sm:$0xff]  ;;  %v2791_v42 = vld [vmem:[#allocation15 + $0xa98] sm:$0xff] }
 0x4f1   : > { %3563 = vmatprep.subr.mxu1 %v2955_v9  ;;  %3493 = vmatpush2.msra.mxu0 %v2826_v10  ;;  %v2922_v46 = vld [vmem:[#allocation15 + $0xeb0] sm:$0xff]  ;;  %v2919_v0 = vld [vmem:[#allocation15 + $0xe98] sm:$0xff] }
 0x4f2   : > { %3564 = vmatpush2.msra.mxu1 %v2954_v47  ;;  %3494 = vmatprep.subr.mxu0 %v2823_v12  ;;  %v2790_v37 = vld [vmem:[#allocation15 + $0xa90] sm:$0xff]  ;;  %v2787_v51 = vld [vmem:[#allocation15 + $0xa78] sm:$0xff]  ;;  %v3630_v12 = vld [vmem:[#allocation18 + $0xe0] sm:$0xff] }
 0x4f3   : > { %3565 = vmatprep.subr.mxu1 %v2951_v16  ;;  %3495 = vmatpush2.msra.mxu0 %v2822_v44  ;;  %v2918_v24 = vld [vmem:[#allocation15 + $0xe90] sm:$0xff]  ;;  %v2915_v33 = vld [vmem:[#allocation15 + $0xe78] sm:$0xff] }
 0x4f4   : > { %3566 = vmatpush2.msra.mxu1 %v2950_v23  ;;  %3496 = vmatprep.subr.mxu0 %v2819_v35  ;;  %v2786_v22 = vld [vmem:[#allocation15 + $0xa70] sm:$0xff]  ;;  %v2783_v19 = vld [vmem:[#allocation15 + $0xa58] sm:$0xff] }
 0x4f5   : > { %3567 = vmatprep.subr.mxu1 %v2947_v39  ;;  %3497 = vmatpush2.msra.mxu0 %v2818_v54  ;;  %v2914_v58 = vld [vmem:[#allocation15 + $0xe70] sm:$0xff]  ;;  %v2911_v59 = vld [vmem:[#allocation15 + $0xe58] sm:$0xff] }
 0x4f6   : > { %3568 = vmatpush2.msra.mxu1 %v2946_v13  ;;  %3498 = vmatprep.subr.mxu0 %v2815_v49  ;;  %v2782_v63 = vld [vmem:[#allocation15 + $0xa50] sm:$0xff]  ;;  %v2779_v1 = vld [vmem:[#allocation15 + $0xa38] sm:$0xff] }
 0x4f7   : > { %3569 = vmatprep.subr.mxu1 %v2943_v5  ;;  %3499 = vmatpush2.msra.mxu0 %v2814_v14  ;;  %v2910_v29 = vld [vmem:[#allocation15 + $0xe50] sm:$0xff]  ;;  %v2907_v30 = vld [vmem:[#allocation15 + $0xe38] sm:$0xff]  ;;  %v3690_v14 = vld [vmem:[#allocation18 + $0x2c0] sm:$0xff] }
 0x4f8   : > { %3570 = vmatpush2.msra.mxu1 %v2942_v55  ;;  %3500 = vmatprep.subr.mxu0 %v2811_v17  ;;  %v2778_v2 = vld [vmem:[#allocation15 + $0xa30] sm:$0xff]  ;;  %v2775_v8 = vld [vmem:[#allocation15 + $0xa18] sm:$0xff] }
 0x4f9   : > { %3571 = vmatprep.subr.mxu1 %v2939_v32  ;;  %3501 = vmatpush2.msra.mxu0 %v2810_v48  ;;  %v2906_v57 = vld [vmem:[#allocation15 + $0xe30] sm:$0xff]  ;;  %v2903_v26 = vld [vmem:[#allocation15 + $0xe18] sm:$0xff]  ;;  %v3622_v32 = vld [vmem:[#allocation18 + $0xa0] sm:$0xff] }
 0x4fa   : > { %3572 = vmatpush2.msra.mxu1 %v2938_v56  ;;  %3502 = vmatprep.subr.mxu0 %v2807_v11  ;;  %v2774_v60 = vld [vmem:[#allocation15 + $0xa10] sm:$0xff]  ;;  %v3633_v9 = vld [vmem:[#allocation18 + $0xf8] sm:$0xff] }
 0x4fb   : > { %3573 = vmatprep.subr.mxu1 %v2935_v18  ;;  %3503 = vmatpush2.msra.mxu0 %v2806_v25  ;;  %v2902_v50 = vld [vmem:[#allocation15 + $0xe10] sm:$0xff]  ;;  %v3629_v16 = vld [vmem:[#allocation18 + $0xd8] sm:$0xff]  ;;  %v3686_v25 = vld [vmem:[#allocation18 + $0x2a0] sm:$0xff] }
 0x4fc   : > { %3574 = vmatpush2.msra.mxu1 %v2934_v28  ;;  %3504 = vmatprep.subr.mxu0 %v2803_v52  ;;  %v3632_v10 = vld [vmem:[#allocation18 + $0xf0] sm:$0xff]  ;;  %v3631_v47 = vld [vmem:[#allocation18 + $0xe8] sm:$0xff]  ;;  %v3697_v44 = vld [vmem:[#allocation18 + $0x2f8] sm:$0xff] }
 0x4fd   : > { %3575 = vmatprep.subr.mxu1 %v2931_v7  ;;  %3505 = vmatpush2.msra.mxu0 %v2802_v15  ;;  %v3696_v23 = vld [vmem:[#allocation18 + $0x2f0] sm:$0xff]  ;;  %v3695_v35 = vld [vmem:[#allocation18 + $0x2e8] sm:$0xff]  ;;  %v3625_v13 = vld [vmem:[#allocation18 + $0xb8] sm:$0xff] }
 0x4fe   : > { %3576 = vmatpush2.msra.mxu1 %v2930_v40  ;;  %3506 = vmatprep.subr.mxu0 %v2799_v20  ;;  %v3628_v39 = vld [vmem:[#allocation18 + $0xd0] sm:$0xff]  ;;  %v3627_v54 = vld [vmem:[#allocation18 + $0xc8] sm:$0xff]  ;;  %v3689_v17 = vld [vmem:[#allocation18 + $0x2b8] sm:$0xff] }
 0x4ff   : > { %3577 = vmatprep.subr.mxu1 %v2927_v38  ;;  %3507 = vmatpush2.msra.mxu0 %v2798_v27  ;;  %v3691_v49 = vld [vmem:[#allocation18 + $0x2c8] sm:$0xff]  ;;  %v3624_v5 = vld [vmem:[#allocation18 + $0xb0] sm:$0xff]  ;;  %v3621_v56 = vld [vmem:[#allocation18 + $0x98] sm:$0xff] }
 0x500   : > { %3578 = vmatpush2.msra.mxu1 %v2926_v34  ;;  %3508 = vmatprep.subr.mxu0 %v2795_v4  ;;  %v3623_v55 = vld [vmem:[#allocation18 + $0xa8] sm:$0xff]  ;;  %v3688_v48 = vld [vmem:[#allocation18 + $0x2b0] sm:$0xff]  ;;  %v3685_v52 = vld [vmem:[#allocation18 + $0x298] sm:$0xff] }
 0x501   : > { %3579 = vmatprep.subr.mxu1 %v2923_v43  ;;  %3509 = vmatpush2.msra.mxu0 %v2794_v21  ;;  %v3687_v11 = vld [vmem:[#allocation18 + $0x2a8] sm:$0xff]  ;;  %v3620_v18 = vld [vmem:[#allocation18 + $0x90] sm:$0xff]  ;;  %v3618_v7 = vld [vmem:[#allocation18 + $0x80] sm:$0xff] }
 0x502   : > { %3580 = vmatpush2.msra.mxu1 %v2922_v46  ;;  %3510 = vmatprep.subr.mxu0 %v2791_v42  ;;  %v3619_v28 = vld [vmem:[#allocation18 + $0x88] sm:$0xff]  ;;  %v3684_v15 = vld [vmem:[#allocation18 + $0x290] sm:$0xff]  ;;  %v3617_v40 = vld [vmem:[#allocation18 + $0x78] sm:$0xff] }
 0x503   : > { %3581 = vmatprep.subr.mxu1 %v2919_v0  ;;  %3511 = vmatpush2.msra.mxu0 %v2790_v37  ;;  %v3683_v20 = vld [vmem:[#allocation18 + $0x288] sm:$0xff]  ;;  %v3616_v38 = vld [vmem:[#allocation18 + $0x70] sm:$0xff]  ;;  %v3682_v27 = vld [vmem:[#allocation18 + $0x280] sm:$0xff] }
 0x504   : > { %3582 = vmatpush2.msra.mxu1 %v2918_v24  ;;  %3512 = vmatprep.subr.mxu0 %v2787_v51  ;;  %v3615_v34 = vld [vmem:[#allocation18 + $0x68] sm:$0xff]  ;;  %v3681_v4 = vld [vmem:[#allocation18 + $0x278] sm:$0xff]  ;;  %v3614_v43 = vld [vmem:[#allocation18 + $0x60] sm:$0xff] }
 0x505   : > { %3583 = vmatprep.subr.mxu1 %v2915_v33  ;;  %3513 = vmatpush2.msra.mxu0 %v2786_v22  ;;  %v3680_v21 = vld [vmem:[#allocation18 + $0x270] sm:$0xff]  ;;  %v3613_v46 = vld [vmem:[#allocation18 + $0x58] sm:$0xff]  ;;  %v3679_v42 = vld [vmem:[#allocation18 + $0x268] sm:$0xff] }
 0x506   : > { %3584 = vmatpush2.msra.mxu1 %v2914_v58  ;;  %3514 = vmatprep.subr.mxu0 %v2783_v19  ;;  %v3612_v0 = vld [vmem:[#allocation18 + $0x50] sm:$0xff]  ;;  %v3678_v37 = vld [vmem:[#allocation18 + $0x260] sm:$0xff]  ;;  %v3611_v24 = vld [vmem:[#allocation18 + $0x48] sm:$0xff] }
 0x507   : > { %3585 = vmatprep.subr.mxu1 %v2911_v59  ;;  %3515 = vmatpush2.msra.mxu0 %v2782_v63  ;;  %v3677_v51 = vld [vmem:[#allocation18 + $0x258] sm:$0xff]  ;;  %v3610_v33 = vld [vmem:[#allocation18 + $0x40] sm:$0xff]  ;;  %v3676_v22 = vld [vmem:[#allocation18 + $0x250] sm:$0xff] }
 0x508   : > { %3586 = vmatpush2.msra.mxu1 %v2910_v29  ;;  %3516 = vmatprep.subr.mxu0 %v2779_v1  ;;  %v3609_v58 = vld [vmem:[#allocation18 + $0x38] sm:$0xff]  ;;  %v3675_v19 = vld [vmem:[#allocation18 + $0x248] sm:$0xff]  ;;  %v3608_v59 = vld [vmem:[#allocation18 + $0x30] sm:$0xff] }
 0x509   : > { %3587 = vmatprep.subr.mxu1 %v2907_v30  ;;  %3517 = vmatpush2.msra.mxu0 %v2778_v2  ;;  %v3674_v63 = vld [vmem:[#allocation18 + $0x240] sm:$0xff]  ;;  %v3607_v29 = vld [vmem:[#allocation18 + $0x28] sm:$0xff]  ;;  %v3673_v1 = vld [vmem:[#allocation18 + $0x238] sm:$0xff] }
 0x50a   : > { %3588 = vmatpush2.msra.mxu1 %v2906_v57  ;;  %3518 = vmatprep.subr.mxu0 %v2775_v8  ;;  %v3606_v30 = vld [vmem:[#allocation18 + $0x20] sm:$0xff]  ;;  %v3672_v2 = vld [vmem:[#allocation18 + $0x230] sm:$0xff]  ;;  %v3605_v57 = vld [vmem:[#allocation18 + $0x18] sm:$0xff] }
 0x50b   : > { %3589 = vmatprep.subr.mxu1 %v2903_v26  ;;  %3519 = vmatpush2.msra.mxu0 %v2774_v60  ;;  %v3671_v8 = vld [vmem:[#allocation18 + $0x228] sm:$0xff]  ;;  %v3604_v26 = vld [vmem:[#allocation18 + $0x10] sm:$0xff]  ;;  %v3670_v60 = vld [vmem:[#allocation18 + $0x220] sm:$0xff] }
 0x50c   : > { %3520 = vmatprep.mubr.f32.mxu0 %v6176_v31  ;;  %3590 = vmatpush2.msra.mxu1 %v2902_v50  ;;  %v3694_v31 = vld [vmem:[#allocation18 + $0x2e0] sm:$0xff]  ;;  %v3603_v50 = vld [vmem:[#allocation18 + $0x8] sm:$0xff] }
 0x50d   : > { %3591 = vmatprep.mubr.f32.mxu1 %v6180_v45  ;;  %3521 = vmatmul.mubr.f32.vlgmr.msra.gmra.mxu0 %v6169_v61  ;;  %v3693_v45 = vld [vmem:[#allocation18 + $0x2d8] sm:$0xff]  ;;  %v3626_v61 = vld [vmem:[#allocation18 + $0xc0] sm:$0xff] }
 0x50e   : > { %3592 = vmatmul.mubr.f32.vlgmr.msra.gmra.mxu1 %v6172_v3  ;;  %3742 = vmatprep.subr.mxu0 %v3633_v9  ;;  %v3692_v3 = vld [vmem:[#allocation18 + $0x2d0] sm:$0xff]  ;;  %v3669_v9 = vld [vmem:[#allocation18 + $0x218] sm:$0xff] }
 0x50f   : > { %3743 = vmatpush1.msra.mxu0 %v3632_v10  ;;  %3813 = vmatprep.subr.mxu1 %v3697_v44  ;;  %v3602_v10 = vld [vmem:[#allocation18] sm:$0xff]  ;;  %v3664_v44 = vld [vmem:[#allocation18 + $0x1f0] sm:$0xff] }
 0x510   : > { %3744 = vmatprep.subr.mxu0 %v3631_v47  ;;  %3814 = vmatpush1.msra.mxu1 %v3696_v23  ;;  %v3668_v47 = vld [vmem:[#allocation18 + $0x210] sm:$0xff]  ;;  %v3666_v23 = vld [vmem:[#allocation18 + $0x200] sm:$0xff] }
 0x511   : > { %3745 = vmatpush1.msra.mxu0 %v3630_v12  ;;  %3815 = vmatprep.subr.mxu1 %v3695_v35  ;;  %v3665_v12 = vld [vmem:[#allocation18 + $0x1f8] sm:$0xff]  ;;  %v3663_v35 = vld [vmem:[#allocation18 + $0x1e8] sm:$0xff] }
 0x512   : > { %3746 = vmatprep.subr.mxu0 %v3629_v16  ;;  %3816 = vmatpush1.msra.mxu1 %v3694_v31  ;;  %v3667_v16 = vld [vmem:[#allocation18 + $0x208] sm:$0xff]  ;;  %v3662_v31 = vld [vmem:[#allocation18 + $0x1e0] sm:$0xff] }
 0x513   : > { %3747 = vmatpush1.msra.mxu0 %v3628_v39  ;;  %3817 = vmatprep.subr.mxu1 %v3693_v45  ;;  %v3729_v39 = vld [vmem:[#allocation18 + $0x3f8] sm:$0xff] }
 0x514   : > { %3748 = vmatprep.subr.mxu0 %v3627_v54  ;;  %3818 = vmatpush1.msra.mxu1 %v3692_v3  ;;  %v3728_v54 = vld [vmem:[#allocation18 + $0x3f0] sm:$0xff]  ;;  %v3661_v45 = vld [vmem:[#allocation18 + $0x1d8] sm:$0xff] }
 0x515   : > { %3749 = vmatpush1.msra.mxu0 %v3626_v61  ;;  %3819 = vmatprep.subr.mxu1 %v3691_v49  ;;  %v3727_v61 = vld [vmem:[#allocation18 + $0x3e8] sm:$0xff]  ;;  %v3660_v3 = vld [vmem:[#allocation18 + $0x1d0] sm:$0xff]  ;;  %v3905_v41 = vld [vmem:[#allocation21 + $0x98] sm:$0xff] }
 0x516   : > { %3750 = vmatprep.subr.mxu0 %v3625_v13  ;;  %3820 = vmatpush1.msra.mxu1 %v3690_v14  ;;  %v3726_v13 = vld [vmem:[#allocation18 + $0x3e0] sm:$0xff]  ;;  %v3659_v49 = vld [vmem:[#allocation18 + $0x1c8] sm:$0xff] }
 0x517   : > { %3751 = vmatpush1.msra.mxu0 %v3624_v5  ;;  %3821 = vmatprep.subr.mxu1 %v3689_v17  ;;  %v3725_v5 = vld [vmem:[#allocation18 + $0x3d8] sm:$0xff]  ;;  %v3658_v14 = vld [vmem:[#allocation18 + $0x1c0] sm:$0xff] }
 0x518   : > { %3752 = vmatprep.subr.mxu0 %v3623_v55  ;;  %3822 = vmatpush1.msra.mxu1 %v3688_v48  ;;  %v3724_v55 = vld [vmem:[#allocation18 + $0x3d0] sm:$0xff]  ;;  %v3657_v17 = vld [vmem:[#allocation18 + $0x1b8] sm:$0xff] }
 0x519   : > { %3753 = vmatpush1.msra.mxu0 %v3622_v32  ;;  %3823 = vmatprep.subr.mxu1 %v3687_v11  ;;  %v3723_v32 = vld [vmem:[#allocation18 + $0x3c8] sm:$0xff]  ;;  %v3656_v48 = vld [vmem:[#allocation18 + $0x1b0] sm:$0xff] }
 0x51a   : > { %3754 = vmatprep.subr.mxu0 %v3621_v56  ;;  %3824 = vmatpush1.msra.mxu1 %v3686_v25  ;;  %v3722_v56 = vld [vmem:[#allocation18 + $0x3c0] sm:$0xff]  ;;  %v3655_v11 = vld [vmem:[#allocation18 + $0x1a8] sm:$0xff] }
 0x51b   : > { %3755 = vmatpush1.msra.mxu0 %v3620_v18  ;;  %3825 = vmatprep.subr.mxu1 %v3685_v52  ;;  %v3721_v18 = vld [vmem:[#allocation18 + $0x3b8] sm:$0xff]  ;;  %v3654_v25 = vld [vmem:[#allocation18 + $0x1a0] sm:$0xff] }
 0x51c   : > { %3756 = vmatprep.subr.mxu0 %v3619_v28  ;;  %3826 = vmatpush1.msra.mxu1 %v3684_v15  ;;  %v3720_v28 = vld [vmem:[#allocation18 + $0x3b0] sm:$0xff]  ;;  %v3653_v52 = vld [vmem:[#allocation18 + $0x198] sm:$0xff] }
 0x51d   : > { %3757 = vmatpush1.msra.mxu0 %v3618_v7  ;;  %3827 = vmatprep.subr.mxu1 %v3683_v20  ;;  %v3719_v7 = vld [vmem:[#allocation18 + $0x3a8] sm:$0xff]  ;;  %v3652_v15 = vld [vmem:[#allocation18 + $0x190] sm:$0xff] }
 0x51e   : > { %3758 = vmatprep.subr.mxu0 %v3617_v40  ;;  %3828 = vmatpush1.msra.mxu1 %v3682_v27  ;;  %v3718_v40 = vld [vmem:[#allocation18 + $0x3a0] sm:$0xff]  ;;  %v3651_v20 = vld [vmem:[#allocation18 + $0x188] sm:$0xff] }
 0x51f   : > { %3759 = vmatpush1.msra.mxu0 %v3616_v38  ;;  %3829 = vmatprep.subr.mxu1 %v3681_v4  ;;  %v3717_v38 = vld [vmem:[#allocation18 + $0x398] sm:$0xff]  ;;  %v3650_v27 = vld [vmem:[#allocation18 + $0x180] sm:$0xff] }
 0x520   : > { %3760 = vmatprep.subr.mxu0 %v3615_v34  ;;  %3830 = vmatpush1.msra.mxu1 %v3680_v21  ;;  %v3716_v34 = vld [vmem:[#allocation18 + $0x390] sm:$0xff]  ;;  %v3649_v4 = vld [vmem:[#allocation18 + $0x178] sm:$0xff] }
 0x521   : > { %3761 = vmatpush1.msra.mxu0 %v3614_v43  ;;  %3831 = vmatprep.subr.mxu1 %v3679_v42  ;;  %v3715_v43 = vld [vmem:[#allocation18 + $0x388] sm:$0xff]  ;;  %v6194_v21 = vld [vmem:[#allocation16] sm:$0xf]  ;;  %v3714_v42 = vld [vmem:[#allocation18 + $0x380] sm:$0xff] }
 0x522   : > { %3762 = vmatprep.subr.mxu0 %v3613_v46  ;;  %3832 = vmatpush1.msra.mxu1 %v3678_v37  ;;  %v3648_v46 = vld [vmem:[#allocation18 + $0x170] sm:$0xff]  ;;  %v3713_v37 = vld [vmem:[#allocation18 + $0x378] sm:$0xff] }
 0x523   : > { %3763 = vmatpush1.msra.mxu0 %v3612_v0  ;;  %3833 = vmatprep.subr.mxu1 %v3677_v51  ;;  %v3647_v0 = vld [vmem:[#allocation18 + $0x168] sm:$0xff]  ;;  %v3646_v51 = vld [vmem:[#allocation18 + $0x160] sm:$0xff] }
 0x524   : > { %3764 = vmatprep.subr.mxu0 %v3611_v24  ;;  %3834 = vmatpush1.msra.mxu1 %v3676_v22  ;;  %v3096_v24 = vpop.f32.mrf.mxu0  ;;  %v2969_v22 = vrot.slane %v6194_v21, %v5877_v53 }
 0x525   : > { %3765 = vmatpush1.msra.mxu0 %v3610_v33  ;;  %3835 = vmatprep.subr.mxu1 %v3675_v19  ;;  %v3712_v33 = vld [vmem:[#allocation18 + $0x370] sm:$0xff]  ;;  %v3711_v19 = vld [vmem:[#allocation18 + $0x368] sm:$0xff] }
 0x526   : > { %3766 = vmatprep.subr.mxu0 %v3609_v58  ;;  %3836 = vmatpush1.msra.mxu1 %v3674_v63  ;;  %v3645_v58 = vld [vmem:[#allocation18 + $0x158] sm:$0xff]  ;;  %v3710_v63 = vld [vmem:[#allocation18 + $0x360] sm:$0xff] }
 0x527   : > { %3767 = vmatpush1.msra.mxu0 %v3608_v59  ;;  %3837 = vmatprep.subr.mxu1 %v3673_v1  ;;  %v3644_v59 = vld [vmem:[#allocation18 + $0x150] sm:$0xff]  ;;  %v3643_v1 = vld [vmem:[#allocation18 + $0x148] sm:$0xff] }
 0x528   : > { %3768 = vmatprep.subr.mxu0 %v3607_v29  ;;  %3838 = vmatpush1.msra.mxu1 %v3672_v2  ;;  %v2973_v29 = vrot.slane %v6194_v21, %v5883_v36  ;;  %v3167_v2 = vpop.f32.mrf.mxu1 }
 0x529   : > { %3769 = vmatpush1.msra.mxu0 %v3606_v30  ;;  %3839 = vmatprep.subr.mxu1 %v3671_v8  ;;  %v3709_v30 = vld [vmem:[#allocation18 + $0x358] sm:$0xff]  ;;  %v3642_v8 = vld [vmem:[#allocation18 + $0x140] sm:$0xff] }
 0x52a   : > { %3770 = vmatprep.subr.mxu0 %v3605_v57  ;;  %3840 = vmatpush1.msra.mxu1 %v3670_v60  ;;  %v3098_v57 = vpop.f32.mrf.mxu0  ;;  %v3097_v60 = vadd.f32 %v3096_v24, %v2969_v22  ;;  %v3912_v24 = vld [vmem:[#allocation21 + $0xd0] sm:$0xff]  ;;  %v3895_v22 = vld [vmem:[#allocation21 + $0x48] sm:$0xff] }
 0x52b   : > { %3771 = vmatpush1.msra.mxu0 %v3604_v26  ;;  %3841 = vmatprep.subr.mxu1 %v3669_v9  ;;  %v3708_v26 = vld [vmem:[#allocation18 + $0x350] sm:$0xff] }
 0x52c   : > { %3772 = vmatprep.subr.mxu0 %v3603_v50  ;;  %3842 = vmatpush1.msra.mxu1 %v3668_v47  ;;  %v3641_v50 = vld [vmem:[#allocation18 + $0x138] sm:$0xff]  ;;  %v3640_v9 = vld [vmem:[#allocation18 + $0x130] sm:$0xff]  ;;  %v3639_v47 = vld [vmem:[#allocation18 + $0x128] sm:$0xff] }
 0x52d   : > { %3773 = vmatpush1.msra.mxu0 %v3602_v10  ;;  %3843 = vmatprep.subr.mxu1 %v3667_v16  ;;  %v3099_v10 = vadd.f32 %v3098_v57, %v2973_v29  ;;  %v3638_v16 = vld [vmem:[#allocation18 + $0x120] sm:$0xff]  ;;  %v3908_v29 = vld [vmem:[#allocation21 + $0xb0] sm:$0xff] }
 0x52e   : > { %3774 = vmatprep.subr.mxu0 %v3665_v12  ;;  %3844 = vmatpush1.msra.mxu1 %v3666_v23  ;;  %v3169_v12 = vpop.f32.mrf.mxu1  ;;  %v3637_v23 = vld [vmem:[#allocation18 + $0x118] sm:$0xff]  ;;  %v3906_v57 = vld [vmem:[#allocation21 + $0xa0] sm:$0xff] }
 0x52f   : > { %3775 = vmatpush2.msra.mxu0 %v3664_v44  ;;  %3845 = vmatprep.subr.mxu1 %v3729_v39  ;;  %v3168_v44 = vadd.f32 %v3167_v2, %v3097_v60  ;;  %v3636_v39 = vld [vmem:[#allocation18 + $0x110] sm:$0xff]  ;;  %v2977_v60 = vrot.slane %v6194_v21, %v1324_v62 }
 0x530   : > { %3776 = vmatprep.subr.mxu0 %v3663_v35  ;;  %3846 = vmatpush2.msra.mxu1 %v3728_v54  ;;  %v3891_v2 = vld [vmem:[#allocation21 + $0x28] sm:$0xff] }
 0x531   : > { %3777 = vmatpush2.msra.mxu0 %v3662_v31  ;;  %3847 = vmatprep.subr.mxu1 %v3727_v61  ;;  %v3170_v31 = vadd.f32 %v3169_v12, %v3099_v10 }
 0x532   : > { %3778 = vmatprep.subr.mxu0 %v3661_v45  ;;  %3848 = vmatpush2.msra.mxu1 %v3726_v13  ;;  %v3635_v45 = vld [vmem:[#allocation18 + $0x108] sm:$0xff]  ;;  %v3634_v13 = vld [vmem:[#allocation18 + $0x100] sm:$0xff] }
 0x533   : > { %3779 = vmatpush2.msra.mxu0 %v3660_v3  ;;  %3849 = vmatprep.subr.mxu1 %v3725_v5 }
 0x534   : > { %3780 = vmatprep.subr.mxu0 %v3659_v49  ;;  %3850 = vmatpush2.msra.mxu1 %v3724_v55  ;;  %v3707_v55 = vld [vmem:[#allocation18 + $0x348] sm:$0xff] }
 0x535   : > { %3781 = vmatpush2.msra.mxu0 %v3658_v14  ;;  %3851 = vmatprep.subr.mxu1 %v3723_v32  ;;  %v3706_v32 = vld [vmem:[#allocation18 + $0x340] sm:$0xff] }
 0x536   : > { %3782 = vmatprep.subr.mxu0 %v3657_v17  ;;  %3852 = vmatpush2.msra.mxu1 %v3722_v56 }
 0x537   : > { %3783 = vmatpush2.msra.mxu0 %v3656_v48  ;;  %3853 = vmatprep.subr.mxu1 %v3721_v18  ;;  %v3705_v48 = vld [vmem:[#allocation18 + $0x338] sm:$0xff] }
 0x538   : > { %3784 = vmatprep.subr.mxu0 %v3655_v11  ;;  %3854 = vmatpush2.msra.mxu1 %v3720_v28  ;;  %v3704_v11 = vld [vmem:[#allocation18 + $0x330] sm:$0xff]  ;;  %v3702_v28 = vld [vmem:[#allocation18 + $0x320] sm:$0xff] }
 0x539   : > { %3785 = vmatpush2.msra.mxu0 %v3654_v25  ;;  %3855 = vmatprep.subr.mxu1 %v3719_v7  ;;  %v3703_v25 = vld [vmem:[#allocation18 + $0x328] sm:$0xff]  ;;  %v3700_v7 = vld [vmem:[#allocation18 + $0x310] sm:$0xff] }
 0x53a   : > { %3786 = vmatprep.subr.mxu0 %v3653_v52  ;;  %3856 = vmatpush2.msra.mxu1 %v3718_v40  ;;  %v3701_v52 = vld [vmem:[#allocation18 + $0x318] sm:$0xff]  ;;  %v3698_v40 = vld [vmem:[#allocation18 + $0x300] sm:$0xff] }
 0x53b   : > { %3787 = vmatpush2.msra.mxu0 %v3652_v15  ;;  %3857 = vmatprep.subr.mxu1 %v3717_v38  ;;  %v3699_v15 = vld [vmem:[#allocation18 + $0x308] sm:$0xff]  ;;  %v3901_v38 = vld [vmem:[#allocation21 + $0x78] sm:$0xff] }
 0x53c   : > { %3788 = vmatprep.subr.mxu0 %v3651_v20  ;;  %3858 = vmatpush2.msra.mxu1 %v3716_v34  ;;  %v3917_v20 = vld [vmem:[#allocation21 + $0xf8] sm:$0xff]  ;;  %v3900_v34 = vld [vmem:[#allocation21 + $0x70] sm:$0xff] }
 0x53d   : > { %3789 = vmatpush2.msra.mxu0 %v3650_v27  ;;  %3859 = vmatprep.subr.mxu1 %v3715_v43  ;;  %v3916_v27 = vld [vmem:[#allocation21 + $0xf0] sm:$0xff]  ;;  %v3899_v43 = vld [vmem:[#allocation21 + $0x68] sm:$0xff] }
 0x53e   : > { %3790 = vmatprep.subr.mxu0 %v3649_v4  ;;  %3860 = vmatpush2.msra.mxu1 %v3714_v42  ;;  %v3915_v4 = vld [vmem:[#allocation21 + $0xe8] sm:$0xff]  ;;  %v3898_v42 = vld [vmem:[#allocation21 + $0x60] sm:$0xff] }
 0x53f   : > { %3791 = vmatpush2.msra.mxu0 %v3648_v46  ;;  %3861 = vmatprep.subr.mxu1 %v3713_v37  ;;  %v3914_v46 = vld [vmem:[#allocation21 + $0xe0] sm:$0xff]  ;;  %v3897_v37 = vld [vmem:[#allocation21 + $0x58] sm:$0xff] }
 0x540   : > { %3792 = vmatprep.subr.mxu0 %v3647_v0  ;;  %3862 = vmatpush2.msra.mxu1 %v3712_v33  ;;  %v3913_v0 = vld [vmem:[#allocation21 + $0xd8] sm:$0xff]  ;;  %v3911_v33 = vld [vmem:[#allocation21 + $0xc8] sm:$0xff] }
 0x541   : > { %3793 = vmatpush2.msra.mxu0 %v3646_v51  ;;  %3863 = vmatprep.subr.mxu1 %v3711_v19  ;;  %v3896_v51 = vld [vmem:[#allocation21 + $0x50] sm:$0xff]  ;;  %v3894_v19 = vld [vmem:[#allocation21 + $0x40] sm:$0xff] }
 0x542   : > { %3794 = vmatprep.subr.mxu0 %v3645_v58  ;;  %3864 = vmatpush2.msra.mxu1 %v3710_v63  ;;  %v3910_v58 = vld [vmem:[#allocation21 + $0xc0] sm:$0xff]  ;;  %v3893_v63 = vld [vmem:[#allocation21 + $0x38] sm:$0xff] }
 0x543   : > { %3795 = vmatpush2.msra.mxu0 %v3644_v59  ;;  %3865 = vmatprep.subr.mxu1 %v3709_v30  ;;  %v3909_v59 = vld [vmem:[#allocation21 + $0xb8] sm:$0xff]  ;;  %v3907_v30 = vld [vmem:[#allocation21 + $0xa8] sm:$0xff] }
 0x544   : > { %3796 = vmatprep.subr.mxu0 %v3643_v1  ;;  %3866 = vmatpush2.msra.mxu1 %v3708_v26  ;;  %v3892_v1 = vld [vmem:[#allocation21 + $0x30] sm:$0xff] }
 0x545   : > { %3797 = vmatpush2.msra.mxu0 %v3642_v8  ;;  %3867 = vmatprep.subr.mxu1 %v3707_v55  ;;  %v3890_v8 = vld [vmem:[#allocation21 + $0x20] sm:$0xff]  ;;  %v3887_v55 = vld [vmem:[#allocation21 + $0x8] sm:$0xff] }
 0x546   : > { %3798 = vmatprep.subr.mxu0 %v3641_v50  ;;  %3868 = vmatpush2.msra.mxu1 %v3706_v32  ;;  %v2981_v50 = vrot.slane %v6194_v21, %v1328_v6  ;;  %v3889_v6 = vld [vmem:[#allocation21 + $0x18] sm:$0xff]  ;;  %v3904_v21 = vld [vmem:[#allocation21 + $0x90] sm:$0xff]  ;;  %v3886_v32 = vld [vmem:[#allocation21] sm:$0xff] }
 0x547   : > { %3799 = vmatpush2.msra.mxu0 %v3640_v9  ;;  %3869 = vmatprep.subr.mxu1 %v3705_v48  ;;  %v3730_v48 = vld [vmem:[#allocation19] sm:$0x3] }
 0x548   : > { %3800 = vmatprep.subr.mxu0 %v3639_v47  ;;  %3870 = vmatpush2.msra.mxu1 %v3704_v11  ;;  %v3735_v11 = vrot.slane %v3730_v48, %v5877_v53 }
 0x549   : > { %v3238_v35 = vpop.f32.mrf.mxu0  ;;  %3801 = vmatpush2.msra.mxu0 %v3638_v16  ;;  %3871 = vmatprep.subr.mxu1 %v3703_v25 }
 0x54a   : > { %v3239_v54 = vadd.f32 %v3238_v35, %v3168_v44  ;;  %3802 = vmatprep.subr.mxu0 %v3637_v23  ;;  %3872 = vmatpush2.msra.mxu1 %v3702_v28 }
 0x54b   : > { %v3309_v61 = vpop.f32.mrf.mxu1  ;;  %v3240_v3 = vpop.f32.mrf.mxu0  ;;  %3803 = vmatpush2.msra.mxu0 %v3636_v39  ;;  %3873 = vmatprep.subr.mxu1 %v3701_v52 }
 0x54c   : > { %v3241_v49 = vadd.f32 %v3240_v3, %v3170_v31  ;;  %v3310_v5 = vadd.f32 %v3309_v61, %v3239_v54  ;;  %3804 = vmatprep.subr.mxu0 %v3635_v45  ;;  %3874 = vmatpush2.msra.mxu1 %v3700_v7 }
 0x54d   : > { %v3311_v14 = vpop.f32.mrf.mxu1  ;;  %3805 = vmatpush2.msra.mxu0 %v3634_v13  ;;  %3875 = vmatprep.subr.mxu1 %v3699_v15 }
 0x54e   : > { %v3312_v17 = vadd.f32 %v3311_v14, %v3241_v49  ;;  %v3598_v18 = vmax.f32 %v3310_v5, 0.0  ;;  %3876 = vmatpush2.msra.mxu1 %v3698_v40  ;;  %4326 = vmatprep.subr.mxu0 %v3917_v20  ;;  %v3888_v5 = vld [vmem:[#allocation21 + $0x10] sm:$0xff]  ;;  %v3903_v14 = vld [vmem:[#allocation21 + $0x88] sm:$0xff] }
 0x550   : > { %v3599_v56 = vmax.f32 %v3312_v17, 0.0  ;;  %v3902_v17 = vld [vmem:[#allocation21 + $0x80] sm:$0xff] }
 0x552   : > { %3806 = vmatprep.mubr.f32.mxu0 %v3599_v56 }
 0x553   : > { %3807 = vmatmul.mubr.f32.vlgmr.msra.gmra.mxu0 %v3598_v18  ;;  %v3739_v18 = vrot.slane %v3730_v48, %v5883_v36 }
 0x554   : > { %4327 = vmatpush3.msra.mxu0 %v3901_v38 }
 0x555   : > { %4328 = vmatprep.subr.mxu0 %v3916_v27 }
 0x556   : > { %4329 = vmatpush3.msra.mxu0 %v3900_v34 }
 0x557   : > { %4330 = vmatprep.subr.mxu0 %v3915_v4  ;;  %v4279_v4 = vld [vmem:[#allocation22] ss:$0 sm:$0xff] }
 0x558   : > { %4331 = vmatpush3.msra.mxu0 %v3899_v43 }
 0x559   : > { %4332 = vmatprep.subr.mxu0 %v3914_v46 }
 0x55a   : > { %4333 = vmatpush3.msra.mxu0 %v3898_v42 }
 0x55b   : > { %4334 = vmatprep.subr.mxu0 %v3913_v0 }
 0x55c   : > { %4335 = vmatpush3.msra.mxu0 %v3897_v37 }
 0x55d   : > { %4336 = vmatprep.subr.mxu0 %v3912_v24 }
 0x55e   : > { %4337 = vmatpush3.msra.mxu0 %v3896_v51 }
 0x55f   : > { %4338 = vmatprep.subr.mxu0 %v3911_v33 }
 0x560   : > { %4339 = vmatpush3.msra.mxu0 %v3895_v22 }
 0x561   : > { %4340 = vmatprep.subr.mxu0 %v3910_v58 }
 0x562   : > { %4341 = vmatpush3.msra.mxu0 %v3894_v19 }
 0x563   : > { %4342 = vmatprep.subr.mxu0 %v3909_v59 }
 0x564   : > { %4343 = vmatpush3.msra.mxu0 %v3893_v63 }
 0x565   : > { %4344 = vmatprep.subr.mxu0 %v3908_v29 }
 0x566   : > { %4345 = vmatpush3.msra.mxu0 %v3892_v1 }
 0x567   : > { %4346 = vmatprep.subr.mxu0 %v3907_v30 }
 0x568   : > { %4347 = vmatpush3.msra.mxu0 %v3891_v2 }
 0x569   : > { %4348 = vmatprep.subr.mxu0 %v3906_v57 }
 0x56a   : > { %4349 = vmatpush3.msra.mxu0 %v3890_v8 }
 0x56b   : > { %4350 = vmatprep.subr.mxu0 %v3905_v41 }
 0x56c   : > { %4351 = vmatpush3.msra.mxu0 %v3889_v6 }
 0x56d   : > { %4352 = vmatprep.subr.mxu0 %v3904_v21 }
 0x56e   : > { %4353 = vmatpush3.msra.mxu0 %v3888_v5 }
 0x56f   : > { %4354 = vmatprep.subr.mxu0 %v3903_v14 }
 0x570   : > { %4355 = vmatpush3.msra.mxu0 %v3887_v55 }
 0x571   : > { %4356 = vmatprep.subr.mxu0 %v3902_v17 }
 0x572   : > { %4357 = vmatpush3.msra.mxu0 %v3886_v32 }
 0x58b   : > { %v3380_v26 = vpop.f32.mrf.mxu0 }
 0x58c   : > { %v3381_v47 = vadd.f32 %v3380_v26, %v2977_v60 }
 0x58d   : > { %v3451_v9 = vpop.f32.mrf.mxu1  ;;  %v3382_v10 = vpop.f32.mrf.mxu0 }
 0x58e   : > { %v3383_v12 = vadd.f32 %v3382_v10, %v2981_v50  ;;  %v3452_v44 = vadd.f32 %v3451_v9, %v3381_v47 }
 0x58f   : > { %v3453_v16 = vpop.f32.mrf.mxu1 }
 0x590   : > { %v3454_v39 = vadd.f32 %v3453_v16, %v3383_v12 }
 0x5cd   : > { %v3522_v23 = vpop.f32.mrf.mxu0 }
 0x5ce   : > { %v3593_v35 = vpop.f32.mrf.mxu1  ;;  %v3523_v31 = vadd.f32 %v3522_v23, %v3452_v44 }
 0x5cf   : > { %v3524_v54 = vpop.f32.mrf.mxu0 }
 0x5d0   : > { %v3525_v45 = vadd.f32 %v3524_v54, %v3454_v39  ;;  %v3594_v61 = vadd.f32 %v3593_v35, %v3523_v31  ;;  %v3595_v3 = vpop.f32.mrf.mxu1 }
 0x5d2   : > { %v3596_v13 = vadd.f32 %v3595_v3, %v3525_v45  ;;  %v3600_v49 = vmax.f32 %v3594_v61, 0.0 }
 0x5d4   : > { %v3601_v62 = vmax.f32 %v3596_v13, 0.0 }
 0x5d6   : > { %3877 = vmatprep.mubr.f32.mxu1 %v3601_v62 }
 0x5d7   : > { %3878 = vmatmul.mubr.f32.vlgmr.msra.gmra.mxu1 %v3600_v49 }
 0x613   : > { %v3808_v56 = vpop.f32.mrf.mxu0 }
 0x614   : > { %v3809_v28 = vadd.f32 %v3808_v56, %v3735_v11 }
 0x615   : > { %v3810_v25 = vpop.f32.mrf.mxu0 }
 0x616   : > { %v3811_v7 = vadd.f32 %v3810_v25, %v3739_v18 }
 0x697   : > { %v3879_v52 = vpop.f32.mrf.mxu1 }
 0x698   : > { %v3880_v15 = vadd.f32 %v3879_v52, %v3809_v28 }
 0x699   : > { %v3881_v40 = vpop.f32.mrf.mxu1 }
 0x69a   : > { %v3882_v20 = vadd.f32 %v3881_v40, %v3811_v7  ;;  %v3884_v27 = vmax.f32 %v3880_v15, 0.0 }
 0x69c   : > { %v3885_v38 = vmax.f32 %v3882_v20, 0.0 }
 0x69e   : > { %3989 = vmatprep.mubr.f32.mxu0 %v3885_v38 }
 0x69f   : > { %3990 = vmatmul.mubr.f32.vlgmr.msra.gmra.mxu0 %v3884_v27 }
 0x75f   : > { %v4358_v34 = vpop.f32.mrf.mxu0 }
 0x761   : > { %v4359_v43 = vpop.f32.mrf.mxu0 }
 0x762   : > { %v4360_v46 = vadd.f32 %v4359_v43, %v4358_v34 }
 0x764   : > { %v3992_v42 = vadd.f32 %v4360_v46, %v4279_v4 }
 0x766   : > { %3995 = vst [vmem:[%s712_s0] sm:$0x3] %v3992_v42 }
 0x767 PF: > { %s6329_s20 = sld [smem:[#allocation36_spill]]  ;;  %s4010_s21 = sshll.u32 %s712_s0, 4  ;;  %s4011_s21 = int_to_ptr.vmem [resolvable:$true] %s4010_s21 }
 0x768   : > { %s6330_s18 = sld [smem:[#allocation48_spill]]  ;;  %s3997_s3 = scalar_lea.sflag [#allocation6], %s710_s19 }
 0x769   : > { %s4992_s27 = scalar_lea.vmem %s4011_s21, 32  ;;  %p6331_p11 = scmp.ne.s32.totalorder %s6306_s14, 0 }
 0x76a   : > { %p4993_p12 = scmp.ne.s32.totalorder %s4011_s21, %s4992_s27  ;;  %s5153_s28 = smov [#allocation24]  }
 0x76b   : > { %s4996_s15 = sshll.u32 %s5153_s28, 4  ;;  %s4997_s15 = int_to_ptr.vmem [resolvable:$false] %s4996_s15 }
 0x76c   : > { %p4994_p13 = pnand %p4993_p12, %p6331_p11  ;;  %s4998_s30 = scalar_lea.vmem %s4997_s15, 64 }
 0x76d   : > { %s4281_s13 = sshll.u32 %s6329_s20, 5  ;;  %p4999_p3 = scmp.lt.s32.totalorder %s4011_s21, %s4997_s15 }
 0x76e   : > { %s4008_s2 = scalar_lea.hbm %s6330_s18, %s4281_s13  ;;  %p4995_p1 = pneg %p4994_p13 }
 0x76f   : > { %p5000_p2 = scmp.lt.s32.totalorder %s4998_s30, %s4992_s27 }
 0x771   : > { %p5001_p0 = por %p5000_p2, %p4999_p3 }
 0x773   : > { %p5002_p4 = pnand %p5001_p0, %p4995_p1 }
 0x775   : > { %5005 = shalt.err (!%p5002_p4)
}
 0x776   : > { %s5006_s24 = scalar_lea.hbm %s4008_s2, 32  ;;  %s5010_s0 = scalar_lea.hbm %s6330_s18, 64 }
 0x777   : > { %p5007_p8 = scmp.ne.s32.totalorder %s4008_s2, %s5006_s24  ;;  %p5011_p6 = scmp.lt.s32.totalorder %s4008_s2, %s6330_s18 }
 0x778   : > { %p5012_p10 = scmp.lt.s32.totalorder %s5010_s0, %s5006_s24 }
 0x779   : > { %p5008_p9 = pnand %p5007_p8, %p6331_p11 }
 0x77a   : > { %p5013_p7 = por %p5012_p10, %p5011_p6 }
 0x77b   : > { %p5009_p5 = pneg %p5008_p9 }
 0x77d   : > { %p5014_p12 = pnand %p5013_p7, %p5009_p5 }
 0x77f   : > { %5017 = shalt.err (!%p5014_p12)
}
 0x780   : > { %4507 = dma.vmem_to_hbm [thread:$0]  (%p6331_p11), %s4011_s21, 32, %s4008_s2, %s3997_s3  }
 0x781 PF: > { %s6332_s22 = sld [smem:[#allocation41_spill]]  ;;  %p4574_p13 = scmp.ge.s32.totalorder %s5128_s17, 2 }
 0x782   : > { %s4022_s23 = sand.u32 1, %s5092_s25  }
 0x783   : > { %s4023_s27 = scalar_lea.sflag [#allocation6], %s4022_s23 }
 0x787   : > { %p6333_p1 = scmp.ne.s32.totalorder %s6332_s22, 0 }
 0x789   : > { %p4547_p3 = pnand %p4574_p13, %p6333_p1 }
 0x78b   : > { %p4548_p2 = pneg %p4547_p3 }
 0x78d   : > { %5087 = dma.done.wait (%p4548_p2), %s4023_s27, 32  }
 0x78e   : > { %5089 = vsyncadd (%p4548_p2), %s4023_s27, 4294967264  ;;  %s33_s17 = sadd.s32 1, %s5128_s17   ;;  %s6334_s28 = sld [smem:[#allocation33_spill]] }
 0x78f   : > { %p30_p0 = scmp.ge.s32.totalorder %s33_s17, 10   ;;  %s6335_s27 = sld [smem:[#allocation42_spill]] }
 0x790   : > { %s6336_s14 = sld [smem:[#allocation43_spill]]  ;;  %s6340_s25 = smov %s5096_s26 }
 0x791   : > { %s6337_s30 = sld [smem:[#allocation37_spill]] }
 0x792   : > { %s6338_s15 = sld [smem:[#allocation38_spill]] }
 0x793   : > { %s6339_s2 = sld [smem:[#allocation40_spill]] }
 0x794   : > { %s6341_s26 = smov %s6334_s28  ;;  %s6342_s28 = smov %s5108_s29 }
 0x795   :  { %32 = sbr.rel (!%p30_p0) target bundleno = 19 (0x13), region = 207 }
 0x796   : > { %s6343_s29 = smov %s6336_s14  ;;  %s6344_s14 = smov %s5124_s16 }
 0x799   : > { %s6345_s16 = smov %s6339_s2 }
 0x79a   :  { %4028 = vsyncpa [#allocation5], 1 }
 0x79b   :  { %4030 = vsyncpa [#allocation5 + $0x1], 1 }
 0x79c   :  { %4031 = vsyncpa [#allocation8], 1 }
 0x79d   :  { %4032 = vsyncpa [#allocation11], 1 }
 0x79e   :  { %4033 = vsyncpa [#allocation14], 1 }
 0x79f   :  { %4034 = vsyncpa [#allocation17], 1 }
 0x7a0   :  { %4035 = vsyncpa [#allocation20], 1 }
 0x7a1   :  { %4036 = vsyncpa [#allocation23], 1 }
 0x7a2   :  { %4037 = vsyncpa [#allocation6], 1 }
 0x7a3   :  { %4039 = vsyncpa [#allocation6 + $0x1], 1 }

</bundles_post_ra>
